<compile_context>
chip_gen: v7x
topology: tpu7x:2x2x1
jax: 0.10.0
libtpu: 0.0.40
codegen_flags: <defaults>
</compile_context>

<pallas_src>
import functools

import jax
import jax.numpy as jnp
from jax import lax
from jax.experimental import pallas as pl
from jax.experimental.pallas import tpu as pltpu

EPS = 1e-5
N_FILT = 100                     # out_channels per conv kernel
KSIZES = (3, 5, 7)
TAPS = sum(KSIZES)               # 15 real taps
TAPS_PAD = 16                    # padded to a sublane multiple
CH_PAD = 128                     # per-kernel channels padded to one lane tile
C_TOT = N_FILT * len(KSIZES)     # 300 real channels
C_PAD = CH_PAD * len(KSIZES)     # 384 lane-dense channels
LANE = 128
# tap offsets into the 3-padded signal for k = 3, 5, 7 ("same" padding = (k-1)//2)
OFFSETS = (2, 3, 4,  1, 2, 3, 4, 5,  0, 1, 2, 3, 4, 5, 6)


def _ceil_to(n, m):
    return ((n + m - 1) // m) * m


# ----------------------------- fused kernel ----------------------------------

def make_fused_kernel(B, TP, n_cls, n_dec):
    """Grid axis 0 tiles the L//2 pooled positions (K dim of the W1 matmul)."""
    TPB = TP * B

    def kernel(*refs):
        p_ref, wc_ref, bc_ref, w1_ref, b1_ref, g_ref, be_ref = refs[:7]
        i = 7
        cls_w = refs[i:i + n_cls]; i += n_cls          # HBM (pl.ANY) bf16 weights
        cls_b = refs[i:i + n_cls]; i += n_cls          # VMEM f32 biases
        dec_w = refs[i:i + n_dec]; i += n_dec
        dec_b = refs[i:i + n_dec]; i += n_dec
        emb_ref, rec_ref, cls_ref = refs[i:i + 3]; i += 3
        acc_ref, wbuf_ref, dma_sem = refs[i:i + 3]

        k = pl.program_id(0)

        @pl.when(k == 0)
        def _init():
            acc_ref[...] = jnp.zeros_like(acc_ref)

        # -- MultiKernelConv1d: ONE stacked-tap matmul over both MaxPool parities,
        #    then parity max (sublane-aligned halves), bias added once, ReLU.
        p = p_ref[...].reshape(2 * TPB, TAPS_PAD)                 # bf16
        y = jnp.dot(p, wc_ref[...], preferred_element_type=jnp.float32)
        y = jnp.maximum(y[:TPB], y[TPB:]) + bc_ref[...]           # pool + bias once
        pooled = jnp.maximum(y, 0.0)                              # ReLU, f32
        pooled = pooled.astype(jnp.bfloat16).reshape(TP, B, C_PAD)

        # -- first-Linear partial contraction for this K tile: one batched matmul
        #    over all TP positions (no per-position unroll), reduced over positions.
        part = jnp.einsum("tbc,tce->tbe", pooled, w1_ref[...],
                          preferred_element_type=jnp.float32)
        acc_ref[...] += jnp.sum(part, axis=0)

        # -- epilogue: bias + BatchNorm1d (batch stats) + both MLP heads ----------
        @pl.when(k == pl.num_programs(0) - 1)
        def _epilogue():
            y1 = acc_ref[...] + b1_ref[...]
            mean = jnp.mean(y1, axis=0, keepdims=True)
            var = jnp.mean((y1 - mean) ** 2, axis=0, keepdims=True)
            e = g_ref[...] * (y1 - mean) * lax.rsqrt(var + EPS) + be_ref[...]
            emb_ref[...] = e

            # Head weights live in HBM; stream each layer through one max-size VMEM
            # buffer so nothing stays (double-buffered) resident during the K loop.
            def run_head(h, w_refs, b_refs, out_ref):
                n = len(w_refs)
                for li in range(n):
                    fi, fo = w_refs[li].shape
                    cp = pltpu.make_async_copy(w_refs[li],
                                               wbuf_ref.at[:fi, :fo], dma_sem)
                    cp.start()
                    cp.wait()
                    h = jnp.dot(h.astype(jnp.bfloat16), wbuf_ref[:fi, :fo],
                                preferred_element_type=jnp.float32) + b_refs[li][...]
                    if li < n - 1:
                        h = jnp.maximum(h, 0.0)
                out_ref[...] = h

            run_head(e, cls_w, cls_b, cls_ref)
            run_head(e, dec_w, dec_b, rec_ref)

    return kernel


# ----------------------------- wrapper ----------------------------------------

def _full_spec(shape):
    nd = len(shape)
    return pl.BlockSpec(shape, lambda k, _nd=nd: (0,) * _nd)


def _vmem_capacity_bytes():
    try:
        info = pltpu.get_tpu_info()
        for name in ("vmem_capacity_bytes", "vmem_size_bytes", "vmem_bytes"):
            v = getattr(info, name, None)
            if v:
                return int(v)
    except Exception:
        pass
    return 64 << 20          # conservative (v7x-sized) fallback


def _choose_tp(L2, emb, B, tile_pair_budget_bytes):
    """Largest divisor of L2 (preferring multiples of 8) whose double-buffered
    W1 + P tile fits the per-tile byte budget."""
    per_pos = C_PAD * emb * 2 + 2 * B * TAPS_PAD * 2          # bf16 W1 + P per position
    divisors = [d for d in range(1, L2 + 1) if L2 % d == 0]
    fits = [d for d in divisors if 2 * d * per_pos <= tile_pair_budget_bytes]
    pool = fits if fits else divisors[:1]
    aligned = [d for d in pool if d % 8 == 0 or d == L2]
    return max(aligned if aligned else pool)


def simplenet_forward(x, params, L, emb_dim, num_classes):
    B = x.shape[0]
    assert L % 2 == 0, "MaxPool1d(2) parity split requires even L"
    L2 = L // 2

    # generation-aware VMEM budget -> K-tile size
    vmem_cap = _vmem_capacity_bytes()
    vmem_ceiling = int(vmem_cap * 0.80)
    tile_pair_budget = max(2 << 20, min(vmem_ceiling // 3, 48 << 20))
    TP = _choose_tp(L2, emb_dim, B, tile_pair_budget)
    KT = L2 // TP

    # im2col patches, ordered (parity, pooled_pos, batch, tap), stored bf16.
    xs = x[:, 0, :].astype(jnp.float32)
    xpad = jnp.pad(xs, ((0, 0), (3, 3)))
    A = jnp.stack([xpad[:, o:o + L] for o in OFFSETS], axis=-1)        # (B, L, 15)
    A = jnp.pad(A, ((0, 0), (0, 0), (0, TAPS_PAD - TAPS)))             # (B, L, 16)
    P = A.reshape(B, L2, 2, TAPS_PAD).transpose(2, 1, 0, 3)            # (2, L2, B, 16)
    P = P.astype(jnp.bfloat16)

    bf = lambda a: a.astype(jnp.bfloat16)
    cls_layers = params["classifier"]
    dec_layers = params["decoder"]
    n_cls, n_dec = len(cls_layers), len(dec_layers)
    cls_ws = [bf(w) for w, _ in cls_layers]; cls_bs = [b for _, b in cls_layers]
    dec_ws = [bf(w) for w, _ in dec_layers]; dec_bs = [b for _, b in dec_layers]

    max_fi = _ceil_to(max(w.shape[0] for w in cls_ws + dec_ws), 16)
    max_fo = _ceil_to(max(w.shape[1] for w in cls_ws + dec_ws), LANE)
    cls_pad = cls_ws[-1].shape[1]                                      # lane-dense outs
    rec_pad = dec_ws[-1].shape[1]

    args = ([P, bf(params["Wc"]), params["bc"], bf(params["W1"]),
             params["b1"], params["gamma"], params["beta"]]
            + cls_ws + cls_bs + dec_ws + dec_bs)

    in_specs = [
        pl.BlockSpec((2, TP, B, TAPS_PAD), lambda k: (0, k, 0, 0)),    # P K-tile
        _full_spec((TAPS_PAD, C_PAD)),                                 # Wc
        _full_spec((1, C_PAD)),                                        # bc
        pl.BlockSpec((TP, C_PAD, emb_dim), lambda k: (k, 0, 0)),       # W1 K-tile
        _full_spec((1, emb_dim)),                                      # b1
        _full_spec((1, emb_dim)),                                      # gamma
        _full_spec((1, emb_dim)),                                      # beta
    ]
    in_specs += [pl.BlockSpec(memory_space=pl.ANY) for _ in cls_ws]    # heads in HBM
    in_specs += [_full_spec(b.shape) for b in cls_bs]
    in_specs += [pl.BlockSpec(memory_space=pl.ANY) for _ in dec_ws]
    in_specs += [_full_spec(b.shape) for b in dec_bs]

    out_shape = (jax.ShapeDtypeStruct((B, emb_dim), jnp.float32),
                 jax.ShapeDtypeStruct((B, rec_pad), jnp.float32),
                 jax.ShapeDtypeStruct((B, cls_pad), jnp.float32))
    out_specs = [_full_spec((B, emb_dim)),
                 _full_spec((B, rec_pad)),
                 _full_spec((B, cls_pad))]

    # resident VMEM estimate (blocked inputs/outputs counted double-buffered)
    resident = 0
    resident += 2 * 2 * TP * B * TAPS_PAD * 2                          # P tile
    resident += 2 * TAPS_PAD * C_PAD * 2                               # Wc
    resident += 2 * C_PAD * 4                                          # bc
    resident += 2 * TP * C_PAD * emb_dim * 2                           # W1 tile
    resident += 2 * 3 * emb_dim * 4                                    # b1/gamma/beta
    resident += 2 * sum(int(b.size) * 4 for b in cls_bs + dec_bs)      # head biases
    resident += 2 * B * (emb_dim + rec_pad + cls_pad) * 4              # outputs
    resident += B * emb_dim * 4 + max_fi * max_fo * 2                  # acc + stream buf
    vmem_limit = int(min(vmem_ceiling, max(32 << 20, 2 * resident)))

    emb_o, rec_o, cls_o = pl.pallas_call(
        make_fused_kernel(B, TP, n_cls, n_dec),
        out_shape=out_shape,
        grid_spec=pltpu.PrefetchScalarGridSpec(
            num_scalar_prefetch=0,
            grid=(KT,),
            in_specs=in_specs,
            out_specs=out_specs,
            scratch_shapes=[
                pltpu.VMEM((B, emb_dim), jnp.float32),         # first-Linear accumulator
                pltpu.VMEM((max_fi, max_fo), jnp.bfloat16),    # head-weight stream buffer
                pltpu.SemaphoreType.DMA,                       # its DMA semaphore
            ],
        ),
        compiler_params=pltpu.CompilerParams(
            dimension_semantics=("arbitrary",),
            vmem_limit_bytes=vmem_limit,
        ),
    )(*args)

    return emb_o, rec_o[:, :L][:, None, :], cls_o[:, :num_classes]


# ----------------------------- parameters -------------------------------------

def init_params(key, L, emb, num_classes):
    L2 = L // 2
    keys = jax.random.split(key, 4)

    # MultiKernelConv1d as one stacked-tap weight (taps padded to 16, each
    # kernel's 100 channels padded to a 128-lane block -> C_PAD = 384).
    Wc = jnp.zeros((TAPS_PAD, C_PAD), jnp.float32)
    bc = jnp.zeros((1, C_PAD), jnp.float32)
    ckeys = jax.random.split(keys[0], len(KSIZES))
    t0 = 0
    for g, ks in enumerate(KSIZES):
        kw, kb = jax.random.split(ckeys[g])
        bound = 1.0 / (ks ** 0.5)                    # Conv1d default, fan_in = 1*ks
        w = jax.random.uniform(kw, (N_FILT, ks), jnp.float32, -bound, bound)
        b = jax.random.uniform(kb, (N_FILT,), jnp.float32, -bound, bound)
        c0 = g * CH_PAD
        Wc = Wc.at[t0:t0 + ks, c0:c0 + N_FILT].set(w.T)
        bc = bc.at[0, c0:c0 + N_FILT].set(b)
        t0 += ks

    # first Linear: fan_in = L//2 * 300; stored (L2, C_PAD, emb) in the
    # position-major / padded-channel flatten ordering used by the kernel.
    kw, kb = jax.random.split(keys[1])
    bound = 1.0 / ((L2 * C_TOT) ** 0.5)
    w1 = jax.random.uniform(kw, (L2, len(KSIZES), N_FILT, emb), jnp.float32,
                            -bound, bound)
    W1 = jnp.pad(w1, ((0, 0), (0, 0), (0, CH_PAD - N_FILT), (0, 0)))
    W1 = W1.reshape(L2, C_PAD, emb)
    b1 = jax.random.uniform(kb, (1, emb), jnp.float32, -bound, bound)

    gamma = jnp.ones((1, emb), jnp.float32)          # BatchNorm1d affine init
    beta = jnp.zeros((1, emb), jnp.float32)

    def linear_init(k, fi, fo, fi_pad, fo_pad):
        kw_, kb_ = jax.random.split(k)
        bnd = 1.0 / (fi ** 0.5)
        w = jax.random.uniform(kw_, (fi, fo), jnp.float32, -bnd, bnd)
        b = jax.random.uniform(kb_, (1, fo), jnp.float32, -bnd, bnd)
        W = jnp.zeros((fi_pad, fo_pad), jnp.float32).at[:fi, :fo].set(w)
        Bv = jnp.zeros((1, fo_pad), jnp.float32).at[:, :fo].set(b)
        return W, Bv

    def mlp_init(k, dims):
        ks = jax.random.split(k, len(dims) - 1)
        layers = []
        for i in range(len(dims) - 1):
            fi, fo = dims[i], dims[i + 1]
            fi_pad = fi if i == 0 else _ceil_to(fi, LANE)   # hidden dims lane-padded
            fo_pad = _ceil_to(fo, LANE)
            layers.append(linear_init(ks[i], fi, fo, fi_pad, fo_pad))
        return layers

    e = emb
    classifier = mlp_init(keys[2],
                          [e, 2 * e, 4 * e, 8 * e, 16 * e, 32 * e, 500, num_classes])
    decoder = mlp_init(keys[3],
                       [e, 2 * e, 4 * e, 8 * e, 16 * e, 32 * e, L // 4, L // 2, L])

    return dict(Wc=Wc, bc=bc, W1=W1, b1=b1, gamma=gamma, beta=beta,
                classifier=classifier, decoder=decoder)


# ----------------------------- pure-JAX reference ------------------------------

def simplenet_reference(x, params, L, emb, num_classes):
    """Pure-JAX forward using the same bf16-matmul / f32-accumulate recipe."""
    B = x.shape[0]
    L2 = L // 2
    bf = lambda a: a.astype(jnp.bfloat16)

    xs = x[:, 0, :].astype(jnp.float32)
    xpad = jnp.pad(xs, ((0, 0), (3, 3)))
    A = jnp.stack([xpad[:, o:o + L] for o in OFFSETS], axis=-1)
    A = jnp.pad(A, ((0, 0), (0, 0), (0, TAPS_PAD - TAPS)))             # (B, L, 16)
    y = jnp.dot(bf(A.reshape(B * L, TAPS_PAD)), bf(params["Wc"]),
                preferred_element_type=jnp.float32) + params["bc"]
    y = jnp.maximum(y, 0.0).reshape(B, L2, 2, C_PAD)
    pooled = jnp.max(y, axis=2)                                        # (B, L2, C_PAD)

    feats = bf(pooled).reshape(B, L2 * C_PAD)
    w1 = bf(params["W1"]).reshape(L2 * C_PAD, emb)
    y1 = jnp.dot(feats, w1, preferred_element_type=jnp.float32) + params["b1"]
    mean = jnp.mean(y1, axis=0, keepdims=True)
    var = jnp.mean((y1 - mean) ** 2, axis=0, keepdims=True)
    e = params["gamma"] * (y1 - mean) * lax.rsqrt(var + EPS) + params["beta"]

    def chain(h, layers):
        n = len(layers)
        for i, (w, b) in enumerate(layers):
            h = jnp.dot(bf(h), bf(w), preferred_element_type=jnp.float32) + b
            if i < n - 1:
                h = jnp.maximum(h, 0.0)
        return h

    cls = chain(e, params["classifier"])[:, :num_classes]
    rec = chain(e, params["decoder"])[:, :L]
    return e, rec[:, None, :], cls


# ----------------------------- main --------------------------------------------

if __name__ == "__main__":
    B, L, EMB, NUM_CLASSES = 2, 32, 8, 4
    key = jax.random.PRNGKey(0)
    pkey, xkey = jax.random.split(key)
    params = init_params(pkey, L, EMB, NUM_CLASSES)
    x = jax.random.normal(xkey, (B, 1, L), dtype=jnp.float32)

    fwd = jax.jit(functools.partial(simplenet_forward, L=L, emb_dim=EMB,
                                    num_classes=NUM_CLASSES))
    emb, rec, cls = fwd(x, params)
    jax.block_until_ready((emb, rec, cls))

    assert emb.shape == (B, EMB), emb.shape
    assert rec.shape == (B, 1, L), rec.shape
    assert cls.shape == (B, NUM_CLASSES), cls.shape
    for a in (emb, rec, cls):
        assert bool(jnp.all(jnp.isfinite(a)))

    emb_r, rec_r, cls_r = simplenet_reference(x, params, L, EMB, NUM_CLASSES)
    assert bool(jnp.allclose(emb, emb_r, atol=3e-2, rtol=3e-2))
    assert bool(jnp.allclose(rec, rec_r, atol=3e-2, rtol=3e-2))
    assert bool(jnp.allclose(cls, cls_r, atol=3e-2, rtol=3e-2))

    print("KERNEL_OK")
</pallas_src>

<mosaic_0001>
module attributes {stable_mosaic.version = 11 : i64} {
  func.func @kernel(%arg0: i32, %arg1: memref<2x16x2x16xbf16, #tpu.memory_space<vmem>>, %arg2: memref<16x384xbf16, #tpu.memory_space<vmem>>, %arg3: memref<1x384xf32, #tpu.memory_space<vmem>>, %arg4: memref<16x384x8xbf16, #tpu.memory_space<vmem>>, %arg5: memref<1x8xf32, #tpu.memory_space<vmem>>, %arg6: memref<1x8xf32, #tpu.memory_space<vmem>>, %arg7: memref<1x8xf32, #tpu.memory_space<vmem>>, %arg8: memref<8x128xbf16, #tpu.memory_space<any>>, %arg9: memref<128x128xbf16, #tpu.memory_space<any>>, %arg10: memref<128x128xbf16, #tpu.memory_space<any>>, %arg11: memref<128x128xbf16, #tpu.memory_space<any>>, %arg12: memref<128x256xbf16, #tpu.memory_space<any>>, %arg13: memref<256x512xbf16, #tpu.memory_space<any>>, %arg14: memref<512x128xbf16, #tpu.memory_space<any>>, %arg15: memref<1x128xf32, #tpu.memory_space<vmem>>, %arg16: memref<1x128xf32, #tpu.memory_space<vmem>>, %arg17: memref<1x128xf32, #tpu.memory_space<vmem>>, %arg18: memref<1x128xf32, #tpu.memory_space<vmem>>, %arg19: memref<1x256xf32, #tpu.memory_space<vmem>>, %arg20: memref<1x512xf32, #tpu.memory_space<vmem>>, %arg21: memref<1x128xf32, #tpu.memory_space<vmem>>, %arg22: memref<8x128xbf16, #tpu.memory_space<any>>, %arg23: memref<128x128xbf16, #tpu.memory_space<any>>, %arg24: memref<128x128xbf16, #tpu.memory_space<any>>, %arg25: memref<128x128xbf16, #tpu.memory_space<any>>, %arg26: memref<128x256xbf16, #tpu.memory_space<any>>, %arg27: memref<256x128xbf16, #tpu.memory_space<any>>, %arg28: memref<128x128xbf16, #tpu.memory_space<any>>, %arg29: memref<128x128xbf16, #tpu.memory_space<any>>, %arg30: memref<1x128xf32, #tpu.memory_space<vmem>>, %arg31: memref<1x128xf32, #tpu.memory_space<vmem>>, %arg32: memref<1x128xf32, #tpu.memory_space<vmem>>, %arg33: memref<1x128xf32, #tpu.memory_space<vmem>>, %arg34: memref<1x256xf32, #tpu.memory_space<vmem>>, %arg35: memref<1x128xf32, #tpu.memory_space<vmem>>, %arg36: memref<1x128xf32, #tpu.memory_space<vmem>>, %arg37: memref<1x128xf32, #tpu.memory_space<vmem>>, %arg38: memref<2x8xf32, #tpu.memory_space<vmem>>, %arg39: memref<2x128xf32, #tpu.memory_space<vmem>>, %arg40: memref<2x128xf32, #tpu.memory_space<vmem>>, %arg41: memref<2x8xf32, #tpu.memory_space<vmem>>, %arg42: memref<512x512xbf16, #tpu.memory_space<vmem>>, %arg43: memref<!tpu.dma_semaphore, #tpu.memory_space<semaphore_mem>>) attributes {dimension_semantics = [#tpu.dimension_semantics<arbitrary>], iteration_bounds = array<i64: 1>, scalar_prefetch = 0 : i64, scratch_operands = 3 : i64, tpu.core_type = #tpu.core_type<tc>, window_params = [{transform_indices = @transform_0, window_bounds = array<i64: 2, 16, 2, 16>}, {pipeline_mode = #tpu.pipeline_mode<synchronous>, transform_indices = @transform_1, window_bounds = array<i64: 16, 384>}, {pipeline_mode = #tpu.pipeline_mode<synchronous>, transform_indices = @transform_2, window_bounds = array<i64: 1, 384>}, {transform_indices = @transform_3, window_bounds = array<i64: 16, 384, 8>}, {pipeline_mode = #tpu.pipeline_mode<synchronous>, transform_indices = @transform_4, window_bounds = array<i64: 1, 8>}, {pipeline_mode = #tpu.pipeline_mode<synchronous>, transform_indices = @transform_5, window_bounds = array<i64: 1, 8>}, {pipeline_mode = #tpu.pipeline_mode<synchronous>, transform_indices = @transform_6, window_bounds = array<i64: 1, 8>}, {}, {}, {}, {}, {}, {}, {}, {pipeline_mode = #tpu.pipeline_mode<synchronous>, transform_indices = @transform_14, window_bounds = array<i64: 1, 128>}, {pipeline_mode = #tpu.pipeline_mode<synchronous>, transform_indices = @transform_15, window_bounds = array<i64: 1, 128>}, {pipeline_mode = #tpu.pipeline_mode<synchronous>, transform_indices = @transform_16, window_bounds = array<i64: 1, 128>}, {pipeline_mode = #tpu.pipeline_mode<synchronous>, transform_indices = @transform_17, window_bounds = array<i64: 1, 128>}, {pipeline_mode = #tpu.pipeline_mode<synchronous>, transform_indices = @transform_18, window_bounds = array<i64: 1, 256>}, {pipeline_mode = #tpu.pipeline_mode<synchronous>, transform_indices = @transform_19, window_bounds = array<i64: 1, 512>}, {pipeline_mode = #tpu.pipeline_mode<synchronous>, transform_indices = @transform_20, window_bounds = array<i64: 1, 128>}, {}, {}, {}, {}, {}, {}, {}, {}, {pipeline_mode = #tpu.pipeline_mode<synchronous>, transform_indices = @transform_29, window_bounds = array<i64: 1, 128>}, {pipeline_mode = #tpu.pipeline_mode<synchronous>, transform_indices = @transform_30, window_bounds = array<i64: 1, 128>}, {pipeline_mode = #tpu.pipeline_mode<synchronous>, transform_indices = @transform_31, window_bounds = array<i64: 1, 128>}, {pipeline_mode = #tpu.pipeline_mode<synchronous>, transform_indices = @transform_32, window_bounds = array<i64: 1, 128>}, {pipeline_mode = #tpu.pipeline_mode<synchronous>, transform_indices = @transform_33, window_bounds = array<i64: 1, 256>}, {pipeline_mode = #tpu.pipeline_mode<synchronous>, transform_indices = @transform_34, window_bounds = array<i64: 1, 128>}, {pipeline_mode = #tpu.pipeline_mode<synchronous>, transform_indices = @transform_35, window_bounds = array<i64: 1, 128>}, {pipeline_mode = #tpu.pipeline_mode<synchronous>, transform_indices = @transform_36, window_bounds = array<i64: 1, 128>}, {pipeline_mode = #tpu.pipeline_mode<synchronous>, transform_indices = @transform_37, window_bounds = array<i64: 2, 8>}, {pipeline_mode = #tpu.pipeline_mode<synchronous>, transform_indices = @transform_38, window_bounds = array<i64: 2, 128>}, {pipeline_mode = #tpu.pipeline_mode<synchronous>, transform_indices = @transform_39, window_bounds = array<i64: 2, 128>}]} {
    %c0_i32 = arith.constant 0 : i32
    %0 = arith.cmpi eq, %arg0, %c0_i32 : i32
    %1 = arith.extui %0 : i1 to i32
    %c0_i32_0 = arith.constant 0 : i32
    %2 = arith.cmpi ne, %1, %c0_i32_0 : i32
    scf.if %2 {
      %cst_20 = arith.constant 0.000000e+00 : f32
      %26 = vector.broadcast %cst_20 : f32 to vector<2x8xf32>
      %c0_21 = arith.constant 0 : index
      %c0_22 = arith.constant 0 : index
      %27 = vector.load %arg41[%c0_21, %c0_22] : memref<2x8xf32, #tpu.memory_space<vmem>>, vector<2x8xf32>
      tpu.vector_store %arg41[%c0_21, %c0_22], %26 {strides = array<i32>} : memref<2x8xf32, #tpu.memory_space<vmem>>, vector<2x8xf32>,
    } else {
    }
    %c0 = arith.constant 0 : index
    %c0_1 = arith.constant 0 : index
    %c0_2 = arith.constant 0 : index
    %c0_3 = arith.constant 0 : index
    %3 = vector.load %arg1[%c0, %c0_1, %c0_2, %c0_3] : memref<2x16x2x16xbf16, #tpu.memory_space<vmem>>, vector<2x16x2x16xbf16>
    %4 = vector.shape_cast %3 : vector<2x16x2x16xbf16> to vector<64x16xbf16>
    %c0_4 = arith.constant 0 : index
    %c0_5 = arith.constant 0 : index
    %5 = vector.load %arg2[%c0_4, %c0_5] : memref<16x384xbf16, #tpu.memory_space<vmem>>, vector<16x384xbf16>
    %cst = arith.constant dense<0.000000e+00> : vector<64x384xf32>
    %6 = tpu.matmul %4, %5, %cst {dimension_numbers = #tpu.dot_dimension_numbers<[1], [0], [0], [1], [0, 0, 1, 1], [], []>} : vector<64x16xbf16>, vector<16x384xbf16>, vector<64x384xf32> -> vector<64x384xf32>
    %7 = vector.extract_strided_slice %6 {offsets = [0, 0], sizes = [32, 384], strides = [1, 1]} : vector<64x384xf32> to vector<32x384xf32>
    %8 = vector.extract_strided_slice %6 {offsets = [32, 0], sizes = [32, 384], strides = [1, 1]} : vector<64x384xf32> to vector<32x384xf32>
    %9 = arith.maximumf %7, %8 : vector<32x384xf32>
    %c0_6 = arith.constant 0 : index
    %c0_7 = arith.constant 0 : index
    %10 = vector.load %arg3[%c0_6, %c0_7] : memref<1x384xf32, #tpu.memory_space<vmem>>, vector<1x384xf32>
    %11 = vector.broadcast %10 : vector<1x384xf32> to vector<32x384xf32>
    %12 = arith.addf %9, %11 : vector<32x384xf32>
    %cst_8 = arith.constant 0.000000e+00 : f32
    %13 = vector.broadcast %cst_8 : f32 to vector<32x384xf32>
    %14 = arith.maximumf %12, %13 : vector<32x384xf32>
    %15 = arith.truncf %14 : vector<32x384xf32> to vector<32x384xbf16>
    %16 = vector.shape_cast %15 : vector<32x384xbf16> to vector<16x2x384xbf16>
    %c0_9 = arith.constant 0 : index
    %c0_10 = arith.constant 0 : index
    %c0_11 = arith.constant 0 : index
    %17 = vector.load %arg4[%c0_9, %c0_10, %c0_11] : memref<16x384x8xbf16, #tpu.memory_space<vmem>>, vector<16x384x8xbf16>
    "tpu.trace_start"() <{level = 10 : i32, message = "tbc,tce->tbe"}> : () -> ()
    %cst_12 = arith.constant dense<0.000000e+00> : vector<16x2x8xf32>
    %18 = tpu.matmul %16, %17, %cst_12 {dimension_numbers = #tpu.dot_dimension_numbers<[2], [1], [1], [2], [0, 0, 0, 1, 1, 2], [0], [0]>} : vector<16x2x384xbf16>, vector<16x384x8xbf16>, vector<16x2x8xf32> -> vector<16x2x8xf32>
    "tpu.trace_stop"() : () -> ()
    %c0_13 = arith.constant 0 : index
    %c0_14 = arith.constant 0 : index
    %19 = vector.load %arg41[%c0_13, %c0_14] : memref<2x8xf32, #tpu.memory_space<vmem>>, vector<2x8xf32>
    %cst_15 = arith.constant dense<0.000000e+00> : vector<2x8xf32>
    %20 = vector.multi_reduction <add>, %18, %cst_15 [0] : vector<16x2x8xf32> to vector<2x8xf32>
    %21 = arith.addf %19, %20 : vector<2x8xf32>
    %c0_16 = arith.constant 0 : index
    %c0_17 = arith.constant 0 : index
    %22 = vector.load %arg41[%c0_16, %c0_17] : memref<2x8xf32, #tpu.memory_space<vmem>>, vector<2x8xf32>
    tpu.vector_store %arg41[%c0_16, %c0_17], %21 {strides = array<i32>} : memref<2x8xf32, #tpu.memory_space<vmem>>, vector<2x8xf32>,
    %c0_i32_18 = arith.constant 0 : i32
    %23 = arith.cmpi eq, %arg0, %c0_i32_18 : i32
    %24 = arith.extui %23 : i1 to i32
    %c0_i32_19 = arith.constant 0 : i32
    %25 = arith.cmpi ne, %24, %c0_i32_19 : i32
    scf.if %25 {
      %c0_20 = arith.constant 0 : index
      %c0_21 = arith.constant 0 : index
      %26 = vector.load %arg41[%c0_20, %c0_21] : memref<2x8xf32, #tpu.memory_space<vmem>>, vector<2x8xf32>
      %c0_22 = arith.constant 0 : index
      %c0_23 = arith.constant 0 : index
      %27 = vector.load %arg5[%c0_22, %c0_23] : memref<1x8xf32, #tpu.memory_space<vmem>>, vector<1x8xf32>
      %28 = vector.broadcast %27 : vector<1x8xf32> to vector<2x8xf32>
      %29 = arith.addf %26, %28 : vector<2x8xf32>
      %cst_24 = arith.constant dense<0.000000e+00> : vector<8xf32>
      %30 = vector.multi_reduction <add>, %29, %cst_24 [0] : vector<2x8xf32> to vector<8xf32>
      %31 = vector.shape_cast %30 : vector<8xf32> to vector<1x8xf32>
      %cst_25 = arith.constant 2.000000e+00 : f32
      %32 = vector.broadcast %cst_25 : f32 to vector<1x8xf32>
      %33 = arith.divf %31, %32 : vector<1x8xf32>
      %34 = vector.broadcast %33 : vector<1x8xf32> to vector<2x8xf32>
      %35 = arith.subf %29, %34 : vector<2x8xf32>
      %36 = arith.mulf %35, %35 : vector<2x8xf32>
      %cst_26 = arith.constant dense<0.000000e+00> : vector<8xf32>
      %37 = vector.multi_reduction <add>, %36, %cst_26 [0] : vector<2x8xf32> to vector<8xf32>
      %38 = vector.shape_cast %37 : vector<8xf32> to vector<1x8xf32>
      %cst_27 = arith.constant 2.000000e+00 : f32
      %39 = vector.broadcast %cst_27 : f32 to vector<1x8xf32>
      %40 = arith.divf %38, %39 : vector<1x8xf32>
      %c0_28 = arith.constant 0 : index
      %c0_29 = arith.constant 0 : index
      %41 = vector.load %arg6[%c0_28, %c0_29] : memref<1x8xf32, #tpu.memory_space<vmem>>, vector<1x8xf32>
      %42 = vector.broadcast %33 : vector<1x8xf32> to vector<2x8xf32>
      %43 = arith.subf %29, %42 : vector<2x8xf32>
      %44 = vector.broadcast %41 : vector<1x8xf32> to vector<2x8xf32>
      %45 = arith.mulf %44, %43 : vector<2x8xf32>
      %cst_30 = arith.constant 9.99999974E-6 : f32
      %46 = vector.broadcast %cst_30 : f32 to vector<1x8xf32>
      %47 = arith.addf %40, %46 : vector<1x8xf32>
      %48 = math.rsqrt %47 : vector<1x8xf32>
      %49 = vector.broadcast %48 : vector<1x8xf32> to vector<2x8xf32>
      %50 = arith.mulf %45, %49 : vector<2x8xf32>
      %c0_31 = arith.constant 0 : index
      %c0_32 = arith.constant 0 : index
      %51 = vector.load %arg7[%c0_31, %c0_32] : memref<1x8xf32, #tpu.memory_space<vmem>>, vector<1x8xf32>
      %52 = vector.broadcast %51 : vector<1x8xf32> to vector<2x8xf32>
      %53 = arith.addf %50, %52 : vector<2x8xf32>
      %c0_33 = arith.constant 0 : index
      %c0_34 = arith.constant 0 : index
      %54 = vector.load %arg38[%c0_33, %c0_34] : memref<2x8xf32, #tpu.memory_space<vmem>>, vector<2x8xf32>
      tpu.vector_store %arg38[%c0_33, %c0_34], %53 {strides = array<i32>} : memref<2x8xf32, #tpu.memory_space<vmem>>, vector<2x8xf32>,
      %c0_i32_35 = arith.constant 0 : i32
      %c0_i32_36 = arith.constant 0 : i32
      %55 = tpu.memref_slice %arg42[%c0_i32_35, %c0_i32_36] : memref<512x512xbf16, #tpu.memory_space<vmem>> -> memref<8x128xbf16, #tpu.memory_space<vmem>>
      tpu.enqueue_dma source(%arg8 : memref<8x128xbf16, #tpu.memory_space<any>>) target(%55 : memref<8x128xbf16, #tpu.memory_space<vmem>>) target_semaphore(%arg43 : memref<!tpu.dma_semaphore, #tpu.memory_space<semaphore_mem>>)
      %c0_i32_37 = arith.constant 0 : i32
      %c0_i32_38 = arith.constant 0 : i32
      %56 = tpu.memref_slice %arg42[%c0_i32_37, %c0_i32_38] : memref<512x512xbf16, #tpu.memory_space<vmem>> -> memref<8x128xbf16, #tpu.memory_space<vmem>>
      tpu.wait_dma2 semaphore(%arg43 : memref<!tpu.dma_semaphore, #tpu.memory_space<semaphore_mem>>) src(%arg8 : memref<8x128xbf16, #tpu.memory_space<any>>) dst(%56 : memref<8x128xbf16, #tpu.memory_space<vmem>>)
      %57 = arith.truncf %53 : vector<2x8xf32> to vector<2x8xbf16>
      %c0_39 = arith.constant 0 : index
      %c0_40 = arith.constant 0 : index
      %58 = vector.load %arg42[%c0_39, %c0_40] : memref<512x512xbf16, #tpu.memory_space<vmem>>, vector<8x128xbf16>
      %cst_41 = arith.constant dense<0.000000e+00> : vector<2x128xf32>
      %59 = tpu.matmul %57, %58, %cst_41 {dimension_numbers = #tpu.dot_dimension_numbers<[1], [0], [0], [1], [0, 0, 1, 1], [], []>} : vector<2x8xbf16>, vector<8x128xbf16>, vector<2x128xf32> -> vector<2x128xf32>
      %c0_42 = arith.constant 0 : index
      %c0_43 = arith.constant 0 : index
      %60 = vector.load %arg15[%c0_42, %c0_43] : memref<1x128xf32, #tpu.memory_space<vmem>>, vector<1x128xf32>
      %61 = vector.broadcast %60 : vector<1x128xf32> to vector<2x128xf32>
      %62 = arith.addf %59, %61 : vector<2x128xf32>
      %cst_44 = arith.constant 0.000000e+00 : f32
      %63 = vector.broadcast %cst_44 : f32 to vector<2x128xf32>
      %64 = arith.maximumf %62, %63 : vector<2x128xf32>
      %c0_i32_45 = arith.constant 0 : i32
      %c0_i32_46 = arith.constant 0 : i32
      %65 = tpu.memref_slice %arg42[%c0_i32_45, %c0_i32_46] : memref<512x512xbf16, #tpu.memory_space<vmem>> -> memref<128x128xbf16, #tpu.memory_space<vmem>>
      tpu.enqueue_dma source(%arg9 : memref<128x128xbf16, #tpu.memory_space<any>>) target(%65 : memref<128x128xbf16, #tpu.memory_space<vmem>>) target_semaphore(%arg43 : memref<!tpu.dma_semaphore, #tpu.memory_space<semaphore_mem>>)
      %c0_i32_47 = arith.constant 0 : i32
      %c0_i32_48 = arith.constant 0 : i32
      %66 = tpu.memref_slice %arg42[%c0_i32_47, %c0_i32_48] : memref<512x512xbf16, #tpu.memory_space<vmem>> -> memref<128x128xbf16, #tpu.memory_space<vmem>>
      tpu.wait_dma2 semaphore(%arg43 : memref<!tpu.dma_semaphore, #tpu.memory_space<semaphore_mem>>) src(%arg9 : memref<128x128xbf16, #tpu.memory_space<any>>) dst(%66 : memref<128x128xbf16, #tpu.memory_space<vmem>>)
      %67 = arith.truncf %64 : vector<2x128xf32> to vector<2x128xbf16>
      %c0_49 = arith.constant 0 : index
      %c0_50 = arith.constant 0 : index
      %68 = vector.load %arg42[%c0_49, %c0_50] : memref<512x512xbf16, #tpu.memory_space<vmem>>, vector<128x128xbf16>
      %cst_51 = arith.constant dense<0.000000e+00> : vector<2x128xf32>
      %69 = tpu.matmul %67, %68, %cst_51 {dimension_numbers = #tpu.dot_dimension_numbers<[1], [0], [0], [1], [0, 0, 1, 1], [], []>} : vector<2x128xbf16>, vector<128x128xbf16>, vector<2x128xf32> -> vector<2x128xf32>
      %c0_52 = arith.constant 0 : index
      %c0_53 = arith.constant 0 : index
      %70 = vector.load %arg16[%c0_52, %c0_53] : memref<1x128xf32, #tpu.memory_space<vmem>>, vector<1x128xf32>
      %71 = vector.broadcast %70 : vector<1x128xf32> to vector<2x128xf32>
      %72 = arith.addf %69, %71 : vector<2x128xf32>
      %cst_54 = arith.constant 0.000000e+00 : f32
      %73 = vector.broadcast %cst_54 : f32 to vector<2x128xf32>
      %74 = arith.maximumf %72, %73 : vector<2x128xf32>
      %c0_i32_55 = arith.constant 0 : i32
      %c0_i32_56 = arith.constant 0 : i32
      %75 = tpu.memref_slice %arg42[%c0_i32_55, %c0_i32_56] : memref<512x512xbf16, #tpu.memory_space<vmem>> -> memref<128x128xbf16, #tpu.memory_space<vmem>>
      tpu.enqueue_dma source(%arg10 : memref<128x128xbf16, #tpu.memory_space<any>>) target(%75 : memref<128x128xbf16, #tpu.memory_space<vmem>>) target_semaphore(%arg43 : memref<!tpu.dma_semaphore, #tpu.memory_space<semaphore_mem>>)
      %c0_i32_57 = arith.constant 0 : i32
      %c0_i32_58 = arith.constant 0 : i32
      %76 = tpu.memref_slice %arg42[%c0_i32_57, %c0_i32_58] : memref<512x512xbf16, #tpu.memory_space<vmem>> -> memref<128x128xbf16, #tpu.memory_space<vmem>>
      tpu.wait_dma2 semaphore(%arg43 : memref<!tpu.dma_semaphore, #tpu.memory_space<semaphore_mem>>) src(%arg10 : memref<128x128xbf16, #tpu.memory_space<any>>) dst(%76 : memref<128x128xbf16, #tpu.memory_space<vmem>>)
      %77 = arith.truncf %74 : vector<2x128xf32> to vector<2x128xbf16>
      %c0_59 = arith.constant 0 : index
      %c0_60 = arith.constant 0 : index
      %78 = vector.load %arg42[%c0_59, %c0_60] : memref<512x512xbf16, #tpu.memory_space<vmem>>, vector<128x128xbf16>
      %cst_61 = arith.constant dense<0.000000e+00> : vector<2x128xf32>
      %79 = tpu.matmul %77, %78, %cst_61 {dimension_numbers = #tpu.dot_dimension_numbers<[1], [0], [0], [1], [0, 0, 1, 1], [], []>} : vector<2x128xbf16>, vector<128x128xbf16>, vector<2x128xf32> -> vector<2x128xf32>
      %c0_62 = arith.constant 0 : index
      %c0_63 = arith.constant 0 : index
      %80 = vector.load %arg17[%c0_62, %c0_63] : memref<1x128xf32, #tpu.memory_space<vmem>>, vector<1x128xf32>
      %81 = vector.broadcast %80 : vector<1x128xf32> to vector<2x128xf32>
      %82 = arith.addf %79, %81 : vector<2x128xf32>
      %cst_64 = arith.constant 0.000000e+00 : f32
      %83 = vector.broadcast %cst_64 : f32 to vector<2x128xf32>
      %84 = arith.maximumf %82, %83 : vector<2x128xf32>
      %c0_i32_65 = arith.constant 0 : i32
      %c0_i32_66 = arith.constant 0 : i32
      %85 = tpu.memref_slice %arg42[%c0_i32_65, %c0_i32_66] : memref<512x512xbf16, #tpu.memory_space<vmem>> -> memref<128x128xbf16, #tpu.memory_space<vmem>>
      tpu.enqueue_dma source(%arg11 : memref<128x128xbf16, #tpu.memory_space<any>>) target(%85 : memref<128x128xbf16, #tpu.memory_space<vmem>>) target_semaphore(%arg43 : memref<!tpu.dma_semaphore, #tpu.memory_space<semaphore_mem>>)
      %c0_i32_67 = arith.constant 0 : i32
      %c0_i32_68 = arith.constant 0 : i32
      %86 = tpu.memref_slice %arg42[%c0_i32_67, %c0_i32_68] : memref<512x512xbf16, #tpu.memory_space<vmem>> -> memref<128x128xbf16, #tpu.memory_space<vmem>>
      tpu.wait_dma2 semaphore(%arg43 : memref<!tpu.dma_semaphore, #tpu.memory_space<semaphore_mem>>) src(%arg11 : memref<128x128xbf16, #tpu.memory_space<any>>) dst(%86 : memref<128x128xbf16, #tpu.memory_space<vmem>>)
      %87 = arith.truncf %84 : vector<2x128xf32> to vector<2x128xbf16>
      %c0_69 = arith.constant 0 : index
      %c0_70 = arith.constant 0 : index
      %88 = vector.load %arg42[%c0_69, %c0_70] : memref<512x512xbf16, #tpu.memory_space<vmem>>, vector<128x128xbf16>
      %cst_71 = arith.constant dense<0.000000e+00> : vector<2x128xf32>
      %89 = tpu.matmul %87, %88, %cst_71 {dimension_numbers = #tpu.dot_dimension_numbers<[1], [0], [0], [1], [0, 0, 1, 1], [], []>} : vector<2x128xbf16>, vector<128x128xbf16>, vector<2x128xf32> -> vector<2x128xf32>
      %c0_72 = arith.constant 0 : index
      %c0_73 = arith.constant 0 : index
      %90 = vector.load %arg18[%c0_72, %c0_73] : memref<1x128xf32, #tpu.memory_space<vmem>>, vector<1x128xf32>
      %91 = vector.broadcast %90 : vector<1x128xf32> to vector<2x128xf32>
      %92 = arith.addf %89, %91 : vector<2x128xf32>
      %cst_74 = arith.constant 0.000000e+00 : f32
      %93 = vector.broadcast %cst_74 : f32 to vector<2x128xf32>
      %94 = arith.maximumf %92, %93 : vector<2x128xf32>
      %c0_i32_75 = arith.constant 0 : i32
      %c0_i32_76 = arith.constant 0 : i32
      %95 = tpu.memref_slice %arg42[%c0_i32_75, %c0_i32_76] : memref<512x512xbf16, #tpu.memory_space<vmem>> -> memref<128x256xbf16, #tpu.memory_space<vmem>>
      tpu.enqueue_dma source(%arg12 : memref<128x256xbf16, #tpu.memory_space<any>>) target(%95 : memref<128x256xbf16, #tpu.memory_space<vmem>>) target_semaphore(%arg43 : memref<!tpu.dma_semaphore, #tpu.memory_space<semaphore_mem>>)
      %c0_i32_77 = arith.constant 0 : i32
      %c0_i32_78 = arith.constant 0 : i32
      %96 = tpu.memref_slice %arg42[%c0_i32_77, %c0_i32_78] : memref<512x512xbf16, #tpu.memory_space<vmem>> -> memref<128x256xbf16, #tpu.memory_space<vmem>>
      tpu.wait_dma2 semaphore(%arg43 : memref<!tpu.dma_semaphore, #tpu.memory_space<semaphore_mem>>) src(%arg12 : memref<128x256xbf16, #tpu.memory_space<any>>) dst(%96 : memref<128x256xbf16, #tpu.memory_space<vmem>>)
      %97 = arith.truncf %94 : vector<2x128xf32> to vector<2x128xbf16>
      %c0_79 = arith.constant 0 : index
      %c0_80 = arith.constant 0 : index
      %98 = vector.load %arg42[%c0_79, %c0_80] : memref<512x512xbf16, #tpu.memory_space<vmem>>, vector<128x256xbf16>
      %cst_81 = arith.constant dense<0.000000e+00> : vector<2x256xf32>
      %99 = tpu.matmul %97, %98, %cst_81 {dimension_numbers = #tpu.dot_dimension_numbers<[1], [0], [0], [1], [0, 0, 1, 1], [], []>} : vector<2x128xbf16>, vector<128x256xbf16>, vector<2x256xf32> -> vector<2x256xf32>
      %c0_82 = arith.constant 0 : index
      %c0_83 = arith.constant 0 : index
      %100 = vector.load %arg19[%c0_82, %c0_83] : memref<1x256xf32, #tpu.memory_space<vmem>>, vector<1x256xf32>
      %101 = vector.broadcast %100 : vector<1x256xf32> to vector<2x256xf32>
      %102 = arith.addf %99, %101 : vector<2x256xf32>
      %cst_84 = arith.constant 0.000000e+00 : f32
      %103 = vector.broadcast %cst_84 : f32 to vector<2x256xf32>
      %104 = arith.maximumf %102, %103 : vector<2x256xf32>
      %c0_i32_85 = arith.constant 0 : i32
      %c0_i32_86 = arith.constant 0 : i32
      %105 = tpu.memref_slice %arg42[%c0_i32_85, %c0_i32_86] : memref<512x512xbf16, #tpu.memory_space<vmem>> -> memref<256x512xbf16, #tpu.memory_space<vmem>>
      tpu.enqueue_dma source(%arg13 : memref<256x512xbf16, #tpu.memory_space<any>>) target(%105 : memref<256x512xbf16, #tpu.memory_space<vmem>>) target_semaphore(%arg43 : memref<!tpu.dma_semaphore, #tpu.memory_space<semaphore_mem>>)
      %c0_i32_87 = arith.constant 0 : i32
      %c0_i32_88 = arith.constant 0 : i32
      %106 = tpu.memref_slice %arg42[%c0_i32_87, %c0_i32_88] : memref<512x512xbf16, #tpu.memory_space<vmem>> -> memref<256x512xbf16, #tpu.memory_space<vmem>>
      tpu.wait_dma2 semaphore(%arg43 : memref<!tpu.dma_semaphore, #tpu.memory_space<semaphore_mem>>) src(%arg13 : memref<256x512xbf16, #tpu.memory_space<any>>) dst(%106 : memref<256x512xbf16, #tpu.memory_space<vmem>>)
      %107 = arith.truncf %104 : vector<2x256xf32> to vector<2x256xbf16>
      %c0_89 = arith.constant 0 : index
      %c0_90 = arith.constant 0 : index
      %108 = vector.load %arg42[%c0_89, %c0_90] : memref<512x512xbf16, #tpu.memory_space<vmem>>, vector<256x512xbf16>
      %cst_91 = arith.constant dense<0.000000e+00> : vector<2x512xf32>
      %109 = tpu.matmul %107, %108, %cst_91 {dimension_numbers = #tpu.dot_dimension_numbers<[1], [0], [0], [1], [0, 0, 1, 1], [], []>} : vector<2x256xbf16>, vector<256x512xbf16>, vector<2x512xf32> -> vector<2x512xf32>
      %c0_92 = arith.constant 0 : index
      %c0_93 = arith.constant 0 : index
      %110 = vector.load %arg20[%c0_92, %c0_93] : memref<1x512xf32, #tpu.memory_space<vmem>>, vector<1x512xf32>
      %111 = vector.broadcast %110 : vector<1x512xf32> to vector<2x512xf32>
      %112 = arith.addf %109, %111 : vector<2x512xf32>
      %cst_94 = arith.constant 0.000000e+00 : f32
      %113 = vector.broadcast %cst_94 : f32 to vector<2x512xf32>
      %114 = arith.maximumf %112, %113 : vector<2x512xf32>
      %c0_i32_95 = arith.constant 0 : i32
      %c0_i32_96 = arith.constant 0 : i32
      %115 = tpu.memref_slice %arg42[%c0_i32_95, %c0_i32_96] : memref<512x512xbf16, #tpu.memory_space<vmem>> -> memref<512x128xbf16, #tpu.memory_space<vmem>>
      tpu.enqueue_dma source(%arg14 : memref<512x128xbf16, #tpu.memory_space<any>>) target(%115 : memref<512x128xbf16, #tpu.memory_space<vmem>>) target_semaphore(%arg43 : memref<!tpu.dma_semaphore, #tpu.memory_space<semaphore_mem>>)
      %c0_i32_97 = arith.constant 0 : i32
      %c0_i32_98 = arith.constant 0 : i32
      %116 = tpu.memref_slice %arg42[%c0_i32_97, %c0_i32_98] : memref<512x512xbf16, #tpu.memory_space<vmem>> -> memref<512x128xbf16, #tpu.memory_space<vmem>>
      tpu.wait_dma2 semaphore(%arg43 : memref<!tpu.dma_semaphore, #tpu.memory_space<semaphore_mem>>) src(%arg14 : memref<512x128xbf16, #tpu.memory_space<any>>) dst(%116 : memref<512x128xbf16, #tpu.memory_space<vmem>>)
      %117 = arith.truncf %114 : vector<2x512xf32> to vector<2x512xbf16>
      %c0_99 = arith.constant 0 : index
      %c0_100 = arith.constant 0 : index
      %118 = vector.load %arg42[%c0_99, %c0_100] : memref<512x512xbf16, #tpu.memory_space<vmem>>, vector<512x128xbf16>
      %cst_101 = arith.constant dense<0.000000e+00> : vector<2x128xf32>
      %119 = tpu.matmul %117, %118, %cst_101 {dimension_numbers = #tpu.dot_dimension_numbers<[1], [0], [0], [1], [0, 0, 1, 1], [], []>} : vector<2x512xbf16>, vector<512x128xbf16>, vector<2x128xf32> -> vector<2x128xf32>
      %c0_102 = arith.constant 0 : index
      %c0_103 = arith.constant 0 : index
      %120 = vector.load %arg21[%c0_102, %c0_103] : memref<1x128xf32, #tpu.memory_space<vmem>>, vector<1x128xf32>
      %121 = vector.broadcast %120 : vector<1x128xf32> to vector<2x128xf32>
      %122 = arith.addf %119, %121 : vector<2x128xf32>
      %c0_104 = arith.constant 0 : index
      %c0_105 = arith.constant 0 : index
      %123 = vector.load %arg40[%c0_104, %c0_105] : memref<2x128xf32, #tpu.memory_space<vmem>>, vector<2x128xf32>
      tpu.vector_store %arg40[%c0_104, %c0_105], %122 {strides = array<i32>} : memref<2x128xf32, #tpu.memory_space<vmem>>, vector<2x128xf32>,
      %c0_i32_106 = arith.constant 0 : i32
      %c0_i32_107 = arith.constant 0 : i32
      %124 = tpu.memref_slice %arg42[%c0_i32_106, %c0_i32_107] : memref<512x512xbf16, #tpu.memory_space<vmem>> -> memref<8x128xbf16, #tpu.memory_space<vmem>>
      tpu.enqueue_dma source(%arg22 : memref<8x128xbf16, #tpu.memory_space<any>>) target(%124 : memref<8x128xbf16, #tpu.memory_space<vmem>>) target_semaphore(%arg43 : memref<!tpu.dma_semaphore, #tpu.memory_space<semaphore_mem>>)
      %c0_i32_108 = arith.constant 0 : i32
      %c0_i32_109 = arith.constant 0 : i32
      %125 = tpu.memref_slice %arg42[%c0_i32_108, %c0_i32_109] : memref<512x512xbf16, #tpu.memory_space<vmem>> -> memref<8x128xbf16, #tpu.memory_space<vmem>>
      tpu.wait_dma2 semaphore(%arg43 : memref<!tpu.dma_semaphore, #tpu.memory_space<semaphore_mem>>) src(%arg22 : memref<8x128xbf16, #tpu.memory_space<any>>) dst(%125 : memref<8x128xbf16, #tpu.memory_space<vmem>>)
      %126 = arith.truncf %53 : vector<2x8xf32> to vector<2x8xbf16>
      %c0_110 = arith.constant 0 : index
      %c0_111 = arith.constant 0 : index
      %127 = vector.load %arg42[%c0_110, %c0_111] : memref<512x512xbf16, #tpu.memory_space<vmem>>, vector<8x128xbf16>
      %cst_112 = arith.constant dense<0.000000e+00> : vector<2x128xf32>
      %128 = tpu.matmul %126, %127, %cst_112 {dimension_numbers = #tpu.dot_dimension_numbers<[1], [0], [0], [1], [0, 0, 1, 1], [], []>} : vector<2x8xbf16>, vector<8x128xbf16>, vector<2x128xf32> -> vector<2x128xf32>
      %c0_113 = arith.constant 0 : index
      %c0_114 = arith.constant 0 : index
      %129 = vector.load %arg30[%c0_113, %c0_114] : memref<1x128xf32, #tpu.memory_space<vmem>>, vector<1x128xf32>
      %130 = vector.broadcast %129 : vector<1x128xf32> to vector<2x128xf32>
      %131 = arith.addf %128, %130 : vector<2x128xf32>
      %cst_115 = arith.constant 0.000000e+00 : f32
      %132 = vector.broadcast %cst_115 : f32 to vector<2x128xf32>
      %133 = arith.maximumf %131, %132 : vector<2x128xf32>
      %c0_i32_116 = arith.constant 0 : i32
      %c0_i32_117 = arith.constant 0 : i32
      %134 = tpu.memref_slice %arg42[%c0_i32_116, %c0_i32_117] : memref<512x512xbf16, #tpu.memory_space<vmem>> -> memref<128x128xbf16, #tpu.memory_space<vmem>>
      tpu.enqueue_dma source(%arg23 : memref<128x128xbf16, #tpu.memory_space<any>>) target(%134 : memref<128x128xbf16, #tpu.memory_space<vmem>>) target_semaphore(%arg43 : memref<!tpu.dma_semaphore, #tpu.memory_space<semaphore_mem>>)
      %c0_i32_118 = arith.constant 0 : i32
      %c0_i32_119 = arith.constant 0 : i32
      %135 = tpu.memref_slice %arg42[%c0_i32_118, %c0_i32_119] : memref<512x512xbf16, #tpu.memory_space<vmem>> -> memref<128x128xbf16, #tpu.memory_space<vmem>>
      tpu.wait_dma2 semaphore(%arg43 : memref<!tpu.dma_semaphore, #tpu.memory_space<semaphore_mem>>) src(%arg23 : memref<128x128xbf16, #tpu.memory_space<any>>) dst(%135 : memref<128x128xbf16, #tpu.memory_space<vmem>>)
      %136 = arith.truncf %133 : vector<2x128xf32> to vector<2x128xbf16>
      %c0_120 = arith.constant 0 : index
      %c0_121 = arith.constant 0 : index
      %137 = vector.load %arg42[%c0_120, %c0_121] : memref<512x512xbf16, #tpu.memory_space<vmem>>, vector<128x128xbf16>
      %cst_122 = arith.constant dense<0.000000e+00> : vector<2x128xf32>
      %138 = tpu.matmul %136, %137, %cst_122 {dimension_numbers = #tpu.dot_dimension_numbers<[1], [0], [0], [1], [0, 0, 1, 1], [], []>} : vector<2x128xbf16>, vector<128x128xbf16>, vector<2x128xf32> -> vector<2x128xf32>
      %c0_123 = arith.constant 0 : index
      %c0_124 = arith.constant 0 : index
      %139 = vector.load %arg31[%c0_123, %c0_124] : memref<1x128xf32, #tpu.memory_space<vmem>>, vector<1x128xf32>
      %140 = vector.broadcast %139 : vector<1x128xf32> to vector<2x128xf32>
      %141 = arith.addf %138, %140 : vector<2x128xf32>
      %cst_125 = arith.constant 0.000000e+00 : f32
      %142 = vector.broadcast %cst_125 : f32 to vector<2x128xf32>
      %143 = arith.maximumf %141, %142 : vector<2x128xf32>
      %c0_i32_126 = arith.constant 0 : i32
      %c0_i32_127 = arith.constant 0 : i32
      %144 = tpu.memref_slice %arg42[%c0_i32_126, %c0_i32_127] : memref<512x512xbf16, #tpu.memory_space<vmem>> -> memref<128x128xbf16, #tpu.memory_space<vmem>>
      tpu.enqueue_dma source(%arg24 : memref<128x128xbf16, #tpu.memory_space<any>>) target(%144 : memref<128x128xbf16, #tpu.memory_space<vmem>>) target_semaphore(%arg43 : memref<!tpu.dma_semaphore, #tpu.memory_space<semaphore_mem>>)
      %c0_i32_128 = arith.constant 0 : i32
      %c0_i32_129 = arith.constant 0 : i32
      %145 = tpu.memref_slice %arg42[%c0_i32_128, %c0_i32_129] : memref<512x512xbf16, #tpu.memory_space<vmem>> -> memref<128x128xbf16, #tpu.memory_space<vmem>>
      tpu.wait_dma2 semaphore(%arg43 : memref<!tpu.dma_semaphore, #tpu.memory_space<semaphore_mem>>) src(%arg24 : memref<128x128xbf16, #tpu.memory_space<any>>) dst(%145 : memref<128x128xbf16, #tpu.memory_space<vmem>>)
      %146 = arith.truncf %143 : vector<2x128xf32> to vector<2x128xbf16>
      %c0_130 = arith.constant 0 : index
      %c0_131 = arith.constant 0 : index
      %147 = vector.load %arg42[%c0_130, %c0_131] : memref<512x512xbf16, #tpu.memory_space<vmem>>, vector<128x128xbf16>
      %cst_132 = arith.constant dense<0.000000e+00> : vector<2x128xf32>
      %148 = tpu.matmul %146, %147, %cst_132 {dimension_numbers = #tpu.dot_dimension_numbers<[1], [0], [0], [1], [0, 0, 1, 1], [], []>} : vector<2x128xbf16>, vector<128x128xbf16>, vector<2x128xf32> -> vector<2x128xf32>
      %c0_133 = arith.constant 0 : index
      %c0_134 = arith.constant 0 : index
      %149 = vector.load %arg32[%c0_133, %c0_134] : memref<1x128xf32, #tpu.memory_space<vmem>>, vector<1x128xf32>
      %150 = vector.broadcast %149 : vector<1x128xf32> to vector<2x128xf32>
      %151 = arith.addf %148, %150 : vector<2x128xf32>
      %cst_135 = arith.constant 0.000000e+00 : f32
      %152 = vector.broadcast %cst_135 : f32 to vector<2x128xf32>
      %153 = arith.maximumf %151, %152 : vector<2x128xf32>
      %c0_i32_136 = arith.constant 0 : i32
      %c0_i32_137 = arith.constant 0 : i32
      %154 = tpu.memref_slice %arg42[%c0_i32_136, %c0_i32_137] : memref<512x512xbf16, #tpu.memory_space<vmem>> -> memref<128x128xbf16, #tpu.memory_space<vmem>>
      tpu.enqueue_dma source(%arg25 : memref<128x128xbf16, #tpu.memory_space<any>>) target(%154 : memref<128x128xbf16, #tpu.memory_space<vmem>>) target_semaphore(%arg43 : memref<!tpu.dma_semaphore, #tpu.memory_space<semaphore_mem>>)
      %c0_i32_138 = arith.constant 0 : i32
      %c0_i32_139 = arith.constant 0 : i32
      %155 = tpu.memref_slice %arg42[%c0_i32_138, %c0_i32_139] : memref<512x512xbf16, #tpu.memory_space<vmem>> -> memref<128x128xbf16, #tpu.memory_space<vmem>>
      tpu.wait_dma2 semaphore(%arg43 : memref<!tpu.dma_semaphore, #tpu.memory_space<semaphore_mem>>) src(%arg25 : memref<128x128xbf16, #tpu.memory_space<any>>) dst(%155 : memref<128x128xbf16, #tpu.memory_space<vmem>>)
      %156 = arith.truncf %153 : vector<2x128xf32> to vector<2x128xbf16>
      %c0_140 = arith.constant 0 : index
      %c0_141 = arith.constant 0 : index
      %157 = vector.load %arg42[%c0_140, %c0_141] : memref<512x512xbf16, #tpu.memory_space<vmem>>, vector<128x128xbf16>
      %cst_142 = arith.constant dense<0.000000e+00> : vector<2x128xf32>
      %158 = tpu.matmul %156, %157, %cst_142 {dimension_numbers = #tpu.dot_dimension_numbers<[1], [0], [0], [1], [0, 0, 1, 1], [], []>} : vector<2x128xbf16>, vector<128x128xbf16>, vector<2x128xf32> -> vector<2x128xf32>
      %c0_143 = arith.constant 0 : index
      %c0_144 = arith.constant 0 : index
      %159 = vector.load %arg33[%c0_143, %c0_144] : memref<1x128xf32, #tpu.memory_space<vmem>>, vector<1x128xf32>
      %160 = vector.broadcast %159 : vector<1x128xf32> to vector<2x128xf32>
      %161 = arith.addf %158, %160 : vector<2x128xf32>
      %cst_145 = arith.constant 0.000000e+00 : f32
      %162 = vector.broadcast %cst_145 : f32 to vector<2x128xf32>
      %163 = arith.maximumf %161, %162 : vector<2x128xf32>
      %c0_i32_146 = arith.constant 0 : i32
      %c0_i32_147 = arith.constant 0 : i32
      %164 = tpu.memref_slice %arg42[%c0_i32_146, %c0_i32_147] : memref<512x512xbf16, #tpu.memory_space<vmem>> -> memref<128x256xbf16, #tpu.memory_space<vmem>>
      tpu.enqueue_dma source(%arg26 : memref<128x256xbf16, #tpu.memory_space<any>>) target(%164 : memref<128x256xbf16, #tpu.memory_space<vmem>>) target_semaphore(%arg43 : memref<!tpu.dma_semaphore, #tpu.memory_space<semaphore_mem>>)
      %c0_i32_148 = arith.constant 0 : i32
      %c0_i32_149 = arith.constant 0 : i32
      %165 = tpu.memref_slice %arg42[%c0_i32_148, %c0_i32_149] : memref<512x512xbf16, #tpu.memory_space<vmem>> -> memref<128x256xbf16, #tpu.memory_space<vmem>>
      tpu.wait_dma2 semaphore(%arg43 : memref<!tpu.dma_semaphore, #tpu.memory_space<semaphore_mem>>) src(%arg26 : memref<128x256xbf16, #tpu.memory_space<any>>) dst(%165 : memref<128x256xbf16, #tpu.memory_space<vmem>>)
      %166 = arith.truncf %163 : vector<2x128xf32> to vector<2x128xbf16>
      %c0_150 = arith.constant 0 : index
      %c0_151 = arith.constant 0 : index
      %167 = vector.load %arg42[%c0_150, %c0_151] : memref<512x512xbf16, #tpu.memory_space<vmem>>, vector<128x256xbf16>
      %cst_152 = arith.constant dense<0.000000e+00> : vector<2x256xf32>
      %168 = tpu.matmul %166, %167, %cst_152 {dimension_numbers = #tpu.dot_dimension_numbers<[1], [0], [0], [1], [0, 0, 1, 1], [], []>} : vector<2x128xbf16>, vector<128x256xbf16>, vector<2x256xf32> -> vector<2x256xf32>
      %c0_153 = arith.constant 0 : index
      %c0_154 = arith.constant 0 : index
      %169 = vector.load %arg34[%c0_153, %c0_154] : memref<1x256xf32, #tpu.memory_space<vmem>>, vector<1x256xf32>
      %170 = vector.broadcast %169 : vector<1x256xf32> to vector<2x256xf32>
      %171 = arith.addf %168, %170 : vector<2x256xf32>
      %cst_155 = arith.constant 0.000000e+00 : f32
      %172 = vector.broadcast %cst_155 : f32 to vector<2x256xf32>
      %173 = arith.maximumf %171, %172 : vector<2x256xf32>
      %c0_i32_156 = arith.constant 0 : i32
      %c0_i32_157 = arith.constant 0 : i32
      %174 = tpu.memref_slice %arg42[%c0_i32_156, %c0_i32_157] : memref<512x512xbf16, #tpu.memory_space<vmem>> -> memref<256x128xbf16, #tpu.memory_space<vmem>>
      tpu.enqueue_dma source(%arg27 : memref<256x128xbf16, #tpu.memory_space<any>>) target(%174 : memref<256x128xbf16, #tpu.memory_space<vmem>>) target_semaphore(%arg43 : memref<!tpu.dma_semaphore, #tpu.memory_space<semaphore_mem>>)
      %c0_i32_158 = arith.constant 0 : i32
      %c0_i32_159 = arith.constant 0 : i32
      %175 = tpu.memref_slice %arg42[%c0_i32_158, %c0_i32_159] : memref<512x512xbf16, #tpu.memory_space<vmem>> -> memref<256x128xbf16, #tpu.memory_space<vmem>>
      tpu.wait_dma2 semaphore(%arg43 : memref<!tpu.dma_semaphore, #tpu.memory_space<semaphore_mem>>) src(%arg27 : memref<256x128xbf16, #tpu.memory_space<any>>) dst(%175 : memref<256x128xbf16, #tpu.memory_space<vmem>>)
      %176 = arith.truncf %173 : vector<2x256xf32> to vector<2x256xbf16>
      %c0_160 = arith.constant 0 : index
      %c0_161 = arith.constant 0 : index
      %177 = vector.load %arg42[%c0_160, %c0_161] : memref<512x512xbf16, #tpu.memory_space<vmem>>, vector<256x128xbf16>
      %cst_162 = arith.constant dense<0.000000e+00> : vector<2x128xf32>
      %178 = tpu.matmul %176, %177, %cst_162 {dimension_numbers = #tpu.dot_dimension_numbers<[1], [0], [0], [1], [0, 0, 1, 1], [], []>} : vector<2x256xbf16>, vector<256x128xbf16>, vector<2x128xf32> -> vector<2x128xf32>
      %c0_163 = arith.constant 0 : index
      %c0_164 = arith.constant 0 : index
      %179 = vector.load %arg35[%c0_163, %c0_164] : memref<1x128xf32, #tpu.memory_space<vmem>>, vector<1x128xf32>
      %180 = vector.broadcast %179 : vector<1x128xf32> to vector<2x128xf32>
      %181 = arith.addf %178, %180 : vector<2x128xf32>
      %cst_165 = arith.constant 0.000000e+00 : f32
      %182 = vector.broadcast %cst_165 : f32 to vector<2x128xf32>
      %183 = arith.maximumf %181, %182 : vector<2x128xf32>
      %c0_i32_166 = arith.constant 0 : i32
      %c0_i32_167 = arith.constant 0 : i32
      %184 = tpu.memref_slice %arg42[%c0_i32_166, %c0_i32_167] : memref<512x512xbf16, #tpu.memory_space<vmem>> -> memref<128x128xbf16, #tpu.memory_space<vmem>>
      tpu.enqueue_dma source(%arg28 : memref<128x128xbf16, #tpu.memory_space<any>>) target(%184 : memref<128x128xbf16, #tpu.memory_space<vmem>>) target_semaphore(%arg43 : memref<!tpu.dma_semaphore, #tpu.memory_space<semaphore_mem>>)
      %c0_i32_168 = arith.constant 0 : i32
      %c0_i32_169 = arith.constant 0 : i32
      %185 = tpu.memref_slice %arg42[%c0_i32_168, %c0_i32_169] : memref<512x512xbf16, #tpu.memory_space<vmem>> -> memref<128x128xbf16, #tpu.memory_space<vmem>>
      tpu.wait_dma2 semaphore(%arg43 : memref<!tpu.dma_semaphore, #tpu.memory_space<semaphore_mem>>) src(%arg28 : memref<128x128xbf16, #tpu.memory_space<any>>) dst(%185 : memref<128x128xbf16, #tpu.memory_space<vmem>>)
      %186 = arith.truncf %183 : vector<2x128xf32> to vector<2x128xbf16>
      %c0_170 = arith.constant 0 : index
      %c0_171 = arith.constant 0 : index
      %187 = vector.load %arg42[%c0_170, %c0_171] : memref<512x512xbf16, #tpu.memory_space<vmem>>, vector<128x128xbf16>
      %cst_172 = arith.constant dense<0.000000e+00> : vector<2x128xf32>
      %188 = tpu.matmul %186, %187, %cst_172 {dimension_numbers = #tpu.dot_dimension_numbers<[1], [0], [0], [1], [0, 0, 1, 1], [], []>} : vector<2x128xbf16>, vector<128x128xbf16>, vector<2x128xf32> -> vector<2x128xf32>
      %c0_173 = arith.constant 0 : index
      %c0_174 = arith.constant 0 : index
      %189 = vector.load %arg36[%c0_173, %c0_174] : memref<1x128xf32, #tpu.memory_space<vmem>>, vector<1x128xf32>
      %190 = vector.broadcast %189 : vector<1x128xf32> to vector<2x128xf32>
      %191 = arith.addf %188, %190 : vector<2x128xf32>
      %cst_175 = arith.constant 0.000000e+00 : f32
      %192 = vector.broadcast %cst_175 : f32 to vector<2x128xf32>
      %193 = arith.maximumf %191, %192 : vector<2x128xf32>
      %c0_i32_176 = arith.constant 0 : i32
      %c0_i32_177 = arith.constant 0 : i32
      %194 = tpu.memref_slice %arg42[%c0_i32_176, %c0_i32_177] : memref<512x512xbf16, #tpu.memory_space<vmem>> -> memref<128x128xbf16, #tpu.memory_space<vmem>>
      tpu.enqueue_dma source(%arg29 : memref<128x128xbf16, #tpu.memory_space<any>>) target(%194 : memref<128x128xbf16, #tpu.memory_space<vmem>>) target_semaphore(%arg43 : memref<!tpu.dma_semaphore, #tpu.memory_space<semaphore_mem>>)
      %c0_i32_178 = arith.constant 0 : i32
      %c0_i32_179 = arith.constant 0 : i32
      %195 = tpu.memref_slice %arg42[%c0_i32_178, %c0_i32_179] : memref<512x512xbf16, #tpu.memory_space<vmem>> -> memref<128x128xbf16, #tpu.memory_space<vmem>>
      tpu.wait_dma2 semaphore(%arg43 : memref<!tpu.dma_semaphore, #tpu.memory_space<semaphore_mem>>) src(%arg29 : memref<128x128xbf16, #tpu.memory_space<any>>) dst(%195 : memref<128x128xbf16, #tpu.memory_space<vmem>>)
      %196 = arith.truncf %193 : vector<2x128xf32> to vector<2x128xbf16>
      %c0_180 = arith.constant 0 : index
      %c0_181 = arith.constant 0 : index
      %197 = vector.load %arg42[%c0_180, %c0_181] : memref<512x512xbf16, #tpu.memory_space<vmem>>, vector<128x128xbf16>
      %cst_182 = arith.constant dense<0.000000e+00> : vector<2x128xf32>
      %198 = tpu.matmul %196, %197, %cst_182 {dimension_numbers = #tpu.dot_dimension_numbers<[1], [0], [0], [1], [0, 0, 1, 1], [], []>} : vector<2x128xbf16>, vector<128x128xbf16>, vector<2x128xf32> -> vector<2x128xf32>
      %c0_183 = arith.constant 0 : index
      %c0_184 = arith.constant 0 : index
      %199 = vector.load %arg37[%c0_183, %c0_184] : memref<1x128xf32, #tpu.memory_space<vmem>>, vector<1x128xf32>
      %200 = vector.broadcast %199 : vector<1x128xf32> to vector<2x128xf32>
      %201 = arith.addf %198, %200 : vector<2x128xf32>
      %c0_185 = arith.constant 0 : index
      %c0_186 = arith.constant 0 : index
      %202 = vector.load %arg39[%c0_185, %c0_186] : memref<2x128xf32, #tpu.memory_space<vmem>>, vector<2x128xf32>
      tpu.vector_store %arg39[%c0_185, %c0_186], %201 {strides = array<i32>} : memref<2x128xf32, #tpu.memory_space<vmem>>, vector<2x128xf32>,
    } else {
    }
    return
  }
  func.func @transform_0(%arg0: i32) -> (i32, i32, i32, i32) {
    %c0_i32 = arith.constant 0 : i32
    %c0_i32_0 = arith.constant 0 : i32
    %c0_i32_1 = arith.constant 0 : i32
    %c0_i32_2 = arith.constant 0 : i32
    return %c0_i32, %arg0, %c0_i32_0, %c0_i32_1 : i32, i32, i32, i32
  }
  func.func @transform_1(%arg0: i32) -> (i32, i32) {
    %c0_i32 = arith.constant 0 : i32
    %c0_i32_0 = arith.constant 0 : i32
    %c0_i32_1 = arith.constant 0 : i32
    return %c0_i32, %c0_i32_0 : i32, i32
  }
  func.func @transform_2(%arg0: i32) -> (i32, i32) {
    %c0_i32 = arith.constant 0 : i32
    %c0_i32_0 = arith.constant 0 : i32
    %c0_i32_1 = arith.constant 0 : i32
    return %c0_i32, %c0_i32_0 : i32, i32
  }
  func.func @transform_3(%arg0: i32) -> (i32, i32, i32) {
    %c0_i32 = arith.constant 0 : i32
    %c0_i32_0 = arith.constant 0 : i32
    %c0_i32_1 = arith.constant 0 : i32
    return %arg0, %c0_i32, %c0_i32_0 : i32, i32, i32
  }
  func.func @transform_4(%arg0: i32) -> (i32, i32) {
    %c0_i32 = arith.constant 0 : i32
    %c0_i32_0 = arith.constant 0 : i32
    %c0_i32_1 = arith.constant 0 : i32
    return %c0_i32, %c0_i32_0 : i32, i32
  }
  func.func @transform_5(%arg0: i32) -> (i32, i32) {
    %c0_i32 = arith.constant 0 : i32
    %c0_i32_0 = arith.constant 0 : i32
    %c0_i32_1 = arith.constant 0 : i32
    return %c0_i32, %c0_i32_0 : i32, i32
  }
  func.func @transform_6(%arg0: i32) -> (i32, i32) {
    %c0_i32 = arith.constant 0 : i32
    %c0_i32_0 = arith.constant 0 : i32
    %c0_i32_1 = arith.constant 0 : i32
    return %c0_i32, %c0_i32_0 : i32, i32
  }
  func.func @transform_14(%arg0: i32) -> (i32, i32) {
    %c0_i32 = arith.constant 0 : i32
    %c0_i32_0 = arith.constant 0 : i32
    %c0_i32_1 = arith.constant 0 : i32
    return %c0_i32, %c0_i32_0 : i32, i32
  }
  func.func @transform_15(%arg0: i32) -> (i32, i32) {
    %c0_i32 = arith.constant 0 : i32
    %c0_i32_0 = arith.constant 0 : i32
    %c0_i32_1 = arith.constant 0 : i32
    return %c0_i32, %c0_i32_0 : i32, i32
  }
  func.func @transform_16(%arg0: i32) -> (i32, i32) {
    %c0_i32 = arith.constant 0 : i32
    %c0_i32_0 = arith.constant 0 : i32
    %c0_i32_1 = arith.constant 0 : i32
    return %c0_i32, %c0_i32_0 : i32, i32
  }
  func.func @transform_17(%arg0: i32) -> (i32, i32) {
    %c0_i32 = arith.constant 0 : i32
    %c0_i32_0 = arith.constant 0 : i32
    %c0_i32_1 = arith.constant 0 : i32
    return %c0_i32, %c0_i32_0 : i32, i32
  }
  func.func @transform_18(%arg0: i32) -> (i32, i32) {
    %c0_i32 = arith.constant 0 : i32
    %c0_i32_0 = arith.constant 0 : i32
    %c0_i32_1 = arith.constant 0 : i32
    return %c0_i32, %c0_i32_0 : i32, i32
  }
  func.func @transform_19(%arg0: i32) -> (i32, i32) {
    %c0_i32 = arith.constant 0 : i32
    %c0_i32_0 = arith.constant 0 : i32
    %c0_i32_1 = arith.constant 0 : i32
    return %c0_i32, %c0_i32_0 : i32, i32
  }
  func.func @transform_20(%arg0: i32) -> (i32, i32) {
    %c0_i32 = arith.constant 0 : i32
    %c0_i32_0 = arith.constant 0 : i32
    %c0_i32_1 = arith.constant 0 : i32
    return %c0_i32, %c0_i32_0 : i32, i32
  }
  func.func @transform_29(%arg0: i32) -> (i32, i32) {
    %c0_i32 = arith.constant 0 : i32
    %c0_i32_0 = arith.constant 0 : i32
    %c0_i32_1 = arith.constant 0 : i32
    return %c0_i32, %c0_i32_0 : i32, i32
  }
  func.func @transform_30(%arg0: i32) -> (i32, i32) {
    %c0_i32 = arith.constant 0 : i32
    %c0_i32_0 = arith.constant 0 : i32
    %c0_i32_1 = arith.constant 0 : i32
    return %c0_i32, %c0_i32_0 : i32, i32
  }
  func.func @transform_31(%arg0: i32) -> (i32, i32) {
    %c0_i32 = arith.constant 0 : i32
    %c0_i32_0 = arith.constant 0 : i32
    %c0_i32_1 = arith.constant 0 : i32
    return %c0_i32, %c0_i32_0 : i32, i32
  }
  func.func @transform_32(%arg0: i32) -> (i32, i32) {
    %c0_i32 = arith.constant 0 : i32
    %c0_i32_0 = arith.constant 0 : i32
    %c0_i32_1 = arith.constant 0 : i32
    return %c0_i32, %c0_i32_0 : i32, i32
  }
  func.func @transform_33(%arg0: i32) -> (i32, i32) {
    %c0_i32 = arith.constant 0 : i32
    %c0_i32_0 = arith.constant 0 : i32
    %c0_i32_1 = arith.constant 0 : i32
    return %c0_i32, %c0_i32_0 : i32, i32
  }
  func.func @transform_34(%arg0: i32) -> (i32, i32) {
    %c0_i32 = arith.constant 0 : i32
    %c0_i32_0 = arith.constant 0 : i32
    %c0_i32_1 = arith.constant 0 : i32
    return %c0_i32, %c0_i32_0 : i32, i32
  }
  func.func @transform_35(%arg0: i32) -> (i32, i32) {
    %c0_i32 = arith.constant 0 : i32
    %c0_i32_0 = arith.constant 0 : i32
    %c0_i32_1 = arith.constant 0 : i32
    return %c0_i32, %c0_i32_0 : i32, i32
  }
  func.func @transform_36(%arg0: i32) -> (i32, i32) {
    %c0_i32 = arith.constant 0 : i32
    %c0_i32_0 = arith.constant 0 : i32
    %c0_i32_1 = arith.constant 0 : i32
    return %c0_i32, %c0_i32_0 : i32, i32
  }
  func.func @transform_37(%arg0: i32) -> (i32, i32) {
    %c0_i32 = arith.constant 0 : i32
    %c0_i32_0 = arith.constant 0 : i32
    %c0_i32_1 = arith.constant 0 : i32
    return %c0_i32, %c0_i32_0 : i32, i32
  }
  func.func @transform_38(%arg0: i32) -> (i32, i32) {
    %c0_i32 = arith.constant 0 : i32
    %c0_i32_0 = arith.constant 0 : i32
    %c0_i32_1 = arith.constant 0 : i32
    return %c0_i32, %c0_i32_0 : i32, i32
  }
  func.func @transform_39(%arg0: i32) -> (i32, i32) {
    %c0_i32 = arith.constant 0 : i32
    %c0_i32_0 = arith.constant 0 : i32
    %c0_i32_1 = arith.constant 0 : i32
    return %c0_i32, %c0_i32_0 : i32, i32
  }
}

</mosaic_0001>

<bundles_post_ra>
// kernel: simplenet_forward.1
= control target key start
LH: loop header
LB: loop body
LE: loop exit
PB: predicated region body
PF: predicated region fallthrough
CT: control target
= control target key end

     0   :  { %s10960_s6 = smov 1   ;;  %s10961_s10 = smov 2   ;;  %s12601_s0 = inlined_call_operand.smem [shape: u32[40], index: -1, kind: input, shape index: {}] }
   0x1   :  { %s11014_s5 = sld [smem:[%s12601_s0]]   ;;  %s10962_s14 = smov 3  }
   0x2   :  { %s11019_s9 = sld [smem:[%s12601_s0 + %s10960_s6]]   ;;  %s10963_s18 = smov 4  }
   0x3   :  { %s11024_s13 = sld [smem:[%s12601_s0 + %s10961_s10]]   ;;  %s10964_s22 = smov 5  }
   0x4   :  { %s11029_s17 = sld [smem:[%s12601_s0 + %s10962_s14]]   ;;  %s10965_s26 = smov 6  }
   0x5   :  { %s11034_s21 = sld [smem:[%s12601_s0 + %s10963_s18]]   ;;  %s10966_s30 = smov 7  }
   0x6   :  { %s11039_s25 = sld [smem:[%s12601_s0 + %s10964_s22]]   ;;  %s10967_s4 = smov 8  }
   0x7   :  { %s11044_s29 = sld [smem:[%s12601_s0 + %s10965_s26]]   ;;  %s10968_s10 = smov 9  }
   0x8   :  { %s11049_s3 = sld [smem:[%s12601_s0 + %s10966_s30]]   ;;  %s10969_s15 = smov 10  }
   0x9   :  { %s11054_s8 = sld [smem:[%s12601_s0 + %s10967_s4]]   ;;  %s10970_s20 = smov 11  }
   0xa   :  { %s11059_s14 = sld [smem:[%s12601_s0 + %s10968_s10]]   ;;  %s10971_s26 = smov 12  }
   0xb   :  { %s11064_s19 = sld [smem:[%s12601_s0 + %s10969_s15]]   ;;  %s10972_s1 = smov 13  }
   0xc   :  { %s11069_s24 = sld [smem:[%s12601_s0 + %s10970_s20]]   ;;  %s10973_s7 = smov 14  }
   0xd   :  { %s11074_s30 = sld [smem:[%s12601_s0 + %s10971_s26]]   ;;  %s10974_s15 = smov 15  }
   0xe   :  { %s11079_s6 = sld [smem:[%s12601_s0 + %s10972_s1]]   ;;  %s10975_s22 = smov 16  }
   0xf   :  { %s11084_s12 = sld [smem:[%s12601_s0 + %s10973_s7]]   ;;  %s10976_s28 = smov 17  }
  0x10   :  { %s11089_s20 = sld [smem:[%s12601_s0 + %s10974_s15]]   ;;  %s10977_s7 = smov 18  }
  0x11   :  { %s11094_s27 = sld [smem:[%s12601_s0 + %s10975_s22]]   ;;  %s10978_s15 = smov 19  }
  0x12   :  { %12612 = sst [smem:[#allocation44_spill]] %s11069_s24  ;;  %s10979_s22 = smov 20  }
  0x13   :  { %12613 = sst [smem:[#allocation45_spill]] %s11074_s30 }
  0x14   :  { %12614 = sst [smem:[#allocation46_spill]] %s11079_s6 }
  0x15   :  { %s11099_s4 = sld [smem:[%s12601_s0 + %s10976_s28]]   ;;  %s10980_s28 = smov 21  }
  0x16   :  { %s11104_s6 = sld [smem:[%s12601_s0 + %s10977_s7]]   ;;  %s10981_s7 = smov 22  }
  0x17   :  { %s11109_s30 = sld [smem:[%s12601_s0 + %s10978_s15]]   ;;  %s10982_s15 = smov 23  }
  0x18   :  { %s11114_s24 = sld [smem:[%s12601_s0 + %s10979_s22]]   ;;  %s10983_s22 = smov 24  }
  0x1b   :  { %12615 = sst [smem:[#allocation47_spill]] %s11099_s4 }
  0x1c   :  { %12616 = sst [smem:[#allocation48_spill]] %s11104_s6 }
  0x1d   :  { %12617 = sst [smem:[#allocation49_spill]] %s11109_s30 }
  0x1e   :  { %12618 = sst [smem:[#allocation50_spill]] %s11114_s24 }
  0x1f   :  { %s11119_s4 = sld [smem:[%s12601_s0 + %s10980_s28]]   ;;  %s10984_s28 = smov 25  }
  0x20   :  { %s11124_s6 = sld [smem:[%s12601_s0 + %s10981_s7]]   ;;  %s10985_s7 = smov 26  }
  0x21   :  { %s11129_s30 = sld [smem:[%s12601_s0 + %s10982_s15]]   ;;  %s10986_s15 = smov 27  }
  0x22   :  { %s11134_s24 = sld [smem:[%s12601_s0 + %s10983_s22]]   ;;  %s10987_s22 = smov 28  }
  0x25   :  { %12619 = sst [smem:[#allocation51_spill]] %s11119_s4 }
  0x26   :  { %12620 = sst [smem:[#allocation52_spill]] %s11124_s6 }
  0x27   :  { %12621 = sst [smem:[#allocation53_spill]] %s11129_s30 }
  0x28   :  { %12622 = sst [smem:[#allocation54_spill]] %s11134_s24 }
  0x29   :  { %s11139_s4 = sld [smem:[%s12601_s0 + %s10984_s28]]   ;;  %s10988_s28 = smov 29  }
  0x2a   :  { %s11144_s6 = sld [smem:[%s12601_s0 + %s10985_s7]]   ;;  %s10989_s7 = smov 30  }
  0x2b   :  { %s11149_s30 = sld [smem:[%s12601_s0 + %s10986_s15]]   ;;  %s10990_s15 = smov 31  }
  0x2c   :  { %s11154_s24 = sld [smem:[%s12601_s0 + %s10987_s22]]   ;;  %s10991_s22 = smov 32  }
  0x2f   :  { %12623 = sst [smem:[#allocation55_spill]] %s11139_s4 }
  0x30   :  { %12624 = sst [smem:[#allocation56_spill]] %s11144_s6 }
  0x31   :  { %12625 = sst [smem:[#allocation57_spill]] %s11149_s30 }
  0x32   :  { %12626 = sst [smem:[#allocation58_spill]] %s11154_s24 }
  0x33   :  { %s11159_s4 = sld [smem:[%s12601_s0 + %s10988_s28]]   ;;  %s10992_s28 = smov 33  }
  0x34   :  { %s11164_s6 = sld [smem:[%s12601_s0 + %s10989_s7]]   ;;  %s10993_s7 = smov 34  }
  0x35   :  { %s11169_s30 = sld [smem:[%s12601_s0 + %s10990_s15]]   ;;  %s10994_s15 = smov 35  }
  0x36   :  { %s11174_s24 = sld [smem:[%s12601_s0 + %s10991_s22]]   ;;  %s10995_s22 = smov 36  }
  0x39   :  { %12627 = sst [smem:[#allocation59_spill]] %s11159_s4 }
  0x3a   :  { %12628 = sst [smem:[#allocation60_spill]] %s11164_s6 }
  0x3b   :  { %12629 = sst [smem:[#allocation61_spill]] %s11169_s30 }
  0x3c   :  { %12630 = sst [smem:[#allocation62_spill]] %s11174_s24 }
  0x3d   :  { %s11179_s4 = sld [smem:[%s12601_s0 + %s10992_s28]]   ;;  %s10996_s28 = smov 37  }
  0x3e   :  { %s11184_s6 = sld [smem:[%s12601_s0 + %s10993_s7]]   ;;  %s10997_s7 = smov 38  }
  0x3f   :  { %s11189_s30 = sld [smem:[%s12601_s0 + %s10994_s15]]   ;;  %s10998_s15 = smov 39  }
  0x40   :  { %s11194_s24 = sld [smem:[%s12601_s0 + %s10995_s22]]  }
  0x43   :  { %12631 = sst [smem:[#allocation63_spill]] %s11179_s4 }
  0x44   :  { %12632 = sst [smem:[#allocation64_spill]] %s11184_s6 }
  0x45   :  { %12633 = sst [smem:[#allocation65_spill]] %s11189_s30 }
  0x46   :  { %s11199_s4 = sld [smem:[%s12601_s0 + %s10996_s28]]  }
  0x47   :  { %s11204_s6 = sld [smem:[%s12601_s0 + %s10997_s7]]  }
  0x48   :  { %s11209_s30 = sld [smem:[%s12601_s0 + %s10998_s15]]  }
  0x49   :  { %85 = vsyncpa [#allocation6], 0 }
  0x4a   :  { %86 = vsyncpa [#allocation8], 0  ;;  %v10470_v0 = vld [vmem:[%s11019_s9 + $0x4] ss:$12 sps:$4 sm:$0xff]   ;;  %v10472_v1 = vld [vmem:[%s11019_s9] ss:$12 sps:$4 sm:$0xff]   ;;  %v213_v3 = vlaneseq }
  0x4b   :  { %v10999_v2 = vmov 0   ;;  %v10473_v4 = vld [vmem:[%s11019_s9 + $0x8] ss:$12 sps:$4 sm:$0xff]   ;;  %v138_v5 = vld [vmem:[%s11014_s5] sm:$0x1]  ;;  %431 = vmatprep.subr.bf16.mxu0 %v10470_v0  ;;  %vm418_vm0 = vcmask 130048  }
  0x4c   :  { %463 = vmatprep.mubr.bf16.mxu0 %v10999_v2  ;;  %v139_v6 = vld [vmem:[%s11014_s5 + $0x1] sm:$0x1]  ;;  %v140_v7 = vld [vmem:[%s11014_s5 + $0x2] sm:$0x1]  ;;  %v141_v8 = vld [vmem:[%s11014_s5 + $0x3] sm:$0x1]  ;;  %432 = vmatpush1.bf16.msra.mxu0 %v10472_v1 }
  0x4d   :  { %9922 = vmatprep.subr.bf16.mxu1 %v10473_v4  ;;  %v142_v9 = vld [vmem:[%s11014_s5 + $0x4] sm:$0x1]  ;;  %v143_v10 = vld [vmem:[%s11014_s5 + $0x5] sm:$0x1]  ;;  %v144_v11 = vld [vmem:[%s11014_s5 + $0x6] sm:$0x1]  ;;  %v206_v19 = vcombine.low %v138_v5, %v139_v6  ;;  %v207_v23 = vcombine.low %v140_v7, %v141_v8 }
  0x4e   :  { %9923 = vmatpush3.bf16.msra.mxu1 %v10473_v4  ;;  %v145_v12 = vld [vmem:[%s11014_s5 + $0x7] sm:$0x1]  ;;  %v11223_v13 = vshrl.u32 %v213_v3, 7  ;;  %v11000_v14 = vmov 1966171168   ;;  %v208_v24 = vcombine.low %v142_v9, %v143_v10  ;;  %vm11002_vm1 = vmmov 0  }
  0x4f   :  { %v211_v15 = vunpack.c.l.s4 %v11000_v14  ;;  %v146_v16 = vld [vmem:[%s11014_s5 + $0x8] sm:$0x1]  ;;  %v147_v17 = vld [vmem:[%s11014_s5 + $0x9] sm:$0x1]  ;;  %v148_v18 = vld [vmem:[%s11014_s5 + $0xa] sm:$0x1]  ;;  %v209_v25 = vcombine.low %v144_v11, %v145_v12 }
  0x50   :  { %v149_v20 = vld [vmem:[%s11014_s5 + $0xb] sm:$0x1]  ;;  %v150_v21 = vld [vmem:[%s11014_s5 + $0xc] sm:$0x1]  ;;  %v151_v22 = vld [vmem:[%s11014_s5 + $0xd] sm:$0x1]  ;;  %v255_v30 = vcombine.low %v146_v16, %v147_v17 }
  0x51   :  { %v212_v26 = vunpack.c.0.s8 %v211_v15  ;;  %v152_v27 = vld [vmem:[%s11014_s5 + $0xe] sm:$0x1]  ;;  %v153_v28 = vld [vmem:[%s11014_s5 + $0xf] sm:$0x1]  ;;  %v154_v29 = vld [vmem:[%s11014_s5 + $0x10] sm:$0x1]  ;;  %v256_v31 = vcombine.low %v148_v18, %v149_v20  ;;  %v257_v32 = vcombine.low %v150_v21, %v151_v22 }
  0x52   :  { %v258_v33 = vcombine.low %v152_v27, %v153_v28  ;;  %v155_v34 = vld [vmem:[%s11014_s5 + $0x11] sm:$0x1]  ;;  %v156_v35 = vld [vmem:[%s11014_s5 + $0x12] sm:$0x1]  ;;  %v157_v36 = vld [vmem:[%s11014_s5 + $0x13] sm:$0x1] }
  0x53   :  { %v11238_v37 = vsub.s32 %v212_v26, %v11223_v13  ;;  %v158_v38 = vld [vmem:[%s11014_s5 + $0x14] sm:$0x1]  ;;  %v159_v39 = vld [vmem:[%s11014_s5 + $0x15] sm:$0x1]  ;;  %v304_v40 = vcombine.low %v154_v29, %v155_v34  ;;  %v160_v41 = vld [vmem:[%s11014_s5 + $0x16] sm:$0x1]  ;;  %v305_v43 = vcombine.low %v156_v35, %v157_v36 }
  0x54   :  { %v161_v42 = vld [vmem:[%s11014_s5 + $0x17] sm:$0x1]  ;;  %v306_v44 = vcombine.low %v158_v38, %v159_v39  ;;  %v162_v45 = vld [vmem:[%s11014_s5 + $0x18] sm:$0x1]  ;;  %v163_v50 = vld [vmem:[%s11014_s5 + $0x19] sm:$0x1] }
  0x55   :  { %v216_v46 = vrot.slane %v206_v19, %v11238_v37  ;;  %v223_v47 = vrot.slane %v207_v23, %v11238_v37  ;;  %v230_v48 = vrot.slane %v208_v24, %v11238_v37  ;;  %v237_v49 = vrot.slane %v209_v25, %v11238_v37  ;;  %v164_v51 = vld [vmem:[%s11014_s5 + $0x1a] sm:$0x1]  ;;  %v165_v52 = vld [vmem:[%s11014_s5 + $0x1b] sm:$0x1]  ;;  %v166_v57 = vld [vmem:[%s11014_s5 + $0x1c] sm:$0x1] }
  0x56   :  { %v265_v53 = vrot.slane %v255_v30, %v11238_v37  ;;  %v272_v54 = vrot.slane %v256_v31, %v11238_v37  ;;  %v279_v55 = vrot.slane %v257_v32, %v11238_v37  ;;  %v286_v56 = vrot.slane %v258_v33, %v11238_v37  ;;  %v167_v58 = vld [vmem:[%s11014_s5 + $0x1d] sm:$0x1]  ;;  %v168_v59 = vld [vmem:[%s11014_s5 + $0x1e] sm:$0x1]  ;;  %v169_v60 = vld [vmem:[%s11014_s5 + $0x1f] sm:$0x1] }
  0x57   :  { %v238_v61 = vcombine.low %v216_v46, %v223_v47  ;;  %v239_v62 = vcombine.low %v230_v48, %v237_v49  ;;  %v307_v63 = vcombine.low %v160_v41, %v161_v42  ;;  %v314_v0 = vrot.slane %v304_v40, %v11238_v37  ;;  %v10474_v33 = vld [vmem:[%s11029_s17 + $0x40] sm:$0xff]   ;;  %v10477_v36 = vld [vmem:[%s11029_s17 + $0x48] sm:$0xff]   ;;  %v10480_v40 = vld [vmem:[%s11029_s17 + $0x50] sm:$0xff]  }
  0x58   :  { %v287_v1 = vcombine.low %v265_v53, %v272_v54  ;;  %v288_v3 = vcombine.low %v279_v55, %v286_v56  ;;  %v321_v4 = vrot.slane %v305_v43, %v11238_v37  ;;  %v328_v5 = vrot.slane %v306_v44, %v11238_v37  ;;  %v10475_v34 = vld [vmem:[%s11029_s17 + $0x80] sm:$0xff]   ;;  %9284 = vmatprep.subr.bf16.mxu0 %v10474_v33  ;;  %v10478_v38 = vld [vmem:[%s11029_s17 + $0x88] sm:$0xff]   ;;  %v10481_v41 = vld [vmem:[%s11029_s17 + $0x90] sm:$0xff]  }
  0x59   :  { %v246_v6 = vrot.slane %v238_v61, %v11238_v37  ;;  %v253_v7 = vrot.slane %v239_v62, %v11238_v37  ;;  %v335_v8 = vrot.slane %v307_v63, %v11238_v37  ;;  %v353_v9 = vcombine.low %v162_v45, %v163_v50  ;;  %v10476_v35 = vld [vmem:[%s11029_s17] sm:$0xff]   ;;  %v10479_v39 = vld [vmem:[%s11029_s17 + $0x8] sm:$0xff]   ;;  %v10482_v42 = vld [vmem:[%s11029_s17 + $0x10] sm:$0xff]  }
  0x5a   :  { %v295_v10 = vrot.slane %v287_v1, %v11238_v37  ;;  %v302_v11 = vrot.slane %v288_v3, %v11238_v37  ;;  %v336_v12 = vcombine.low %v314_v0, %v321_v4  ;;  %v354_v14 = vcombine.low %v164_v51, %v165_v52  ;;  %v10483_v43 = vld [vmem:[%s11029_s17 + $0x58] sm:$0xff]   ;;  %v10486_v46 = vld [vmem:[%s11029_s17 + $0x60] sm:$0xff]   ;;  %v10489_v49 = vld [vmem:[%s11029_s17 + $0x68] sm:$0xff]  }
  0x5b   :  { %v254_v15 = vcombine.low %v246_v6, %v253_v7  ;;  %v337_v16 = vcombine.low %v328_v5, %v335_v8  ;;  %v355_v17 = vcombine.low %v166_v57, %v167_v58  ;;  %v356_v18 = vcombine.low %v168_v59, %v169_v60  ;;  %v10484_v44 = vld [vmem:[%s11029_s17 + $0x98] sm:$0xff]   ;;  %v10487_v47 = vld [vmem:[%s11029_s17 + $0xa0] sm:$0xff]   ;;  %v10490_v50 = vld [vmem:[%s11029_s17 + $0xa8] sm:$0xff]  }
  0x5c   :  { %v303_v19 = vcombine.low %v295_v10, %v302_v11  ;;  %v344_v20 = vrot.slane %v336_v12, %v11238_v37  ;;  %v363_v21 = vrot.slane %v353_v9, %v11238_v37  ;;  %v370_v22 = vrot.slane %v354_v14, %v11238_v37  ;;  %v10485_v45 = vld [vmem:[%s11029_s17 + $0x18] sm:$0xff]   ;;  %v10488_v48 = vld [vmem:[%s11029_s17 + $0x20] sm:$0xff]   ;;  %v10491_v51 = vld [vmem:[%s11029_s17 + $0x28] sm:$0xff]  }
  0x5d   :  { %8863 = vmatmul.mubr.msk.bf16.vlgmr.msra.gmra.mrb[0].mxu0 %vm418_vm0, %v254_v15  ;;  %9924 = vmatprep.mubr.msk.bf16.mxu1 %vm418_vm0, %v254_v15  ;;  %v351_v23 = vrot.slane %v337_v16, %v11238_v37  ;;  %v377_v24 = vrot.slane %v355_v17, %v11238_v37  ;;  %v384_v25 = vrot.slane %v356_v18, %v11238_v37  ;;  %v11001_v32 = vmov 0.0   ;;  %v10492_v52 = vld [vmem:[%s11029_s17 + $0x70] sm:$0xff]   ;;  %v10495_v55 = vld [vmem:[%s11029_s17 + $0x78] sm:$0xff]   ;;  %v10498_v58 = vld [vmem:[%s11029_s17 + $0x100] sm:$0xff]  }
  0x5e   :  { %9925 = vmatmul.mubr.msk.bf16.vlgmr.msra.gmra.mrb[0].mxu1 %vm418_vm0, %v303_v19  ;;  %473 = vmatprep.mubr.bf16.mxu0 %v10999_v2  ;;  %v385_v26 = vcombine.low %v363_v21, %v370_v22  ;;  %v10493_v53 = vld [vmem:[%s11029_s17 + $0xb0] sm:$0xff]   ;;  %v10496_v56 = vld [vmem:[%s11029_s17 + $0xb8] sm:$0xff]   ;;  %v581_v3 = vld [vmem:[%s11024_s13] sm:$0x7]  ;;  %v593_v5 = vsub.s32 2, %v11223_v13  ;;  %v11328_v17 = vsub.s32 0, %v11223_v13 }
  0x5f   :  { %v352_v27 = vcombine.low %v344_v20, %v351_v23  ;;  %v386_v28 = vcombine.low %v377_v24, %v384_v25  ;;  %9932 = vmatprep.subr.bf16.mxu1 %v11001_v32  ;;  %9285 = vmatpush3.bf16.msra.mxu0 %v10476_v35  ;;  %v10494_v54 = vld [vmem:[%s11029_s17 + $0x30] sm:$0xff]   ;;  %v10497_v57 = vld [vmem:[%s11029_s17 + $0x38] sm:$0xff]   ;;  %v11331_v21 = vsub.s32 1, %v11223_v13  ;;  %vm136_vm2 = vcmask 58368  }
  0x60   :  { %v393_v29 = vrot.slane %v385_v26, %v11238_v37  ;;  %9933 = vmatpush3.bf16.msra.mxu1 %v10475_v34  ;;  %9286 = vmatprep.subr.bf16.mxu0 %v10477_v36  ;;  %v594_v7 = vrot.slane %v581_v3, %v593_v5  ;;  %v586_v26 = vrot.slane %v581_v3, %v11328_v17 }
  0x61   :  { %9928 = vmatprep.mubr.msk.bf16.mxu1 %vm418_vm0, %v352_v27  ;;  %v400_v30 = vrot.slane %v386_v28, %v11238_v37  ;;  %9934 = vmatprep.subr.bf16.mxu1 %v11001_v32  ;;  %137 = vst.msk [vmem:[#allocation2] sm:$0x3] %vm136_vm2, %v11001_v32 }
  0x63   :  { %v401_v31 = vcombine.low %v393_v29, %v400_v30  ;;  %9287 = vmatpush3.bf16.msra.mxu0 %v10479_v39  ;;  %v590_v30 = vrot.slane %v581_v3, %v11331_v21 }
  0x64   :  { %9935 = vmatpush3.bf16.msra.mxu1 %v10478_v38  ;;  %9288 = vmatprep.subr.bf16.mxu0 %v10480_v40 }
  0x65   :  { %8864 = vmatmul.mubr.msk.bf16.gmra.mrb[4].mxu0 %vm418_vm0, %v303_v19  ;;  %9936 = vmatprep.subr.bf16.mxu1 %v11001_v32 }
  0x66   :  { %9929 = vmatmul.mubr.msk.bf16.gmra.mrb[4].mxu1 %vm418_vm0, %v401_v31  ;;  %483 = vmatprep.mubr.bf16.mxu0 %v10999_v2 }
  0x67   :  { %9289 = vmatpush3.bf16.msra.mxu0 %v10482_v42  ;;  %9948 = vmatprep.mubr.msk.bf16.mxu1 %vm11002_vm1, %v11001_v32 }
  0x68   :  { %9937 = vmatpush3.bf16.msra.mxu1 %v10481_v41  ;;  %9290 = vmatprep.subr.bf16.mxu0 %v10483_v43 }
  0x69   :  { %9938 = vmatprep.subr.bf16.mxu1 %v11001_v32 }
  0x6b   :  { %9291 = vmatpush3.bf16.msra.mxu0 %v10485_v45 }
  0x6c   :  { %9939 = vmatpush3.bf16.msra.mxu1 %v10484_v44  ;;  %9292 = vmatprep.subr.bf16.mxu0 %v10486_v46 }
  0x6d   :  { %8865 = vmatmul.mubr.msk.bf16.gmra.mrb[8].mxu0 %vm418_vm0, %v352_v27  ;;  %9940 = vmatprep.subr.bf16.mxu1 %v11001_v32 }
  0x6e   :  { %493 = vmatprep.mubr.bf16.mxu0 %v10999_v2 }
  0x6f   :  { %9293 = vmatpush3.bf16.msra.mxu0 %v10488_v48 }
  0x70   :  { %9941 = vmatpush3.bf16.msra.mxu1 %v10487_v47  ;;  %9294 = vmatprep.subr.bf16.mxu0 %v10489_v49 }
  0x71   :  { %9942 = vmatprep.subr.bf16.mxu1 %v11001_v32 }
  0x73   :  { %9295 = vmatpush3.bf16.msra.mxu0 %v10491_v51 }
  0x74   :  { %9943 = vmatpush3.bf16.msra.mxu1 %v10490_v50  ;;  %9296 = vmatprep.subr.bf16.mxu0 %v10492_v52 }
  0x75   :  { %8866 = vmatmul.mubr.msk.bf16.gmra.mrb[12].mxu0 %vm418_vm0, %v401_v31  ;;  %9944 = vmatprep.subr.bf16.mxu1 %v11001_v32 }
  0x77   :  { %9297 = vmatpush3.bf16.msra.mxu0 %v10494_v54 }
  0x78   :  { %9945 = vmatpush3.bf16.msra.mxu1 %v10493_v53  ;;  %9298 = vmatprep.subr.bf16.mxu0 %v10495_v55 }
  0x79   :  { %9946 = vmatprep.subr.bf16.mxu1 %v11001_v32 }
  0x7b   :  { %9299 = vmatpush3.bf16.msra.mxu0 %v10497_v57 }
  0x7c   :  { %9947 = vmatpush3.bf16.msra.mxu1 %v10496_v56  ;;  %9315 = vmatprep.subr.bf16.mxu0 %v10498_v58 }
  0x7d   :  { %9952 = vmatprep.subr.bf16.mxu1 %v11001_v32 }
 0x130   :  { %v465_v59 = vpop.f32.mrb[0].mxu0 }
 0x131   :  { %v467_v60 = vpop.f32.mrb[1].mxu0  ;;  %v9926_v61 = vpop.f32.mrb[0].mxu1 }
 0x132   :  { %v469_v62 = vpop.f32.mrb[2].mxu0  ;;  %v538_v63 = vpop.f32.mrb[1].mxu1 }
 0x133   :  { %v471_v0 = vpop.f32.mrb[3].mxu0  ;;  %v9927_v1 = vpop.f32.mrb[2].mxu1 }
 0x134   :  { %v541_v4 = vpop.f32.mrb[3].mxu1 }
 0x138   :  { %v475_v6 = vpop.f32.mrb[4].mxu0 }
 0x139   :  { %v477_v8 = vpop.f32.mrb[5].mxu0  ;;  %v9930_v9 = vpop.f32.mrb[4].mxu1 }
 0x13a   :  { %v577_v10 = vmax.f32 %v9926_v61, %v9930_v9  ;;  %v479_v11 = vpop.f32.mrb[6].mxu0  ;;  %v554_v12 = vpop.f32.mrb[5].mxu1 }
 0x13b   :  { %v571_v14 = vmax.f32 %v538_v63, %v554_v12  ;;  %v481_v15 = vpop.f32.mrb[7].mxu0  ;;  %v9931_v16 = vpop.f32.mrb[6].mxu1 }
 0x13c   :  { %v606_v18 = vadd.f32 %v594_v7, %v577_v10  ;;  %v580_v19 = vmax.f32 %v9927_v1, %v9931_v16  ;;  %v557_v20 = vpop.f32.mrb[7].mxu1 }
 0x13d   :  { %v600_v22 = vadd.f32 %v594_v7, %v571_v14  ;;  %v574_v23 = vmax.f32 %v541_v4, %v557_v20 }
 0x13e   :  { %v609_v24 = vadd.f32 %v594_v7, %v580_v19  ;;  %v618_v27 = vmax.f32 %v606_v18, 0.0 }
 0x13f   :  { %v603_v25 = vadd.f32 %v594_v7, %v574_v23  ;;  %v612_v31 = vmax.f32 %v600_v22, 0.0 }
 0x140   :  { %v11334_v28 = vmax.f32 %v609_v24, 0.0  ;;  %v485_v29 = vpop.f32.mrb[8].mxu0 }
 0x141   :  { %v615_v33 = vmax.f32 %v603_v25, 0.0  ;;  %v569_v34 = vmax.f32 %v465_v59, %v485_v29  ;;  %v487_v35 = vpop.f32.mrb[9].mxu0  ;;  %v10499_v25 = vld [vmem:[%s11029_s17 + $0x140] sm:$0xff]  }
 0x142   :  { %v627_v36 = vpack.c.bf16 %v11334_v28, %v618_v27  ;;  %v570_v38 = vmax.f32 %v467_v60, %v487_v35  ;;  %v489_v39 = vpop.f32.mrb[10].mxu0  ;;  %v8876_v23 = vpack.c.bf16 %v11334_v28, %v11334_v28  ;;  %v10501_v35 = vld [vmem:[%s11029_s17 + $0x108] sm:$0xff]  }
 0x143   :  { %v624_v40 = vpack.c.bf16 %v615_v33, %v612_v31  ;;  %v598_v41 = vadd.f32 %v586_v26, %v569_v34  ;;  %v572_v42 = vmax.f32 %v469_v62, %v489_v39  ;;  %v491_v43 = vpop.f32.mrb[11].mxu0  ;;  %v8873_v50 = vpack.c.bf16 %v615_v33, %v615_v33  ;;  %v10500_v33 = vld [vmem:[%s11029_s17 + $0xc0] sm:$0xff]  }
 0x144   :  { %v599_v44 = vadd.f32 %v590_v30, %v570_v38  ;;  %v573_v45 = vmax.f32 %v471_v0, %v491_v43  ;;  %v11366_v27 = vrot.slane %v627_v36, %v11238_v37 }
 0x145   :  { %v610_v46 = vmax.f32 %v598_v41, 0.0  ;;  %v601_v47 = vadd.f32 %v586_v26, %v572_v42  ;;  %v657_v57 = vrot.slane %v624_v40, %v11238_v37  ;;  %v11341_v62 = vrot.slane %v8873_v50, %v11238_v37  ;;  %v10506_v50 = vld [vmem:[%s11029_s17 + $0xd0] sm:$0xff]  }
 0x146   :  { %v611_v48 = vmax.f32 %v599_v44, 0.0  ;;  %v602_v49 = vadd.f32 %v590_v30, %v573_v45  ;;  %v11382_v41 = vrot.slane %v8876_v23, %v11238_v37  ;;  %v10527_v23 = vld [vmem:[%s11029_s17 + $0x188] sm:$0xff]  }
 0x147   :  { %v613_v51 = vmax.f32 %v601_v47, 0.0  ;;  %v10503_v47 = vld [vmem:[%s11029_s17 + $0xc8] sm:$0xff]  }
 0x148   :  { %v8871_v52 = vpack.c.bf16 %v611_v48, %v610_v46  ;;  %v614_v53 = vmax.f32 %v602_v49, 0.0  ;;  %v495_v54 = vpop.f32.mrb[12].mxu0  ;;  %v10502_v46 = vld [vmem:[%s11029_s17 + $0x148] sm:$0xff]   ;;  %v10504_v48 = vld [vmem:[%s11029_s17 + $0x110] sm:$0xff]  }
 0x149   :  { %v575_v55 = vmax.f32 %v475_v6, %v495_v54  ;;  %v497_v56 = vpop.f32.mrb[13].mxu0  ;;  %v10505_v49 = vld [vmem:[%s11029_s17 + $0x150] sm:$0xff]   ;;  %v10510_v54 = vld [vmem:[%s11029_s17 + $0x120] sm:$0xff]  }
 0x14a   :  { %v643_v58 = vrot.slane %v8871_v52, %v11238_v37  ;;  %v8872_v59 = vpack.c.bf16 %v614_v53, %v613_v51  ;;  %v576_v60 = vmax.f32 %v477_v8, %v497_v56  ;;  %v499_v61 = vpop.f32.mrb[14].mxu0  ;;  %v10507_v51 = vld [vmem:[%s11029_s17 + $0x118] sm:$0xff]   ;;  %v10512_v56 = vld [vmem:[%s11029_s17 + $0xe0] sm:$0xff]  }
 0x14b   :  { %v604_v63 = vadd.f32 %v586_v26, %v575_v55  ;;  %v578_v0 = vmax.f32 %v479_v11, %v499_v61  ;;  %v501_v1 = vpop.f32.mrb[15].mxu0  ;;  %v10508_v52 = vld [vmem:[%s11029_s17 + $0x158] sm:$0xff]   ;;  %v10511_v55 = vld [vmem:[%s11029_s17 + $0x160] sm:$0xff]   ;;  %v10517_v61 = vld [vmem:[%s11029_s17 + $0x170] sm:$0xff]  }
 0x14c   :  { %v665_v3 = vcombine.low %v643_v58, %v657_v57  ;;  %v666_v4 = vcombine.high %v643_v58, %v657_v57  ;;  %v11344_v7 = vrot.slane %v8872_v59, %v11238_v37  ;;  %v605_v6 = vadd.f32 %v590_v30, %v576_v60  ;;  %v10509_v53 = vld [vmem:[%s11029_s17 + $0xd8] sm:$0xff]   ;;  %v10513_v57 = vld [vmem:[%s11029_s17 + $0x128] sm:$0xff]   ;;  %v10516_v60 = vld [vmem:[%s11029_s17 + $0x130] sm:$0xff]  }
 0x14d   :  { %v616_v9 = vmax.f32 %v604_v63, 0.0  ;;  %v607_v10 = vadd.f32 %v586_v26, %v578_v0  ;;  %v579_v12 = vmax.f32 %v481_v15, %v501_v1  ;;  %v10514_v58 = vld [vmem:[%s11029_s17 + $0x168] sm:$0xff]   ;;  %v10518_v0 = vld [vmem:[%s11029_s17 + $0xf0] sm:$0xff]   ;;  %v10519_v1 = vld [vmem:[%s11029_s17 + $0x138] sm:$0xff]  }
 0x14e   :  { %v667_v8 = vcombine.low %v11344_v7, %v11341_v62  ;;  %v668_v14 = vcombine.high %v11344_v7, %v11341_v62  ;;  %v617_v16 = vmax.f32 %v605_v6, 0.0  ;;  %v11351_v11 = vrot.slane %v665_v3, %v11238_v37  ;;  %v10515_v59 = vld [vmem:[%s11029_s17 + $0xe8] sm:$0xff]   ;;  %v10520_v3 = vld [vmem:[%s11029_s17 + $0x178] sm:$0xff]  }
 0x14f   :  { %v619_v18 = vmax.f32 %v607_v10, 0.0  ;;  %v608_v19 = vadd.f32 %v590_v30, %v579_v12  ;;  %v11354_v20 = vrot.slane %v666_v4, %v11238_v37  ;;  %v10521_v6 = vld [vmem:[%s11029_s17 + $0xf8] sm:$0xff]   ;;  %v10522_v10 = vld [vmem:[%s11029_s17 + $0x1c0] sm:$0xff]  }
 0x150   :  { %v8874_v22 = vpack.c.bf16 %v617_v16, %v616_v9  ;;  %v1542_v15 = vrot.slane %v11351_v11, %v11238_v37  ;;  %v697_v63 = vcombine.high %v11351_v11, %v11351_v11  ;;  %v10523_v12 = vld [vmem:[%s11029_s17 + $0x200] sm:$0xff]   ;;  %v10592_v62 = vld [vmem:[%s11029_s17 + $0x3b8] sm:$0xff]  }
 0x151   :  { %v620_v24 = vmax.f32 %v608_v19, 0.0  ;;  %v11363_v26 = vrot.slane %v11354_v20, %v11238_v37  ;;  %v10524_v16 = vld [vmem:[%s11029_s17 + $0x180] sm:$0xff]   ;;  %v10593_v7 = vld [vmem:[%s11029_s17 + $0x338] sm:$0xff]  }
 0x152   :  { %v11369_v29 = vrot.slane %v8874_v22, %v11238_v37  ;;  %v1543_v30 = vcombine.high %v1542_v15, %v1542_v15  ;;  %v1550_v31 = vrot.slane %v1542_v15, %v11238_v37  ;;  %v11422_v4 = vrot.slane %v697_v63, %v11238_v37  ;;  %v10526_v15 = vld [vmem:[%s11029_s17 + $0x208] sm:$0xff]  }
 0x153   :  { %v8875_v34 = vpack.c.bf16 %v620_v24, %v619_v18  ;;  %v1793_v28 = vcombine.high %v11363_v26, %v11363_v26  ;;  %v1800_v9 = vrot.slane %v11363_v26, %v11238_v37  ;;  %v10525_v18 = vld [vmem:[%s11029_s17 + $0x1c8] sm:$0xff]   ;;  %v10528_v24 = vld [vmem:[%s11029_s17 + $0x1d0] sm:$0xff]  }
 0x154   :  { %v732_v38 = vcombine.low %v11369_v29, %v11366_v27  ;;  %v733_v36 = vcombine.high %v11369_v29, %v11366_v27  ;;  %v1557_v39 = vrot.slane %v1543_v30, %v11238_v37  ;;  %v1558_v40 = vcombine.high %v1550_v31, %v1550_v31  ;;  %v10530_v26 = vld [vmem:[%s11029_s17 + $0x190] sm:$0xff]   ;;  %v10531_v30 = vld [vmem:[%s11029_s17 + $0x1d8] sm:$0xff]   ;;  %v10551_v63 = vld [vmem:[%s11029_s17 + $0x248] sm:$0xff]  }
 0x155   :  { %v11385_v42 = vrot.slane %v8875_v34, %v11238_v37  ;;  %v1807_v43 = vrot.slane %v1793_v28, %v11238_v37  ;;  %v2043_v11 = vcombine.high %v11422_v4, %v11422_v4  ;;  %v1808_v19 = vcombine.high %v1800_v9, %v1800_v9  ;;  %v10534_v34 = vld [vmem:[%s11029_s17 + $0x1e0] sm:$0xff]  }
 0x156   :  { %1738 = vmatprep.mubr.bf16.mxu0 %v1557_v39  ;;  %9949 = vmatmul.mubr.bf16.vlgmr.msra.gmra.mrb[8].mxu1 %v1558_v40  ;;  %v10535_v28 = vld [vmem:[%s11029_s17 + $0x220] sm:$0xff]   ;;  %v10537_v39 = vld [vmem:[%s11029_s17 + $0x1e8] sm:$0xff]  }
 0x157   :  { %v734_v44 = vcombine.low %v11385_v42, %v11382_v41  ;;  %v735_v45 = vcombine.high %v11385_v42, %v11382_v41  ;;  %9953 = vmatpush3.bf16.msra.mxu1 %v10499_v25  ;;  %1739 = vmatmul.mubr.bf16.vlgmr.msra.gmra.mrb[16].mxu0 %v1550_v31  ;;  %v2057_v22 = vrot.slane %v2043_v11, %v11238_v37  ;;  %v10529_v25 = vld [vmem:[%s11029_s17 + $0x210] sm:$0xff]   ;;  %v10532_v31 = vld [vmem:[%s11029_s17 + $0x218] sm:$0xff]   ;;  %v10538_v40 = vld [vmem:[%s11029_s17 + $0x228] sm:$0xff]  }
 0x158   :  { %9316 = vmatpush3.bf16.msra.mxu0 %v10500_v33  ;;  %1988 = vmatprep.mubr.bf16.mxu0 %v1807_v43  ;;  %v10533_v33 = vld [vmem:[%s11029_s17 + $0x198] sm:$0xff]   ;;  %v10539_v43 = vld [vmem:[%s11029_s17 + $0x1a8] sm:$0xff]  }
 0x159   :  { %9954 = vmatprep.subr.bf16.mxu1 %v11001_v32  ;;  %9317 = vmatprep.subr.bf16.mxu0 %v10501_v35  ;;  %v10536_v35 = vld [vmem:[%s11029_s17 + $0x1a0] sm:$0xff]   ;;  %v10561_v11 = vld [vmem:[%s11029_s17 + $0x2a8] sm:$0xff]   ;;  %v10783_v41 = vld [vmem:[%s11029_s17 + $0x978] sm:$0xff]  }
 0x15a   :  { %9968 = vmatprep.mubr.msk.bf16.mxu1 %vm11002_vm1, %v11001_v32 }
 0x15b   :  { %9955 = vmatpush3.bf16.msra.mxu1 %v10502_v46  ;;  %v10540_v46 = vld [vmem:[%s11029_s17 + $0x1f0] sm:$0xff]  }
 0x15c   :  { %9318 = vmatpush3.bf16.msra.mxu0 %v10503_v47  ;;  %9956 = vmatprep.subr.bf16.mxu1 %v11001_v32  ;;  %v10541_v47 = vld [vmem:[%s11029_s17 + $0x230] sm:$0xff]  }
 0x15d   :  { %9319 = vmatprep.subr.bf16.mxu0 %v10504_v48  ;;  %v699_v48 = vcombine.high %v11354_v20, %v11354_v20  ;;  %v2050_v20 = vrot.slane %v11422_v4, %v11238_v37  ;;  %v10555_v4 = vld [vmem:[%s11029_s17 + $0x298] sm:$0xff]  }
 0x15f   :  { %9957 = vmatpush3.bf16.msra.mxu1 %v10505_v49  ;;  %v10542_v49 = vld [vmem:[%s11029_s17 + $0x1b0] sm:$0xff]  }
 0x160   :  { %9320 = vmatpush3.bf16.msra.mxu0 %v10506_v50  ;;  %9958 = vmatprep.subr.bf16.mxu1 %v11001_v32  ;;  %v10543_v50 = vld [vmem:[%s11029_s17 + $0x1f8] sm:$0xff]  }
 0x161   :  { %9321 = vmatprep.subr.bf16.mxu0 %v10507_v51  ;;  %v10544_v51 = vld [vmem:[%s11029_s17 + $0x238] sm:$0xff]  }
 0x163   :  { %9959 = vmatpush3.bf16.msra.mxu1 %v10508_v52  ;;  %v11466_v52 = vrot.slane %v699_v48, %v11238_v37  ;;  %v10576_v48 = vld [vmem:[%s11029_s17 + $0x350] sm:$0xff]  }
 0x164   :  { %9322 = vmatpush3.bf16.msra.mxu0 %v10509_v53  ;;  %9960 = vmatprep.subr.bf16.mxu1 %v11001_v32  ;;  %v10545_v53 = vld [vmem:[%s11029_s17 + $0x1b8] sm:$0xff]  }
 0x165   :  { %9323 = vmatprep.subr.bf16.mxu0 %v10510_v54  ;;  %v10546_v54 = vld [vmem:[%s11029_s17 + $0x280] sm:$0xff]  }
 0x167   :  { %9961 = vmatpush3.bf16.msra.mxu1 %v10511_v55  ;;  %v10547_v55 = vld [vmem:[%s11029_s17 + $0x2c0] sm:$0xff]  }
 0x168   :  { %9324 = vmatpush3.bf16.msra.mxu0 %v10512_v56  ;;  %9962 = vmatprep.subr.bf16.mxu1 %v11001_v32  ;;  %v2293_v56 = vcombine.high %v11466_v52, %v11466_v52 }
 0x169   :  { %9325 = vmatprep.subr.bf16.mxu0 %v10513_v57  ;;  %v10548_v57 = vld [vmem:[%s11029_s17 + $0x240] sm:$0xff]  }
 0x16b   :  { %9963 = vmatpush3.bf16.msra.mxu1 %v10514_v58  ;;  %v2058_v58 = vcombine.high %v2050_v20, %v2050_v20 }
 0x16c   :  { %9326 = vmatpush3.bf16.msra.mxu0 %v10515_v59  ;;  %9964 = vmatprep.subr.bf16.mxu1 %v11001_v32  ;;  %v10549_v59 = vld [vmem:[%s11029_s17 + $0x288] sm:$0xff]  }
 0x16d   :  { %9327 = vmatprep.subr.bf16.mxu0 %v10516_v60  ;;  %v2307_v60 = vrot.slane %v2293_v56, %v11238_v37  ;;  %v10585_v56 = vld [vmem:[%s11029_s17 + $0x368] sm:$0xff]  }
 0x16f   :  { %9965 = vmatpush3.bf16.msra.mxu1 %v10517_v61  ;;  %v10550_v61 = vld [vmem:[%s11029_s17 + $0x2c8] sm:$0xff]  }
 0x170   :  { %9328 = vmatpush3.bf16.msra.mxu0 %v10518_v0  ;;  %9966 = vmatprep.subr.bf16.mxu1 %v11001_v32  ;;  %v10552_v0 = vld [vmem:[%s11029_s17 + $0x290] sm:$0xff]  }
 0x171   :  { %9329 = vmatprep.subr.bf16.mxu0 %v10519_v1  ;;  %v10553_v1 = vld [vmem:[%s11029_s17 + $0x2d0] sm:$0xff]  }
 0x173   :  { %9967 = vmatpush3.bf16.msra.mxu1 %v10520_v3  ;;  %v10554_v3 = vld [vmem:[%s11029_s17 + $0x250] sm:$0xff]  }
 0x174   :  { %9330 = vmatpush3.bf16.msra.mxu0 %v10521_v6  ;;  %9972 = vmatprep.subr.bf16.mxu1 %v11001_v32  ;;  %v10556_v6 = vld [vmem:[%s11029_s17 + $0x2d8] sm:$0xff]  }
 0x175   :  { %9346 = vmatprep.subr.bf16.mxu0 %v10522_v10  ;;  %v10558_v10 = vld [vmem:[%s11029_s17 + $0x2a0] sm:$0xff]  }
 0x176   :  { %9969 = vmatmul.mubr.bf16.vlgmr.msra.gmra.mrb[12].mxu1 %v1808_v19  ;;  %v10563_v19 = vld [vmem:[%s11029_s17 + $0x268] sm:$0xff]  }
 0x177   :  { %1989 = vmatmul.mubr.bf16.vlgmr.msra.gmra.mrb[20].mxu0 %v1800_v9  ;;  %9973 = vmatpush3.bf16.msra.mxu1 %v10523_v12  ;;  %v10557_v9 = vld [vmem:[%s11029_s17 + $0x258] sm:$0xff]   ;;  %v10559_v12 = vld [vmem:[%s11029_s17 + $0x2e0] sm:$0xff]  }
 0x178   :  { %9347 = vmatpush3.bf16.msra.mxu0 %v10524_v16  ;;  %2238 = vmatprep.mubr.bf16.mxu0 %v2057_v22  ;;  %v10560_v16 = vld [vmem:[%s11029_s17 + $0x260] sm:$0xff]   ;;  %v10564_v22 = vld [vmem:[%s11029_s17 + $0x2b0] sm:$0xff]  }
 0x179   :  { %9974 = vmatprep.subr.bf16.mxu1 %v11001_v32  ;;  %9348 = vmatprep.subr.bf16.mxu0 %v10525_v18  ;;  %v10562_v18 = vld [vmem:[%s11029_s17 + $0x2e8] sm:$0xff]  }
 0x17a   :  { %9988 = vmatprep.mubr.msk.bf16.mxu1 %vm11002_vm1, %v11001_v32 }
 0x17b   :  { %9975 = vmatpush3.bf16.msra.mxu1 %v10526_v15  ;;  %v11506_v15 = vrot.slane %v667_v8, %v11238_v37  ;;  %v10568_v8 = vld [vmem:[%s11029_s17 + $0x2f8] sm:$0xff]  }
 0x17c   :  { %9349 = vmatpush3.bf16.msra.mxu0 %v10527_v23  ;;  %9976 = vmatprep.subr.bf16.mxu1 %v11001_v32  ;;  %v10565_v23 = vld [vmem:[%s11029_s17 + $0x2f0] sm:$0xff]  }
 0x17d   :  { %9350 = vmatprep.subr.bf16.mxu0 %v10528_v24  ;;  %v10566_v24 = vld [vmem:[%s11029_s17 + $0x270] sm:$0xff]  }
 0x17f   :  { %9977 = vmatpush3.bf16.msra.mxu1 %v10529_v25  ;;  %v10567_v25 = vld [vmem:[%s11029_s17 + $0x2b8] sm:$0xff]  }
 0x180   :  { %9351 = vmatpush3.bf16.msra.mxu0 %v10530_v26  ;;  %9978 = vmatprep.subr.bf16.mxu1 %v11001_v32  ;;  %v11516_v26 = vrot.slane %v11506_v15, %v11238_v37 }
 0x181   :  { %9352 = vmatprep.subr.bf16.mxu0 %v10531_v30  ;;  %v10569_v30 = vld [vmem:[%s11029_s17 + $0x278] sm:$0xff]  }
 0x183   :  { %9979 = vmatpush3.bf16.msra.mxu1 %v10532_v31  ;;  %v2300_v31 = vrot.slane %v11466_v52, %v11238_v37  ;;  %v10580_v52 = vld [vmem:[%s11029_s17 + $0x398] sm:$0xff]  }
 0x184   :  { %9353 = vmatpush3.bf16.msra.mxu0 %v10533_v33  ;;  %9980 = vmatprep.subr.bf16.mxu1 %v11001_v32  ;;  %v10570_v33 = vld [vmem:[%s11029_s17 + $0x340] sm:$0xff]  }
 0x185   :  { %9354 = vmatprep.subr.bf16.mxu0 %v10534_v34  ;;  %v2543_v34 = vcombine.high %v11516_v26, %v11516_v26 }
 0x187   :  { %9981 = vmatpush3.bf16.msra.mxu1 %v10535_v28  ;;  %v10571_v28 = vld [vmem:[%s11029_s17 + $0x380] sm:$0xff]  }
 0x188   :  { %9355 = vmatpush3.bf16.msra.mxu0 %v10536_v35  ;;  %9982 = vmatprep.subr.bf16.mxu1 %v11001_v32  ;;  %v2308_v35 = vcombine.high %v2300_v31, %v2300_v31 }
 0x189   :  { %9356 = vmatprep.subr.bf16.mxu0 %v10537_v39  ;;  %v10572_v39 = vld [vmem:[%s11029_s17 + $0x300] sm:$0xff]  }
 0x18b   :  { %9983 = vmatpush3.bf16.msra.mxu1 %v10538_v40  ;;  %v10573_v40 = vld [vmem:[%s11029_s17 + $0x348] sm:$0xff]  }
 0x18c   :  { %9357 = vmatpush3.bf16.msra.mxu0 %v10539_v43  ;;  %9984 = vmatprep.subr.bf16.mxu1 %v11001_v32  ;;  %v2557_v43 = vrot.slane %v2543_v34, %v11238_v37  ;;  %v10610_v34 = vld [vmem:[%s11029_s17 + $0x468] sm:$0xff]  }
 0x18d   :  { %9358 = vmatprep.subr.bf16.mxu0 %v10540_v46  ;;  %v10574_v46 = vld [vmem:[%s11029_s17 + $0x388] sm:$0xff]  }
 0x18f   :  { %9985 = vmatpush3.bf16.msra.mxu1 %v10541_v47  ;;  %v10575_v47 = vld [vmem:[%s11029_s17 + $0x308] sm:$0xff]  }
 0x190   :  { %9359 = vmatpush3.bf16.msra.mxu0 %v10542_v49  ;;  %9986 = vmatprep.subr.bf16.mxu1 %v11001_v32  ;;  %v10577_v49 = vld [vmem:[%s11029_s17 + $0x390] sm:$0xff]  }
 0x191   :  { %9360 = vmatprep.subr.bf16.mxu0 %v10543_v50  ;;  %v10578_v50 = vld [vmem:[%s11029_s17 + $0x310] sm:$0xff]  }
 0x193   :  { %9987 = vmatpush3.bf16.msra.mxu1 %v10544_v51  ;;  %v10579_v51 = vld [vmem:[%s11029_s17 + $0x358] sm:$0xff]  }
 0x194   :  { %9361 = vmatpush3.bf16.msra.mxu0 %v10545_v53  ;;  %9992 = vmatprep.subr.bf16.mxu1 %v11001_v32  ;;  %v10581_v53 = vld [vmem:[%s11029_s17 + $0x318] sm:$0xff]  }
 0x195   :  { %9377 = vmatprep.subr.bf16.mxu0 %v10546_v54  ;;  %v10583_v54 = vld [vmem:[%s11029_s17 + $0x3a0] sm:$0xff]  }
 0x196   :  { %9989 = vmatmul.mubr.bf16.vlgmr.msra.gmra.mrb[16].mxu1 %v2058_v58  ;;  %v10587_v58 = vld [vmem:[%s11029_s17 + $0x328] sm:$0xff]  }
 0x197   :  { %2239 = vmatmul.mubr.bf16.vlgmr.msra.gmra.mrb[24].mxu0 %v2050_v20  ;;  %9993 = vmatpush3.bf16.msra.mxu1 %v10547_v55  ;;  %v10582_v20 = vld [vmem:[%s11029_s17 + $0x360] sm:$0xff]  }
 0x198   :  { %9378 = vmatpush3.bf16.msra.mxu0 %v10548_v57  ;;  %2488 = vmatprep.mubr.bf16.mxu0 %v2307_v60  ;;  %v10584_v55 = vld [vmem:[%s11029_s17 + $0x320] sm:$0xff]   ;;  %v10586_v57 = vld [vmem:[%s11029_s17 + $0x3a8] sm:$0xff]   ;;  %v11557_v60 = vrot.slane %v668_v14, %v11238_v37  ;;  %v2550_v14 = vrot.slane %v11516_v26, %v11238_v37  ;;  %v10605_v26 = vld [vmem:[%s11029_s17 + $0x3d8] sm:$0xff]  }
 0x199   :  { %9994 = vmatprep.subr.bf16.mxu1 %v11001_v32  ;;  %9379 = vmatprep.subr.bf16.mxu0 %v10549_v59  ;;  %v10588_v59 = vld [vmem:[%s11029_s17 + $0x370] sm:$0xff]  }
 0x19a   :  { %10008 = vmatprep.mubr.msk.bf16.mxu1 %vm11002_vm1, %v11001_v32 }
 0x19b   :  { %9995 = vmatpush3.bf16.msra.mxu1 %v10550_v61  ;;  %v10589_v61 = vld [vmem:[%s11029_s17 + $0x3b0] sm:$0xff]  }
 0x19c   :  { %9380 = vmatpush3.bf16.msra.mxu0 %v10551_v63  ;;  %9996 = vmatprep.subr.bf16.mxu1 %v11001_v32  ;;  %v10590_v63 = vld [vmem:[%s11029_s17 + $0x330] sm:$0xff]  }
 0x19d   :  { %9381 = vmatprep.subr.bf16.mxu0 %v10552_v0  ;;  %v10591_v0 = vld [vmem:[%s11029_s17 + $0x378] sm:$0xff]  }
 0x19f   :  { %9997 = vmatpush3.bf16.msra.mxu1 %v10553_v1  ;;  %v11565_v1 = vrot.slane %v11557_v60, %v11238_v37 }
 0x1a0   :  { %9382 = vmatpush3.bf16.msra.mxu0 %v10554_v3  ;;  %9998 = vmatprep.subr.bf16.mxu1 %v11001_v32  ;;  %v10594_v3 = vld [vmem:[%s11029_s17 + $0x400] sm:$0xff]  }
 0x1a1   :  { %9383 = vmatprep.subr.bf16.mxu0 %v10555_v4  ;;  %v2793_v4 = vcombine.high %v11565_v1, %v11565_v1 }
 0x1a3   :  { %9999 = vmatpush3.bf16.msra.mxu1 %v10556_v6  ;;  %v10595_v6 = vld [vmem:[%s11029_s17 + $0x440] sm:$0xff]  }
 0x1a4   :  { %9384 = vmatpush3.bf16.msra.mxu0 %v10557_v9  ;;  %10000 = vmatprep.subr.bf16.mxu1 %v11001_v32  ;;  %v2558_v9 = vcombine.high %v2550_v14, %v2550_v14 }
 0x1a5   :  { %9385 = vmatprep.subr.bf16.mxu0 %v10558_v10  ;;  %v10596_v10 = vld [vmem:[%s11029_s17 + $0x3c0] sm:$0xff]  }
 0x1a7   :  { %10001 = vmatpush3.bf16.msra.mxu1 %v10559_v12  ;;  %v10597_v12 = vld [vmem:[%s11029_s17 + $0x408] sm:$0xff]  }
 0x1a8   :  { %9386 = vmatpush3.bf16.msra.mxu0 %v10560_v16  ;;  %10002 = vmatprep.subr.bf16.mxu1 %v11001_v32  ;;  %v2807_v16 = vrot.slane %v2793_v4, %v11238_v37  ;;  %v10634_v4 = vld [vmem:[%s11029_s17 + $0x528] sm:$0xff]  }
 0x1a9   :  { %9387 = vmatprep.subr.bf16.mxu0 %v10561_v11  ;;  %v10598_v11 = vld [vmem:[%s11029_s17 + $0x448] sm:$0xff]  }
 0x1ab   :  { %10003 = vmatpush3.bf16.msra.mxu1 %v10562_v18  ;;  %v10599_v18 = vld [vmem:[%s11029_s17 + $0x3c8] sm:$0xff]  }
 0x1ac   :  { %9388 = vmatpush3.bf16.msra.mxu0 %v10563_v19  ;;  %10004 = vmatprep.subr.bf16.mxu1 %v11001_v32  ;;  %v10600_v19 = vld [vmem:[%s11029_s17 + $0x410] sm:$0xff]  }
 0x1ad   :  { %9389 = vmatprep.subr.bf16.mxu0 %v10564_v22  ;;  %v10601_v22 = vld [vmem:[%s11029_s17 + $0x450] sm:$0xff]  }
 0x1af   :  { %10005 = vmatpush3.bf16.msra.mxu1 %v10565_v23  ;;  %v10602_v23 = vld [vmem:[%s11029_s17 + $0x3d0] sm:$0xff]  }
 0x1b0   :  { %9390 = vmatpush3.bf16.msra.mxu0 %v10566_v24  ;;  %10006 = vmatprep.subr.bf16.mxu1 %v11001_v32  ;;  %v10603_v24 = vld [vmem:[%s11029_s17 + $0x418] sm:$0xff]  }
 0x1b1   :  { %9391 = vmatprep.subr.bf16.mxu0 %v10567_v25  ;;  %v10604_v25 = vld [vmem:[%s11029_s17 + $0x458] sm:$0xff]  }
 0x1b3   :  { %10007 = vmatpush3.bf16.msra.mxu1 %v10568_v8  ;;  %v10606_v8 = vld [vmem:[%s11029_s17 + $0x420] sm:$0xff]  }
 0x1b4   :  { %9392 = vmatpush3.bf16.msra.mxu0 %v10569_v30  ;;  %10012 = vmatprep.subr.bf16.mxu1 %v11001_v32  ;;  %v10607_v30 = vld [vmem:[%s11029_s17 + $0x460] sm:$0xff]  }
 0x1b5   :  { %9408 = vmatprep.subr.bf16.mxu0 %v10570_v33  ;;  %v10609_v33 = vld [vmem:[%s11029_s17 + $0x428] sm:$0xff]  }
 0x1b6   :  { %10009 = vmatmul.mubr.bf16.vlgmr.msra.gmra.mrb[20].mxu1 %v2308_v35  ;;  %v10612_v35 = vld [vmem:[%s11029_s17 + $0x430] sm:$0xff]  }
 0x1b7   :  { %2489 = vmatmul.mubr.bf16.vlgmr.msra.gmra.mrb[28].mxu0 %v2300_v31  ;;  %10013 = vmatpush3.bf16.msra.mxu1 %v10571_v28  ;;  %v10608_v31 = vld [vmem:[%s11029_s17 + $0x3e0] sm:$0xff]   ;;  %v10611_v28 = vld [vmem:[%s11029_s17 + $0x3e8] sm:$0xff]  }
 0x1b8   :  { %9409 = vmatpush3.bf16.msra.mxu0 %v10572_v39  ;;  %2738 = vmatprep.mubr.bf16.mxu0 %v2557_v43  ;;  %v698_v39 = vcombine.high %v11506_v15, %v11506_v15  ;;  %v10614_v43 = vld [vmem:[%s11029_s17 + $0x3f0] sm:$0xff]   ;;  %v10617_v15 = vld [vmem:[%s11029_s17 + $0x3f8] sm:$0xff]  }
 0x1b9   :  { %10014 = vmatprep.subr.bf16.mxu1 %v11001_v32  ;;  %9410 = vmatprep.subr.bf16.mxu0 %v10573_v40  ;;  %v10613_v40 = vld [vmem:[%s11029_s17 + $0x470] sm:$0xff]  }
 0x1ba   :  { %10028 = vmatprep.mubr.msk.bf16.mxu1 %vm11002_vm1, %v11001_v32 }
 0x1bb   :  { %10015 = vmatpush3.bf16.msra.mxu1 %v10574_v46  ;;  %v10615_v46 = vld [vmem:[%s11029_s17 + $0x438] sm:$0xff]  }
 0x1bc   :  { %9411 = vmatpush3.bf16.msra.mxu0 %v10575_v47  ;;  %10016 = vmatprep.subr.bf16.mxu1 %v11001_v32  ;;  %v11609_v47 = vrot.slane %v698_v39, %v11238_v37  ;;  %v10650_v39 = vld [vmem:[%s11029_s17 + $0x550] sm:$0xff]  }
 0x1bd   :  { %9412 = vmatprep.subr.bf16.mxu0 %v10576_v48  ;;  %v10616_v48 = vld [vmem:[%s11029_s17 + $0x478] sm:$0xff]  }
 0x1bf   :  { %10017 = vmatpush3.bf16.msra.mxu1 %v10577_v49  ;;  %v2800_v49 = vrot.slane %v11565_v1, %v11238_v37  ;;  %v10629_v1 = vld [vmem:[%s11029_s17 + $0x498] sm:$0xff]  }
 0x1c0   :  { %9413 = vmatpush3.bf16.msra.mxu0 %v10578_v50  ;;  %10018 = vmatprep.subr.bf16.mxu1 %v11001_v32  ;;  %v10618_v50 = vld [vmem:[%s11029_s17 + $0x4c0] sm:$0xff]  }
 0x1c1   :  { %9414 = vmatprep.subr.bf16.mxu0 %v10579_v51  ;;  %v3043_v51 = vcombine.high %v11609_v47, %v11609_v47 }
 0x1c3   :  { %10019 = vmatpush3.bf16.msra.mxu1 %v10580_v52  ;;  %v10619_v52 = vld [vmem:[%s11029_s17 + $0x500] sm:$0xff]  }
 0x1c4   :  { %9415 = vmatpush3.bf16.msra.mxu0 %v10581_v53  ;;  %10020 = vmatprep.subr.bf16.mxu1 %v11001_v32  ;;  %v2808_v53 = vcombine.high %v2800_v49, %v2800_v49 }
 0x1c5   :  { %9416 = vmatprep.subr.bf16.mxu0 %v10582_v20  ;;  %v10620_v20 = vld [vmem:[%s11029_s17 + $0x480] sm:$0xff]  }
 0x1c7   :  { %10021 = vmatpush3.bf16.msra.mxu1 %v10583_v54  ;;  %v10621_v54 = vld [vmem:[%s11029_s17 + $0x4c8] sm:$0xff]  }
 0x1c8   :  { %9417 = vmatpush3.bf16.msra.mxu0 %v10584_v55  ;;  %10022 = vmatprep.subr.bf16.mxu1 %v11001_v32  ;;  %v3057_v55 = vrot.slane %v3043_v51, %v11238_v37  ;;  %v10659_v51 = vld [vmem:[%s11029_s17 + $0x568] sm:$0xff]  }
 0x1c9   :  { %9418 = vmatprep.subr.bf16.mxu0 %v10585_v56  ;;  %v10622_v56 = vld [vmem:[%s11029_s17 + $0x508] sm:$0xff]  }
 0x1cb   :  { %10023 = vmatpush3.bf16.msra.mxu1 %v10586_v57  ;;  %v10623_v57 = vld [vmem:[%s11029_s17 + $0x488] sm:$0xff]  }
 0x1cc   :  { %9419 = vmatpush3.bf16.msra.mxu0 %v10587_v58  ;;  %10024 = vmatprep.subr.bf16.mxu1 %v11001_v32  ;;  %v10624_v58 = vld [vmem:[%s11029_s17 + $0x4d0] sm:$0xff]  }
 0x1cd   :  { %9420 = vmatprep.subr.bf16.mxu0 %v10588_v59  ;;  %v10625_v59 = vld [vmem:[%s11029_s17 + $0x510] sm:$0xff]  }
 0x1cf   :  { %10025 = vmatpush3.bf16.msra.mxu1 %v10589_v61  ;;  %v10626_v61 = vld [vmem:[%s11029_s17 + $0x490] sm:$0xff]  }
 0x1d0   :  { %9421 = vmatpush3.bf16.msra.mxu0 %v10590_v63  ;;  %10026 = vmatprep.subr.bf16.mxu1 %v11001_v32  ;;  %v10627_v63 = vld [vmem:[%s11029_s17 + $0x4d8] sm:$0xff]  }
 0x1d1   :  { %9422 = vmatprep.subr.bf16.mxu0 %v10591_v0  ;;  %v10628_v0 = vld [vmem:[%s11029_s17 + $0x518] sm:$0xff]  }
 0x1d3   :  { %10027 = vmatpush3.bf16.msra.mxu1 %v10592_v62  ;;  %v10630_v62 = vld [vmem:[%s11029_s17 + $0x4e0] sm:$0xff]  }
 0x1d4   :  { %9423 = vmatpush3.bf16.msra.mxu0 %v10593_v7  ;;  %10032 = vmatprep.subr.bf16.mxu1 %v11001_v32  ;;  %v10631_v7 = vld [vmem:[%s11029_s17 + $0x520] sm:$0xff]  }
 0x1d5   :  { %9439 = vmatprep.subr.bf16.mxu0 %v10594_v3  ;;  %v10633_v3 = vld [vmem:[%s11029_s17 + $0x4e8] sm:$0xff]  }
 0x1d6   :  { %10029 = vmatmul.mubr.bf16.vlgmr.msra.gmra.mrb[24].mxu1 %v2558_v9  ;;  %v10636_v9 = vld [vmem:[%s11029_s17 + $0x4f0] sm:$0xff]  }
 0x1d7   :  { %2739 = vmatmul.mubr.bf16.vlgmr.msra.gmra.mrb[32].mxu0 %v2550_v14  ;;  %10033 = vmatpush3.bf16.msra.mxu1 %v10595_v6  ;;  %v10632_v14 = vld [vmem:[%s11029_s17 + $0x4a0] sm:$0xff]   ;;  %v10635_v6 = vld [vmem:[%s11029_s17 + $0x4a8] sm:$0xff]  }
 0x1d8   :  { %9440 = vmatpush3.bf16.msra.mxu0 %v10596_v10  ;;  %2988 = vmatprep.mubr.bf16.mxu0 %v2807_v16  ;;  %v700_v10 = vcombine.high %v11557_v60, %v11557_v60  ;;  %v10638_v16 = vld [vmem:[%s11029_s17 + $0x4b0] sm:$0xff]   ;;  %v10641_v60 = vld [vmem:[%s11029_s17 + $0x4b8] sm:$0xff]  }
 0x1d9   :  { %10034 = vmatprep.subr.bf16.mxu1 %v11001_v32  ;;  %9441 = vmatprep.subr.bf16.mxu0 %v10597_v12  ;;  %v10637_v12 = vld [vmem:[%s11029_s17 + $0x530] sm:$0xff]  }
 0x1da   :  { %10048 = vmatprep.mubr.msk.bf16.mxu1 %vm11002_vm1, %v11001_v32 }
 0x1db   :  { %10035 = vmatpush3.bf16.msra.mxu1 %v10598_v11  ;;  %v10639_v11 = vld [vmem:[%s11029_s17 + $0x4f8] sm:$0xff]  }
 0x1dc   :  { %9442 = vmatpush3.bf16.msra.mxu0 %v10599_v18  ;;  %10036 = vmatprep.subr.bf16.mxu1 %v11001_v32  ;;  %v11653_v18 = vrot.slane %v700_v10, %v11238_v37  ;;  %v10667_v10 = vld [vmem:[%s11029_s17 + $0x680] sm:$0xff]  }
 0x1dd   :  { %9443 = vmatprep.subr.bf16.mxu0 %v10600_v19  ;;  %v10640_v19 = vld [vmem:[%s11029_s17 + $0x538] sm:$0xff]  }
 0x1df   :  { %10037 = vmatpush3.bf16.msra.mxu1 %v10601_v22  ;;  %v3050_v22 = vrot.slane %v11609_v47, %v11238_v37  ;;  %v10654_v47 = vld [vmem:[%s11029_s17 + $0x5a0] sm:$0xff]  }
 0x1e0   :  { %9444 = vmatpush3.bf16.msra.mxu0 %v10602_v23  ;;  %10038 = vmatprep.subr.bf16.mxu1 %v11001_v32  ;;  %v10642_v23 = vld [vmem:[%s11029_s17 + $0x580] sm:$0xff]  }
 0x1e1   :  { %9445 = vmatprep.subr.bf16.mxu0 %v10603_v24  ;;  %v3293_v24 = vcombine.high %v11653_v18, %v11653_v18 }
 0x1e3   :  { %10039 = vmatpush3.bf16.msra.mxu1 %v10604_v25  ;;  %v10643_v25 = vld [vmem:[%s11029_s17 + $0x5c0] sm:$0xff]  }
 0x1e4   :  { %9446 = vmatpush3.bf16.msra.mxu0 %v10605_v26  ;;  %10040 = vmatprep.subr.bf16.mxu1 %v11001_v32  ;;  %v3058_v26 = vcombine.high %v3050_v22, %v3050_v22 }
 0x1e5   :  { %9447 = vmatprep.subr.bf16.mxu0 %v10606_v8  ;;  %v10644_v8 = vld [vmem:[%s11029_s17 + $0x540] sm:$0xff]  }
 0x1e7   :  { %10041 = vmatpush3.bf16.msra.mxu1 %v10607_v30  ;;  %v10645_v30 = vld [vmem:[%s11029_s17 + $0x588] sm:$0xff]  }
 0x1e8   :  { %9448 = vmatpush3.bf16.msra.mxu0 %v10608_v31  ;;  %10042 = vmatprep.subr.bf16.mxu1 %v11001_v32  ;;  %v3307_v31 = vrot.slane %v3293_v24, %v11238_v37  ;;  %v10674_v24 = vld [vmem:[%s11029_s17 + $0x610] sm:$0xff]  }
 0x1e9   :  { %9449 = vmatprep.subr.bf16.mxu0 %v10609_v33  ;;  %v10646_v33 = vld [vmem:[%s11029_s17 + $0x5c8] sm:$0xff]  }
 0x1eb   :  { %10043 = vmatpush3.bf16.msra.mxu1 %v10610_v34  ;;  %v10647_v34 = vld [vmem:[%s11029_s17 + $0x548] sm:$0xff]  }
 0x1ec   :  { %9450 = vmatpush3.bf16.msra.mxu0 %v10611_v28  ;;  %10044 = vmatprep.subr.bf16.mxu1 %v11001_v32  ;;  %v10648_v28 = vld [vmem:[%s11029_s17 + $0x590] sm:$0xff]  }
 0x1ed   :  { %9451 = vmatprep.subr.bf16.mxu0 %v10612_v35  ;;  %v10649_v35 = vld [vmem:[%s11029_s17 + $0x5d0] sm:$0xff]  }
 0x1ef   :  { %10045 = vmatpush3.bf16.msra.mxu1 %v10613_v40  ;;  %v10651_v40 = vld [vmem:[%s11029_s17 + $0x598] sm:$0xff]  }
 0x1f0   :  { %9452 = vmatpush3.bf16.msra.mxu0 %v10614_v43  ;;  %10046 = vmatprep.subr.bf16.mxu1 %v11001_v32  ;;  %v10652_v43 = vld [vmem:[%s11029_s17 + $0x5d8] sm:$0xff]  }
 0x1f1   :  { %9453 = vmatprep.subr.bf16.mxu0 %v10615_v46  ;;  %v10653_v46 = vld [vmem:[%s11029_s17 + $0x558] sm:$0xff]  }
 0x1f3   :  { %10047 = vmatpush3.bf16.msra.mxu1 %v10616_v48  ;;  %v10655_v48 = vld [vmem:[%s11029_s17 + $0x5e0] sm:$0xff]  }
 0x1f4   :  { %9454 = vmatpush3.bf16.msra.mxu0 %v10617_v15  ;;  %10052 = vmatprep.subr.bf16.mxu1 %v11001_v32  ;;  %v10656_v15 = vld [vmem:[%s11029_s17 + $0x560] sm:$0xff]  }
 0x1f5   :  { %9470 = vmatprep.subr.bf16.mxu0 %v10618_v50  ;;  %v10658_v50 = vld [vmem:[%s11029_s17 + $0x5e8] sm:$0xff]  }
 0x1f6   :  { %10049 = vmatmul.mubr.bf16.vlgmr.msra.gmra.mrb[28].mxu1 %v2808_v53  ;;  %v10660_v53 = vld [vmem:[%s11029_s17 + $0x5b0] sm:$0xff]  }
 0x1f7   :  { %2989 = vmatmul.mubr.bf16.vlgmr.msra.gmra.mrb[36].mxu0 %v2800_v49  ;;  %10053 = vmatpush3.bf16.msra.mxu1 %v10619_v52  ;;  %v10657_v49 = vld [vmem:[%s11029_s17 + $0x5a8] sm:$0xff]  }
 0x1f8   :  { %9471 = vmatpush3.bf16.msra.mxu0 %v10620_v20  ;;  %3238 = vmatprep.mubr.bf16.mxu0 %v3057_v55  ;;  %v11694_v55 = vrot.slane %v732_v38, %v11238_v37 }
 0x1f9   :  { %10054 = vmatprep.subr.bf16.mxu1 %v11001_v32  ;;  %9472 = vmatprep.subr.bf16.mxu0 %v10621_v54 }
 0x1fa   :  { %10068 = vmatprep.mubr.msk.bf16.mxu1 %vm11002_vm1, %v11001_v32 }
 0x1fb   :  { %10055 = vmatpush3.bf16.msra.mxu1 %v10622_v56 }
 0x1fc   :  { %9473 = vmatpush3.bf16.msra.mxu0 %v10623_v57  ;;  %10056 = vmatprep.subr.bf16.mxu1 %v11001_v32 }
 0x1fd   :  { %9474 = vmatprep.subr.bf16.mxu0 %v10624_v58  ;;  %v10661_v58 = vld [vmem:[%s11029_s17 + $0x5f0] sm:$0xff]  }
 0x1ff   :  { %10057 = vmatpush3.bf16.msra.mxu1 %v10625_v59 }
 0x200   :  { %9475 = vmatpush3.bf16.msra.mxu0 %v10626_v61  ;;  %10058 = vmatprep.subr.bf16.mxu1 %v11001_v32 }
 0x201   :  { %9476 = vmatprep.subr.bf16.mxu0 %v10627_v63 }
 0x203   :  { %10059 = vmatpush3.bf16.msra.mxu1 %v10628_v0  ;;  %v10662_v0 = vld [vmem:[%s11029_s17 + $0x570] sm:$0xff]  }
 0x204   :  { %9477 = vmatpush3.bf16.msra.mxu0 %v10629_v1  ;;  %10060 = vmatprep.subr.bf16.mxu1 %v11001_v32 }
 0x205   :  { %9478 = vmatprep.subr.bf16.mxu0 %v10630_v62  ;;  %v10663_v62 = vld [vmem:[%s11029_s17 + $0x5b8] sm:$0xff]  }
 0x207   :  { %10061 = vmatpush3.bf16.msra.mxu1 %v10631_v7  ;;  %v11704_v7 = vrot.slane %v11694_v55, %v11238_v37 }
 0x208   :  { %9479 = vmatpush3.bf16.msra.mxu0 %v10632_v14  ;;  %10062 = vmatprep.subr.bf16.mxu1 %v11001_v32  ;;  %v10664_v14 = vld [vmem:[%s11029_s17 + $0x5f8] sm:$0xff]  }
 0x209   :  { %9480 = vmatprep.subr.bf16.mxu0 %v10633_v3  ;;  %v10665_v3 = vld [vmem:[%s11029_s17 + $0x578] sm:$0xff]  }
 0x20b   :  { %10063 = vmatpush3.bf16.msra.mxu1 %v10634_v4  ;;  %v3300_v4 = vrot.slane %v11653_v18, %v11238_v37 }
 0x20c   :  { %9481 = vmatpush3.bf16.msra.mxu0 %v10635_v6  ;;  %10064 = vmatprep.subr.bf16.mxu1 %v11001_v32  ;;  %v10666_v6 = vld [vmem:[%s11029_s17 + $0x640] sm:$0xff]  }
 0x20d   :  { %9482 = vmatprep.subr.bf16.mxu0 %v10636_v9  ;;  %v3543_v9 = vcombine.high %v11704_v7, %v11704_v7 }
 0x20f   :  { %10065 = vmatpush3.bf16.msra.mxu1 %v10637_v12  ;;  %v3308_v12 = vcombine.high %v3300_v4, %v3300_v4  ;;  %v3557_v18 = vrot.slane %v3543_v9, %v11238_v37  ;;  %v10697_v9 = vld [vmem:[%s11029_s17 + $0x750] sm:$0xff]  }
 0x210   :  { %9483 = vmatpush3.bf16.msra.mxu0 %v10638_v16  ;;  %10066 = vmatprep.subr.bf16.mxu1 %v11001_v32  ;;  %v10668_v16 = vld [vmem:[%s11029_s17 + $0x600] sm:$0xff]  }
 0x211   :  { %9484 = vmatprep.subr.bf16.mxu0 %v10639_v11  ;;  %v10669_v11 = vld [vmem:[%s11029_s17 + $0x648] sm:$0xff]  }
 0x213   :  { %10067 = vmatpush3.bf16.msra.mxu1 %v10640_v19  ;;  %v10670_v19 = vld [vmem:[%s11029_s17 + $0x688] sm:$0xff]  }
 0x214   :  { %9485 = vmatpush3.bf16.msra.mxu0 %v10641_v60  ;;  %10072 = vmatprep.subr.bf16.mxu1 %v11001_v32  ;;  %v10671_v60 = vld [vmem:[%s11029_s17 + $0x608] sm:$0xff]  }
 0x215   :  { %9501 = vmatprep.subr.bf16.mxu0 %v10642_v23  ;;  %v10673_v23 = vld [vmem:[%s11029_s17 + $0x690] sm:$0xff]  }
 0x216   :  { %10069 = vmatmul.mubr.bf16.vlgmr.msra.gmra.mrb[32].mxu1 %v3058_v26  ;;  %v10676_v26 = vld [vmem:[%s11029_s17 + $0x698] sm:$0xff]  }
 0x217   :  { %3239 = vmatmul.mubr.bf16.vlgmr.msra.gmra.mrb[40].mxu0 %v3050_v22  ;;  %10073 = vmatpush3.bf16.msra.mxu1 %v10643_v25  ;;  %v10672_v22 = vld [vmem:[%s11029_s17 + $0x650] sm:$0xff]   ;;  %v10675_v25 = vld [vmem:[%s11029_s17 + $0x658] sm:$0xff]  }
 0x218   :  { %9502 = vmatpush3.bf16.msra.mxu0 %v10644_v8  ;;  %3488 = vmatprep.mubr.bf16.mxu0 %v3307_v31  ;;  %v10677_v8 = vld [vmem:[%s11029_s17 + $0x618] sm:$0xff]   ;;  %v10679_v31 = vld [vmem:[%s11029_s17 + $0x6a0] sm:$0xff]  }
 0x219   :  { %10074 = vmatprep.subr.bf16.mxu1 %v11001_v32  ;;  %9503 = vmatprep.subr.bf16.mxu0 %v10645_v30  ;;  %v10678_v30 = vld [vmem:[%s11029_s17 + $0x660] sm:$0xff]  }
 0x21a   :  { %10088 = vmatprep.mubr.msk.bf16.mxu1 %vm11002_vm1, %v11001_v32 }
 0x21b   :  { %10075 = vmatpush3.bf16.msra.mxu1 %v10646_v33  ;;  %v10680_v33 = vld [vmem:[%s11029_s17 + $0x620] sm:$0xff]  }
 0x21c   :  { %9504 = vmatpush3.bf16.msra.mxu0 %v10647_v34  ;;  %10076 = vmatprep.subr.bf16.mxu1 %v11001_v32  ;;  %v10681_v34 = vld [vmem:[%s11029_s17 + $0x668] sm:$0xff]  }
 0x21d   :  { %9505 = vmatprep.subr.bf16.mxu0 %v10648_v28  ;;  %v10682_v28 = vld [vmem:[%s11029_s17 + $0x6a8] sm:$0xff]  }
 0x21f   :  { %10077 = vmatpush3.bf16.msra.mxu1 %v10649_v35  ;;  %v10683_v35 = vld [vmem:[%s11029_s17 + $0x628] sm:$0xff]  }
 0x220   :  { %9506 = vmatpush3.bf16.msra.mxu0 %v10650_v39  ;;  %10078 = vmatprep.subr.bf16.mxu1 %v11001_v32 }
 0x221   :  { %9507 = vmatprep.subr.bf16.mxu0 %v10651_v40  ;;  %v10684_v40 = vld [vmem:[%s11029_s17 + $0x670] sm:$0xff]  }
 0x223   :  { %10079 = vmatpush3.bf16.msra.mxu1 %v10652_v43 }
 0x224   :  { %9508 = vmatpush3.bf16.msra.mxu0 %v10653_v46  ;;  %10080 = vmatprep.subr.bf16.mxu1 %v11001_v32 }
 0x225   :  { %9509 = vmatprep.subr.bf16.mxu0 %v10654_v47  ;;  %v11745_v47 = vrot.slane %v733_v36, %v11238_v37  ;;  %v10688_v36 = vld [vmem:[%s11029_s17 + $0x6b8] sm:$0xff]  }
 0x227   :  { %10081 = vmatpush3.bf16.msra.mxu1 %v10655_v48  ;;  %v11753_v29 = vrot.slane %v11745_v47, %v11238_v37 }
 0x228   :  { %9510 = vmatpush3.bf16.msra.mxu0 %v10656_v15  ;;  %10082 = vmatprep.subr.bf16.mxu1 %v11001_v32 }
 0x229   :  { %v1780_v52 = vpop.f32.mrb[8].mxu1  ;;  %9511 = vmatprep.subr.bf16.mxu0 %v10657_v49  ;;  %v10685_v49 = vld [vmem:[%s11029_s17 + $0x6b0] sm:$0xff]  }
 0x22a   :  { %v9300_v20 = vpop.f32.mrb[16].mxu0  ;;  %v9950_v54 = vpop.f32.mrb[9].mxu1 }
 0x22b   :  { %10083 = vmatpush3.bf16.msra.mxu1 %v10658_v50  ;;  %v9301_v56 = vpop.f32.mrb[17].mxu0  ;;  %v1783_v57 = vpop.f32.mrb[10].mxu1  ;;  %v10687_v54 = vld [vmem:[%s11029_s17 + $0x678] sm:$0xff]  }
 0x22c   :  { %v9302_v59 = vadd.f32 %v9301_v56, %v9300_v20  ;;  %9512 = vmatpush3.bf16.msra.mxu0 %v10659_v51  ;;  %v9303_v61 = vpop.f32.mrb[18].mxu0  ;;  %v9951_v63 = vpop.f32.mrb[11].mxu1  ;;  %10084 = vmatprep.subr.bf16.mxu1 %v11001_v32 }
 0x22d   :  { %v9304_v1 = vpop.f32.mrb[19].mxu0  ;;  %9513 = vmatprep.subr.bf16.mxu0 %v10660_v53  ;;  %v10686_v53 = vld [vmem:[%s11029_s17 + $0x630] sm:$0xff]   ;;  %v10690_v63 = vld [vmem:[%s11029_s17 + $0x700] sm:$0xff]  }
 0x22e   :  { %v11700_v38 = vadd.f32 %v9302_v59, %v1780_v52  ;;  %v3550_v59 = vrot.slane %v11704_v7, %v11238_v37  ;;  %v10691_v1 = vld [vmem:[%s11029_s17 + $0x740] sm:$0xff]   ;;  %v10693_v7 = vld [vmem:[%s11029_s17 + $0x708] sm:$0xff]  }
 0x22f   :  { %10085 = vmatpush3.bf16.msra.mxu1 %v10661_v58  ;;  %v10689_v58 = vld [vmem:[%s11029_s17 + $0x638] sm:$0xff]  }
 0x230   :  { %9514 = vmatpush3.bf16.msra.mxu0 %v10662_v0  ;;  %10086 = vmatprep.subr.bf16.mxu1 %v11001_v32  ;;  %v5538_v56 = vsel %vm136_vm2, %v11700_v38, 0.0  ;;  %v3793_v0 = vcombine.high %v11753_v29, %v11753_v29  ;;  %v10692_v38 = vld [vmem:[%s11029_s17 + $0x6c0] sm:$0xff]  }
 0x231   :  { %9515 = vmatprep.subr.bf16.mxu0 %v10663_v62  ;;  %v3558_v62 = vcombine.high %v3550_v59, %v3550_v59 }
 0x233   :  { %10087 = vmatpush3.bf16.msra.mxu1 %v10664_v14  ;;  %v3807_v14 = vrot.slane %v3793_v0, %v11238_v37  ;;  %v10722_v0 = vld [vmem:[%s11029_s17 + $0x790] sm:$0xff]  }
 0x234   :  { %9516 = vmatpush3.bf16.msra.mxu0 %v10665_v3  ;;  %10092 = vmatprep.subr.bf16.mxu1 %v11001_v32  ;;  %v10694_v3 = vld [vmem:[%s11029_s17 + $0x748] sm:$0xff]  }
 0x235   :  { %9532 = vmatprep.subr.bf16.mxu0 %v10666_v6  ;;  %v10696_v6 = vld [vmem:[%s11029_s17 + $0x710] sm:$0xff]  }
 0x236   :  { %10089 = vmatmul.mubr.bf16.vlgmr.msra.gmra.mrb[36].mxu1 %v3308_v12  ;;  %v10699_v12 = vld [vmem:[%s11029_s17 + $0x718] sm:$0xff]  }
 0x237   :  { %3489 = vmatmul.mubr.bf16.vlgmr.msra.gmra.mrb[44].mxu0 %v3300_v4  ;;  %10093 = vmatpush3.bf16.msra.mxu1 %v10667_v10  ;;  %v10695_v4 = vld [vmem:[%s11029_s17 + $0x6c8] sm:$0xff]   ;;  %v10698_v10 = vld [vmem:[%s11029_s17 + $0x6d0] sm:$0xff]  }
 0x238   :  { %9533 = vmatpush3.bf16.msra.mxu0 %v10668_v16  ;;  %3738 = vmatprep.mubr.bf16.mxu0 %v3557_v18  ;;  %v10700_v16 = vld [vmem:[%s11029_s17 + $0x758] sm:$0xff]   ;;  %v10702_v18 = vld [vmem:[%s11029_s17 + $0x720] sm:$0xff]  }
 0x239   :  { %10094 = vmatprep.subr.bf16.mxu1 %v11001_v32  ;;  %9534 = vmatprep.subr.bf16.mxu0 %v10669_v11  ;;  %v10701_v11 = vld [vmem:[%s11029_s17 + $0x6d8] sm:$0xff]  }
 0x23a   :  { %10108 = vmatprep.mubr.msk.bf16.mxu1 %vm11002_vm1, %v11001_v32 }
 0x23b   :  { %10095 = vmatpush3.bf16.msra.mxu1 %v10670_v19  ;;  %v10703_v19 = vld [vmem:[%s11029_s17 + $0x760] sm:$0xff]  }
 0x23c   :  { %9535 = vmatpush3.bf16.msra.mxu0 %v10671_v60  ;;  %10096 = vmatprep.subr.bf16.mxu1 %v11001_v32  ;;  %v10704_v60 = vld [vmem:[%s11029_s17 + $0x6e0] sm:$0xff]  }
 0x23d   :  { %9536 = vmatprep.subr.bf16.mxu0 %v10672_v22  ;;  %v10705_v22 = vld [vmem:[%s11029_s17 + $0x728] sm:$0xff]  }
 0x23f   :  { %10097 = vmatpush3.bf16.msra.mxu1 %v10673_v23  ;;  %v10706_v23 = vld [vmem:[%s11029_s17 + $0x768] sm:$0xff]  }
 0x240   :  { %9537 = vmatpush3.bf16.msra.mxu0 %v10674_v24  ;;  %10098 = vmatprep.subr.bf16.mxu1 %v11001_v32  ;;  %v10707_v24 = vld [vmem:[%s11029_s17 + $0x6e8] sm:$0xff]  }
 0x241   :  { %9538 = vmatprep.subr.bf16.mxu0 %v10675_v25 }
 0x243   :  { %10099 = vmatpush3.bf16.msra.mxu1 %v10676_v26  ;;  %v10708_v26 = vld [vmem:[%s11029_s17 + $0x730] sm:$0xff]  }
 0x244   :  { %9539 = vmatpush3.bf16.msra.mxu0 %v10677_v8  ;;  %10100 = vmatprep.subr.bf16.mxu1 %v11001_v32 }
 0x245   :  { %9540 = vmatprep.subr.bf16.mxu0 %v10678_v30 }
 0x247   :  { %10101 = vmatpush3.bf16.msra.mxu1 %v10679_v31  ;;  %v764_v31 = vcombine.high %v11694_v55, %v11694_v55 }
 0x248   :  { %9541 = vmatpush3.bf16.msra.mxu0 %v10680_v33  ;;  %10102 = vmatprep.subr.bf16.mxu1 %v11001_v32 }
 0x249   :  { %v2030_v39 = vpop.f32.mrb[12].mxu1  ;;  %9542 = vmatprep.subr.bf16.mxu0 %v10681_v34  ;;  %v11802_v55 = vrot.slane %v764_v31, %v11238_v37 }
 0x24a   :  { %v9331_v43 = vpop.f32.mrb[20].mxu0  ;;  %v9970_v46 = vpop.f32.mrb[13].mxu1 }
 0x24b   :  { %v9332_v48 = vpop.f32.mrb[21].mxu0  ;;  %v2033_v15 = vpop.f32.mrb[14].mxu1  ;;  %10103 = vmatpush3.bf16.msra.mxu1 %v10682_v28  ;;  %v10709_v28 = vld [vmem:[%s11029_s17 + $0x770] sm:$0xff]  }
 0x24c   :  { %v9333_v50 = vadd.f32 %v9332_v48, %v9331_v43  ;;  %v9334_v51 = vpop.f32.mrb[22].mxu0  ;;  %v9971_v52 = vpop.f32.mrb[15].mxu1  ;;  %9543 = vmatpush3.bf16.msra.mxu0 %v10683_v35  ;;  %10104 = vmatprep.subr.bf16.mxu1 %v11001_v32  ;;  %v10710_v43 = vld [vmem:[%s11029_s17 + $0x6f0] sm:$0xff]   ;;  %v10711_v48 = vld [vmem:[%s11029_s17 + $0x738] sm:$0xff]  }
 0x24d   :  { %v9335_v20 = vpop.f32.mrb[23].mxu0  ;;  %9544 = vmatprep.subr.bf16.mxu0 %v10684_v40  ;;  %v10713_v51 = vld [vmem:[%s11029_s17 + $0x6f8] sm:$0xff]   ;;  %v3800_v52 = vrot.slane %v11753_v29, %v11238_v37  ;;  %v10717_v29 = vld [vmem:[%s11029_s17 + $0x7c8] sm:$0xff]  }
 0x24e   :  { %v2031_v27 = vadd.f32 %v9333_v50, %v2030_v39  ;;  %v10714_v20 = vld [vmem:[%s11029_s17 + $0x7c0] sm:$0xff]  }
 0x24f   :  { %10105 = vmatpush3.bf16.msra.mxu1 %v10685_v49  ;;  %v10712_v49 = vld [vmem:[%s11029_s17 + $0x778] sm:$0xff]  }
 0x250   :  { %v5539_v57 = vsel %vm136_vm2, %v2031_v27, 0.0  ;;  %9545 = vmatpush3.bf16.msra.mxu0 %v10686_v53  ;;  %10106 = vmatprep.subr.bf16.mxu1 %v11001_v32  ;;  %v10715_v27 = vld [vmem:[%s11029_s17 + $0x800] sm:$0xff]  }
 0x251   :  { %v11763_v61 = vadd.f32 %v5539_v57, %v5538_v56  ;;  %9546 = vmatprep.subr.bf16.mxu0 %v10687_v54  ;;  %v4043_v54 = vcombine.high %v11802_v55, %v11802_v55  ;;  %v10716_v56 = vld [vmem:[%s11029_s17 + $0x780] sm:$0xff]  }
 0x253   :  { %10107 = vmatpush3.bf16.msra.mxu1 %v10688_v36  ;;  %v3808_v36 = vcombine.high %v3800_v52, %v3800_v52  ;;  %v4057_v57 = vrot.slane %v4043_v54, %v11238_v37  ;;  %v10747_v54 = vld [vmem:[%s11029_s17 + $0x898] sm:$0xff]  }
 0x254   :  { %9547 = vmatpush3.bf16.msra.mxu0 %v10689_v58  ;;  %10112 = vmatprep.subr.bf16.mxu1 %v11001_v32  ;;  %v10718_v58 = vld [vmem:[%s11029_s17 + $0x808] sm:$0xff]  }
 0x255   :  { %9563 = vmatprep.subr.bf16.mxu0 %v10690_v63  ;;  %v10721_v63 = vld [vmem:[%s11029_s17 + $0x810] sm:$0xff]  }
 0x256   :  { %10109 = vmatmul.mubr.bf16.vlgmr.msra.gmra.mrb[40].mxu1 %v3558_v62  ;;  %v10724_v62 = vld [vmem:[%s11029_s17 + $0x818] sm:$0xff]  }
 0x257   :  { %3739 = vmatmul.mubr.bf16.vlgmr.msra.gmra.mrb[48].mxu0 %v3550_v59  ;;  %10113 = vmatpush3.bf16.msra.mxu1 %v10691_v1  ;;  %v10719_v59 = vld [vmem:[%s11029_s17 + $0x788] sm:$0xff]   ;;  %v10723_v1 = vld [vmem:[%s11029_s17 + $0x7d8] sm:$0xff]  }
 0x258   :  { %9564 = vmatpush3.bf16.msra.mxu0 %v10692_v38  ;;  %3988 = vmatprep.mubr.bf16.mxu0 %v3807_v14  ;;  %v10725_v38 = vld [vmem:[%s11029_s17 + $0x798] sm:$0xff]   ;;  %v10727_v14 = vld [vmem:[%s11029_s17 + $0x820] sm:$0xff]  }
 0x259   :  { %10114 = vmatprep.subr.bf16.mxu1 %v11001_v32  ;;  %9565 = vmatprep.subr.bf16.mxu0 %v10693_v7  ;;  %v10726_v7 = vld [vmem:[%s11029_s17 + $0x7e0] sm:$0xff]  }
 0x25a   :  { %10128 = vmatprep.mubr.msk.bf16.mxu1 %vm11002_vm1, %v11001_v32 }
 0x25b   :  { %10115 = vmatpush3.bf16.msra.mxu1 %v10694_v3  ;;  %v10728_v3 = vld [vmem:[%s11029_s17 + $0x7a0] sm:$0xff]  }
 0x25c   :  { %9566 = vmatpush3.bf16.msra.mxu0 %v10695_v4  ;;  %10116 = vmatprep.subr.bf16.mxu1 %v11001_v32  ;;  %v10729_v4 = vld [vmem:[%s11029_s17 + $0x7e8] sm:$0xff]  }
 0x25d   :  { %9567 = vmatprep.subr.bf16.mxu0 %v10696_v6  ;;  %v10730_v6 = vld [vmem:[%s11029_s17 + $0x828] sm:$0xff]  }
 0x25f   :  { %10117 = vmatpush3.bf16.msra.mxu1 %v10697_v9  ;;  %v10731_v9 = vld [vmem:[%s11029_s17 + $0x7a8] sm:$0xff]  }
 0x260   :  { %9568 = vmatpush3.bf16.msra.mxu0 %v10698_v10  ;;  %10118 = vmatprep.subr.bf16.mxu1 %v11001_v32 }
 0x261   :  { %9569 = vmatprep.subr.bf16.mxu0 %v10699_v12  ;;  %v10732_v12 = vld [vmem:[%s11029_s17 + $0x7f0] sm:$0xff]  }
 0x263   :  { %10119 = vmatpush3.bf16.msra.mxu1 %v10700_v16 }
 0x264   :  { %9570 = vmatpush3.bf16.msra.mxu0 %v10701_v11  ;;  %10120 = vmatprep.subr.bf16.mxu1 %v11001_v32 }
 0x265   :  { %9571 = vmatprep.subr.bf16.mxu0 %v10702_v18  ;;  %v766_v18 = vcombine.high %v11745_v47, %v11745_v47 }
 0x267   :  { %10121 = vmatpush3.bf16.msra.mxu1 %v10703_v19  ;;  %v11850_v47 = vrot.slane %v766_v18, %v11238_v37  ;;  %v10760_v18 = vld [vmem:[%s11029_s17 + $0x8f8] sm:$0xff]  }
 0x268   :  { %9572 = vmatpush3.bf16.msra.mxu0 %v10704_v60  ;;  %10122 = vmatprep.subr.bf16.mxu1 %v11001_v32 }
 0x269   :  { %v2280_v25 = vpop.f32.mrb[16].mxu1  ;;  %9573 = vmatprep.subr.bf16.mxu0 %v10705_v22  ;;  %v10733_v22 = vld [vmem:[%s11029_s17 + $0x830] sm:$0xff]  }
 0x26a   :  { %v9362_v8 = vpop.f32.mrb[24].mxu0  ;;  %v9990_v30 = vpop.f32.mrb[17].mxu1 }
 0x26b   :  { %v9363_v33 = vpop.f32.mrb[25].mxu0  ;;  %v2283_v34 = vpop.f32.mrb[18].mxu1  ;;  %10123 = vmatpush3.bf16.msra.mxu1 %v10706_v23  ;;  %v10735_v30 = vld [vmem:[%s11029_s17 + $0x7f8] sm:$0xff]  }
 0x26c   :  { %v9364_v35 = vadd.f32 %v9363_v33, %v9362_v8  ;;  %v9365_v39 = vpop.f32.mrb[26].mxu0  ;;  %v9991_v40 = vpop.f32.mrb[19].mxu1  ;;  %9574 = vmatpush3.bf16.msra.mxu0 %v10707_v24  ;;  %10124 = vmatprep.subr.bf16.mxu1 %v11001_v32  ;;  %v10736_v33 = vld [vmem:[%s11029_s17 + $0x838] sm:$0xff]  }
 0x26d   :  { %v9366_v46 = vpop.f32.mrb[27].mxu0  ;;  %9575 = vmatprep.subr.bf16.mxu0 %v10708_v26  ;;  %v10734_v26 = vld [vmem:[%s11029_s17 + $0x7b0] sm:$0xff]   ;;  %v10738_v40 = vld [vmem:[%s11029_s17 + $0x880] sm:$0xff]  }
 0x26e   :  { %v2281_v15 = vadd.f32 %v9364_v35, %v2280_v25  ;;  %v4050_v35 = vrot.slane %v11802_v55, %v11238_v37  ;;  %v10739_v46 = vld [vmem:[%s11029_s17 + $0x8c0] sm:$0xff]   ;;  %v10741_v55 = vld [vmem:[%s11029_s17 + $0x888] sm:$0xff]  }
 0x26f   :  { %10125 = vmatpush3.bf16.msra.mxu1 %v10709_v28  ;;  %v10737_v28 = vld [vmem:[%s11029_s17 + $0x7b8] sm:$0xff]  }
 0x270   :  { %v5541_v50 = vsel %vm136_vm2, %v2281_v15, 0.0  ;;  %9576 = vmatpush3.bf16.msra.mxu0 %v10710_v43  ;;  %10126 = vmatprep.subr.bf16.mxu1 %v11001_v32  ;;  %v4293_v43 = vcombine.high %v11850_v47, %v11850_v47  ;;  %v10740_v15 = vld [vmem:[%s11029_s17 + $0x840] sm:$0xff]  }
 0x271   :  { %v11811_v53 = vadd.f32 %v5541_v50, %v11763_v61  ;;  %9577 = vmatprep.subr.bf16.mxu0 %v10711_v48  ;;  %v10720_v61 = vld [vmem:[%s11029_s17 + $0x7d0] sm:$0xff]   ;;  %v4058_v48 = vcombine.high %v4050_v35, %v4050_v35  ;;  %v10742_v50 = vld [vmem:[%s11029_s17 + $0x8c8] sm:$0xff]  }
 0x273   :  { %10127 = vmatpush3.bf16.msra.mxu1 %v10712_v49  ;;  %v4307_v49 = vrot.slane %v4293_v43, %v11238_v37  ;;  %v10772_v43 = vld [vmem:[%s11029_s17 + $0x998] sm:$0xff]  }
 0x274   :  { %9578 = vmatpush3.bf16.msra.mxu0 %v10713_v51  ;;  %10132 = vmatprep.subr.bf16.mxu1 %v11001_v32  ;;  %v10743_v51 = vld [vmem:[%s11029_s17 + $0x848] sm:$0xff]  }
 0x275   :  { %9594 = vmatprep.subr.bf16.mxu0 %v10714_v20  ;;  %v10746_v20 = vld [vmem:[%s11029_s17 + $0x850] sm:$0xff]  }
 0x276   :  { %10129 = vmatmul.mubr.bf16.vlgmr.msra.gmra.mrb[44].mxu1 %v3808_v36  ;;  %v10749_v36 = vld [vmem:[%s11029_s17 + $0x858] sm:$0xff]  }
 0x277   :  { %3989 = vmatmul.mubr.bf16.vlgmr.msra.gmra.mrb[52].mxu0 %v3800_v52  ;;  %10133 = vmatpush3.bf16.msra.mxu1 %v10715_v27  ;;  %v10744_v52 = vld [vmem:[%s11029_s17 + $0x890] sm:$0xff]   ;;  %v10748_v27 = vld [vmem:[%s11029_s17 + $0x8d8] sm:$0xff]  }
 0x278   :  { %9595 = vmatpush3.bf16.msra.mxu0 %v10716_v56  ;;  %4238 = vmatprep.mubr.bf16.mxu0 %v4057_v57  ;;  %v10750_v56 = vld [vmem:[%s11029_s17 + $0x8a0] sm:$0xff]  }
 0x279   :  { %10134 = vmatprep.subr.bf16.mxu1 %v11001_v32  ;;  %9596 = vmatprep.subr.bf16.mxu0 %v10717_v29  ;;  %v10751_v29 = vld [vmem:[%s11029_s17 + $0x8e0] sm:$0xff]  }
 0x27a   :  { %10148 = vmatprep.mubr.msk.bf16.mxu1 %vm11002_vm1, %v11001_v32  ;;  %v10752_v57 = vld [vmem:[%s11029_s17 + $0x860] sm:$0xff]  }
 0x27b   :  { %10135 = vmatpush3.bf16.msra.mxu1 %v10718_v58  ;;  %v10753_v58 = vld [vmem:[%s11029_s17 + $0x8a8] sm:$0xff]  }
 0x27c   :  { %9597 = vmatpush3.bf16.msra.mxu0 %v10719_v59  ;;  %10136 = vmatprep.subr.bf16.mxu1 %v11001_v32  ;;  %v10754_v59 = vld [vmem:[%s11029_s17 + $0x8e8] sm:$0xff]  }
 0x27d   :  { %9598 = vmatprep.subr.bf16.mxu0 %v10720_v61  ;;  %v10755_v61 = vld [vmem:[%s11029_s17 + $0x868] sm:$0xff]  }
 0x27f   :  { %10137 = vmatpush3.bf16.msra.mxu1 %v10721_v63 }
 0x280   :  { %9599 = vmatpush3.bf16.msra.mxu0 %v10722_v0  ;;  %10138 = vmatprep.subr.bf16.mxu1 %v11001_v32  ;;  %v10756_v0 = vld [vmem:[%s11029_s17 + $0x8b0] sm:$0xff]  }
 0x281   :  { %9600 = vmatprep.subr.bf16.mxu0 %v10723_v1 }
 0x283   :  { %10139 = vmatpush3.bf16.msra.mxu1 %v10724_v62 }
 0x284   :  { %9601 = vmatpush3.bf16.msra.mxu0 %v10725_v38  ;;  %10140 = vmatprep.subr.bf16.mxu1 %v11001_v32  ;;  %v11895_v38 = vrot.slane %v734_v44, %v11238_v37 }
 0x285   :  { %9602 = vmatprep.subr.bf16.mxu0 %v10726_v7 }
 0x287   :  { %10141 = vmatpush3.bf16.msra.mxu1 %v10727_v14 }
 0x288   :  { %9603 = vmatpush3.bf16.msra.mxu0 %v10728_v3  ;;  %10142 = vmatprep.subr.bf16.mxu1 %v11001_v32  ;;  %v10757_v3 = vld [vmem:[%s11029_s17 + $0x8f0] sm:$0xff]  }
 0x289   :  { %v2530_v10 = vpop.f32.mrb[20].mxu1  ;;  %9604 = vmatprep.subr.bf16.mxu0 %v10729_v4 }
 0x28a   :  { %v9393_v16 = vpop.f32.mrb[28].mxu0  ;;  %v10010_v11 = vpop.f32.mrb[21].mxu1 }
 0x28b   :  { %v9394_v19 = vpop.f32.mrb[29].mxu0  ;;  %v2533_v60 = vpop.f32.mrb[22].mxu1  ;;  %10143 = vmatpush3.bf16.msra.mxu1 %v10730_v6  ;;  %v11903_v11 = vrot.slane %v11895_v38, %v11238_v37 }
 0x28c   :  { %v9395_v23 = vadd.f32 %v9394_v19, %v9393_v16  ;;  %v9396_v24 = vpop.f32.mrb[30].mxu0  ;;  %v10011_v25 = vpop.f32.mrb[23].mxu1  ;;  %9605 = vmatpush3.bf16.msra.mxu0 %v10731_v9  ;;  %10144 = vmatprep.subr.bf16.mxu1 %v11001_v32  ;;  %v10759_v16 = vld [vmem:[%s11029_s17 + $0x8b8] sm:$0xff]  }
 0x28d   :  { %v9397_v8 = vpop.f32.mrb[31].mxu0  ;;  %9606 = vmatprep.subr.bf16.mxu0 %v10732_v12  ;;  %v10761_v60 = vld [vmem:[%s11029_s17 + $0x878] sm:$0xff]   ;;  %v10762_v24 = vld [vmem:[%s11029_s17 + $0x940] sm:$0xff]   ;;  %v4543_v25 = vcombine.high %v11903_v11, %v11903_v11 }
 0x28e   :  { %v2531_v31 = vadd.f32 %v9395_v23, %v2530_v10  ;;  %v10758_v10 = vld [vmem:[%s11029_s17 + $0x870] sm:$0xff]  }
 0x28f   :  { %10145 = vmatpush3.bf16.msra.mxu1 %v10733_v22  ;;  %v4300_v22 = vrot.slane %v11850_v47, %v11238_v37  ;;  %v4557_v47 = vrot.slane %v4543_v25, %v11238_v37  ;;  %v10798_v25 = vld [vmem:[%s11029_s17 + $0xa20] sm:$0xff]  }
 0x290   :  { %v5543_v34 = vsel %vm136_vm2, %v2531_v31, 0.0  ;;  %9607 = vmatpush3.bf16.msra.mxu0 %v10734_v26  ;;  %10146 = vmatprep.subr.bf16.mxu1 %v11001_v32  ;;  %v10763_v26 = vld [vmem:[%s11029_s17 + $0x980] sm:$0xff]   ;;  %v10765_v31 = vld [vmem:[%s11029_s17 + $0x948] sm:$0xff]  }
 0x291   :  { %v11859_v39 = vadd.f32 %v5543_v34, %v11811_v53  ;;  %9608 = vmatprep.subr.bf16.mxu0 %v10735_v30  ;;  %v10745_v53 = vld [vmem:[%s11029_s17 + $0x8d0] sm:$0xff]   ;;  %v4308_v8 = vcombine.high %v4300_v22, %v4300_v22  ;;  %v10764_v30 = vld [vmem:[%s11029_s17 + $0x900] sm:$0xff]   ;;  %v10767_v34 = vld [vmem:[%s11029_s17 + $0x908] sm:$0xff]  }
 0x293   :  { %10147 = vmatpush3.bf16.msra.mxu1 %v10736_v33  ;;  %v10766_v33 = vld [vmem:[%s11029_s17 + $0x988] sm:$0xff]  }
 0x294   :  { %9609 = vmatpush3.bf16.msra.mxu0 %v10737_v28  ;;  %10152 = vmatprep.subr.bf16.mxu1 %v11001_v32  ;;  %v10768_v28 = vld [vmem:[%s11029_s17 + $0x950] sm:$0xff]  }
 0x295   :  { %9625 = vmatprep.subr.bf16.mxu0 %v10738_v40  ;;  %v10771_v40 = vld [vmem:[%s11029_s17 + $0x958] sm:$0xff]  }
 0x296   :  { %10149 = vmatmul.mubr.bf16.vlgmr.msra.gmra.mrb[48].mxu1 %v4058_v48  ;;  %v10774_v48 = vld [vmem:[%s11029_s17 + $0x960] sm:$0xff]  }
 0x297   :  { %4239 = vmatmul.mubr.bf16.vlgmr.msra.gmra.mrb[56].mxu0 %v4050_v35  ;;  %10153 = vmatpush3.bf16.msra.mxu1 %v10739_v46  ;;  %v10769_v35 = vld [vmem:[%s11029_s17 + $0x990] sm:$0xff]   ;;  %v10773_v46 = vld [vmem:[%s11029_s17 + $0x918] sm:$0xff]  }
 0x298   :  { %9626 = vmatpush3.bf16.msra.mxu0 %v10740_v15  ;;  %4488 = vmatprep.mubr.bf16.mxu0 %v4307_v49  ;;  %v10775_v15 = vld [vmem:[%s11029_s17 + $0x9a0] sm:$0xff]   ;;  %v10777_v49 = vld [vmem:[%s11029_s17 + $0x968] sm:$0xff]  }
 0x299   :  { %10154 = vmatprep.subr.bf16.mxu1 %v11001_v32  ;;  %9627 = vmatprep.subr.bf16.mxu0 %v10741_v55  ;;  %v10776_v55 = vld [vmem:[%s11029_s17 + $0x920] sm:$0xff]  }
 0x29a   :  { %10168 = vmatprep.mubr.msk.bf16.mxu1 %vm11002_vm1, %v11001_v32 }
 0x29b   :  { %10155 = vmatpush3.bf16.msra.mxu1 %v10742_v50  ;;  %v10778_v50 = vld [vmem:[%s11029_s17 + $0x9a8] sm:$0xff]  }
 0x29c   :  { %9628 = vmatpush3.bf16.msra.mxu0 %v10743_v51  ;;  %10156 = vmatprep.subr.bf16.mxu1 %v11001_v32  ;;  %v10779_v51 = vld [vmem:[%s11029_s17 + $0x928] sm:$0xff]  }
 0x29d   :  { %9629 = vmatprep.subr.bf16.mxu0 %v10744_v52 }
 0x29f   :  { %10157 = vmatpush3.bf16.msra.mxu1 %v10745_v53  ;;  %v10780_v53 = vld [vmem:[%s11029_s17 + $0x970] sm:$0xff]  }
 0x2a0   :  { %9630 = vmatpush3.bf16.msra.mxu0 %v10746_v20  ;;  %10158 = vmatprep.subr.bf16.mxu1 %v11001_v32 }
 0x2a1   :  { %9631 = vmatprep.subr.bf16.mxu0 %v10747_v54 }
 0x2a3   :  { %10159 = vmatpush3.bf16.msra.mxu1 %v10748_v27  ;;  %v11948_v27 = vrot.slane %v735_v45, %v11238_v37 }
 0x2a4   :  { %9632 = vmatpush3.bf16.msra.mxu0 %v10749_v36  ;;  %10160 = vmatprep.subr.bf16.mxu1 %v11001_v32 }
 0x2a5   :  { %9633 = vmatprep.subr.bf16.mxu0 %v10750_v56  ;;  %v11956_v45 = vrot.slane %v11948_v27, %v11238_v37 }
 0x2a7   :  { %10161 = vmatpush3.bf16.msra.mxu1 %v10751_v29  ;;  %v10781_v29 = vld [vmem:[%s11029_s17 + $0x9b0] sm:$0xff]  }
 0x2a8   :  { %9634 = vmatpush3.bf16.msra.mxu0 %v10752_v57  ;;  %10162 = vmatprep.subr.bf16.mxu1 %v11001_v32 }
 0x2a9   :  { %v2780_v63 = vpop.f32.mrb[24].mxu1  ;;  %9635 = vmatprep.subr.bf16.mxu0 %v10753_v58 }
 0x2aa   :  { %v9424_v1 = vpop.f32.mrb[32].mxu0  ;;  %v10030_v62 = vpop.f32.mrb[25].mxu1 }
 0x2ab   :  { %v9425_v7 = vpop.f32.mrb[33].mxu0  ;;  %v2783_v14 = vpop.f32.mrb[26].mxu1  ;;  %10163 = vmatpush3.bf16.msra.mxu1 %v10754_v59  ;;  %v10785_v62 = vld [vmem:[%s11029_s17 + $0x938] sm:$0xff]  }
 0x2ac   :  { %v9426_v4 = vadd.f32 %v9425_v7, %v9424_v1  ;;  %v9427_v6 = vpop.f32.mrb[34].mxu0  ;;  %v10031_v9 = vpop.f32.mrb[27].mxu1  ;;  %9636 = vmatpush3.bf16.msra.mxu0 %v10755_v61  ;;  %10164 = vmatprep.subr.bf16.mxu1 %v11001_v32  ;;  %v10782_v61 = vld [vmem:[%s11029_s17 + $0x930] sm:$0xff]   ;;  %v4550_v7 = vrot.slane %v11903_v11, %v11238_v37  ;;  %v10791_v11 = vld [vmem:[%s11029_s17 + $0x9c8] sm:$0xff]  }
 0x2ad   :  { %v9428_v12 = vpop.f32.mrb[35].mxu0  ;;  %9637 = vmatprep.subr.bf16.mxu0 %v10756_v0  ;;  %v10784_v0 = vld [vmem:[%s11029_s17 + $0x9b8] sm:$0xff]   ;;  %v10787_v6 = vld [vmem:[%s11029_s17 + $0xa40] sm:$0xff]  }
 0x2ae   :  { %v2781_v44 = vadd.f32 %v9426_v4, %v2780_v63  ;;  %v4793_v4 = vcombine.high %v11956_v45, %v11956_v45  ;;  %v4558_v9 = vcombine.high %v4550_v7, %v4550_v7  ;;  %v10789_v12 = vld [vmem:[%s11029_s17 + $0xa08] sm:$0xff]  }
 0x2af   :  { %10165 = vmatpush3.bf16.msra.mxu1 %v10757_v3  ;;  %v10786_v3 = vld [vmem:[%s11029_s17 + $0xa00] sm:$0xff]  }
 0x2b0   :  { %v5545_v19 = vsel %vm136_vm2, %v2781_v44, 0.0  ;;  %9638 = vmatpush3.bf16.msra.mxu0 %v10758_v10  ;;  %10166 = vmatprep.subr.bf16.mxu1 %v11001_v32  ;;  %v10788_v10 = vld [vmem:[%s11029_s17 + $0x9c0] sm:$0xff]   ;;  %v10790_v44 = vld [vmem:[%s11029_s17 + $0xa48] sm:$0xff]  }
 0x2b1   :  { %v11912_v23 = vadd.f32 %v5545_v19, %v11859_v39  ;;  %9639 = vmatprep.subr.bf16.mxu0 %v10759_v16  ;;  %v10770_v39 = vld [vmem:[%s11029_s17 + $0x910] sm:$0xff]   ;;  %v4807_v16 = vrot.slane %v4793_v4, %v11238_v37  ;;  %v10822_v4 = vld [vmem:[%s11029_s17 + $0xae0] sm:$0xff]  }
 0x2b2   :  { %v10793_v19 = vld [vmem:[%s11029_s17 + $0xa50] sm:$0xff]  }
 0x2b3   :  { %10167 = vmatpush3.bf16.msra.mxu1 %v10760_v18  ;;  %v10792_v18 = vld [vmem:[%s11029_s17 + $0xa10] sm:$0xff]  }
 0x2b4   :  { %9640 = vmatpush3.bf16.msra.mxu0 %v10761_v60  ;;  %10172 = vmatprep.subr.bf16.mxu1 %v11001_v32  ;;  %v10794_v60 = vld [vmem:[%s11029_s17 + $0x9d0] sm:$0xff]  }
 0x2b5   :  { %9656 = vmatprep.subr.bf16.mxu0 %v10762_v24  ;;  %v10797_v24 = vld [vmem:[%s11029_s17 + $0x9d8] sm:$0xff]  }
 0x2b6   :  { %10169 = vmatmul.mubr.bf16.vlgmr.msra.gmra.mrb[52].mxu1 %v4308_v8  ;;  %v10800_v8 = vld [vmem:[%s11029_s17 + $0x9e0] sm:$0xff]  }
 0x2b7   :  { %4489 = vmatmul.mubr.bf16.vlgmr.msra.gmra.mrb[60].mxu0 %v4300_v22  ;;  %10173 = vmatpush3.bf16.msra.mxu1 %v10763_v26  ;;  %v10795_v22 = vld [vmem:[%s11029_s17 + $0xa18] sm:$0xff]   ;;  %v10799_v26 = vld [vmem:[%s11029_s17 + $0xa60] sm:$0xff]  }
 0x2b8   :  { %9657 = vmatpush3.bf16.msra.mxu0 %v10764_v30  ;;  %4738 = vmatprep.mubr.bf16.mxu0 %v4557_v47  ;;  %v10801_v30 = vld [vmem:[%s11029_s17 + $0xa28] sm:$0xff]  }
 0x2b9   :  { %10174 = vmatprep.subr.bf16.mxu1 %v11001_v32  ;;  %9658 = vmatprep.subr.bf16.mxu0 %v10765_v31  ;;  %v10802_v31 = vld [vmem:[%s11029_s17 + $0xa68] sm:$0xff]  }
 0x2ba   :  { %10188 = vmatprep.mubr.msk.bf16.mxu1 %vm11002_vm1, %v11001_v32  ;;  %v10803_v47 = vld [vmem:[%s11029_s17 + $0x9e8] sm:$0xff]  }
 0x2bb   :  { %10175 = vmatpush3.bf16.msra.mxu1 %v10766_v33 }
 0x2bc   :  { %9659 = vmatpush3.bf16.msra.mxu0 %v10767_v34  ;;  %10176 = vmatprep.subr.bf16.mxu1 %v11001_v32  ;;  %v10804_v34 = vld [vmem:[%s11029_s17 + $0xa30] sm:$0xff]  }
 0x2bd   :  { %9660 = vmatprep.subr.bf16.mxu0 %v10768_v28 }
 0x2bf   :  { %10177 = vmatpush3.bf16.msra.mxu1 %v10769_v35 }
 0x2c0   :  { %9661 = vmatpush3.bf16.msra.mxu0 %v10770_v39  ;;  %10178 = vmatprep.subr.bf16.mxu1 %v11001_v32  ;;  %v765_v39 = vcombine.high %v11895_v38, %v11895_v38 }
 0x2c1   :  { %9662 = vmatprep.subr.bf16.mxu0 %v10771_v40 }
 0x2c2   :  { %v12004_v38 = vrot.slane %v765_v39, %v11238_v37 }
 0x2c3   :  { %10179 = vmatpush3.bf16.msra.mxu1 %v10772_v43 }
 0x2c4   :  { %9663 = vmatpush3.bf16.msra.mxu0 %v10773_v46  ;;  %10180 = vmatprep.subr.bf16.mxu1 %v11001_v32  ;;  %v10805_v46 = vld [vmem:[%s11029_s17 + $0xa70] sm:$0xff]   ;;  %v5050_v39 = vrot.slane %v12004_v38, %v11238_v37 }
 0x2c5   :  { %9664 = vmatprep.subr.bf16.mxu0 %v10774_v48 }
 0x2c7   :  { %10181 = vmatpush3.bf16.msra.mxu1 %v10775_v15 }
 0x2c8   :  { %9665 = vmatpush3.bf16.msra.mxu0 %v10776_v55  ;;  %10182 = vmatprep.subr.bf16.mxu1 %v11001_v32 }
 0x2c9   :  { %v3030_v52 = vpop.f32.mrb[28].mxu1  ;;  %9666 = vmatprep.subr.bf16.mxu0 %v10777_v49  ;;  %v10806_v49 = vld [vmem:[%s11029_s17 + $0x9f0] sm:$0xff]  }
 0x2ca   :  { %v9455_v20 = vpop.f32.mrb[36].mxu0  ;;  %v10050_v54 = vpop.f32.mrb[29].mxu1 }
 0x2cb   :  { %v9456_v36 = vpop.f32.mrb[37].mxu0  ;;  %v3033_v56 = vpop.f32.mrb[30].mxu1  ;;  %10183 = vmatpush3.bf16.msra.mxu1 %v10778_v50  ;;  %v10809_v54 = vld [vmem:[%s11029_s17 + $0x9f8] sm:$0xff]  }
 0x2cc   :  { %v9457_v57 = vadd.f32 %v9456_v36, %v9455_v20  ;;  %v9458_v58 = vpop.f32.mrb[38].mxu0  ;;  %v10051_v59 = vpop.f32.mrb[31].mxu1  ;;  %9667 = vmatpush3.bf16.msra.mxu0 %v10779_v51  ;;  %10184 = vmatprep.subr.bf16.mxu1 %v11001_v32  ;;  %v10807_v51 = vld [vmem:[%s11029_s17 + $0xa38] sm:$0xff]   ;;  %v4800_v36 = vrot.slane %v11956_v45, %v11238_v37  ;;  %v10815_v45 = vld [vmem:[%s11029_s17 + $0xa88] sm:$0xff]  }
 0x2cd   :  { %v9459_v63 = vpop.f32.mrb[39].mxu0  ;;  %9668 = vmatprep.subr.bf16.mxu0 %v10780_v53  ;;  %v10808_v53 = vld [vmem:[%s11029_s17 + $0xa78] sm:$0xff]   ;;  %v10811_v58 = vld [vmem:[%s11029_s17 + $0xb00] sm:$0xff]  }
 0x2ce   :  { %v3031_v42 = vadd.f32 %v9457_v57, %v3030_v52  ;;  %v5043_v57 = vcombine.high %v12004_v38, %v12004_v38  ;;  %v4808_v59 = vcombine.high %v4800_v36, %v4800_v36  ;;  %v10813_v63 = vld [vmem:[%s11029_s17 + $0xac8] sm:$0xff]   ;;  %v10840_v38 = vld [vmem:[%s11029_s17 + $0xb90] sm:$0xff]  }
 0x2cf   :  { %10185 = vmatpush3.bf16.msra.mxu1 %v10781_v29  ;;  %v10810_v29 = vld [vmem:[%s11029_s17 + $0xac0] sm:$0xff]  }
 0x2d0   :  { %v5547_v1 = vsel %vm136_vm2, %v3031_v42, 0.0  ;;  %9669 = vmatpush3.bf16.msra.mxu0 %v10782_v61  ;;  %10186 = vmatprep.subr.bf16.mxu1 %v11001_v32  ;;  %v10812_v61 = vld [vmem:[%s11029_s17 + $0xa80] sm:$0xff]   ;;  %v10814_v42 = vld [vmem:[%s11029_s17 + $0xb08] sm:$0xff]  }
 0x2d1   :  { %v11965_v14 = vadd.f32 %v5547_v1, %v11912_v23  ;;  %9670 = vmatprep.subr.bf16.mxu0 %v10783_v41  ;;  %v10796_v23 = vld [vmem:[%s11029_s17 + $0xa58] sm:$0xff]   ;;  %v5057_v41 = vrot.slane %v5043_v57, %v11238_v37  ;;  %v10817_v1 = vld [vmem:[%s11029_s17 + $0xb10] sm:$0xff]   ;;  %v10847_v57 = vld [vmem:[%s11029_s17 + $0xbe0] sm:$0xff]  }
 0x2d3   :  { %10187 = vmatpush3.bf16.msra.mxu1 %v10784_v0  ;;  %v10816_v0 = vld [vmem:[%s11029_s17 + $0xad0] sm:$0xff]  }
 0x2d4   :  { %9671 = vmatpush3.bf16.msra.mxu0 %v10785_v62  ;;  %10192 = vmatprep.subr.bf16.mxu1 %v11001_v32  ;;  %v10818_v62 = vld [vmem:[%s11029_s17 + $0xa90] sm:$0xff]  }
 0x2d5   :  { %9687 = vmatprep.subr.bf16.mxu0 %v10786_v3  ;;  %v10821_v3 = vld [vmem:[%s11029_s17 + $0xa98] sm:$0xff]  }
 0x2d6   :  { %10189 = vmatmul.mubr.bf16.vlgmr.msra.gmra.mrb[56].mxu1 %v4558_v9  ;;  %v10824_v9 = vld [vmem:[%s11029_s17 + $0xaa0] sm:$0xff]  }
 0x2d7   :  { %4739 = vmatmul.mubr.bf16.vlgmr.msra.gmra.mrb[64].mxu0 %v4550_v7  ;;  %10193 = vmatpush3.bf16.msra.mxu1 %v10787_v6  ;;  %v10819_v7 = vld [vmem:[%s11029_s17 + $0xad8] sm:$0xff]   ;;  %v10823_v6 = vld [vmem:[%s11029_s17 + $0xb20] sm:$0xff]  }
 0x2d8   :  { %9688 = vmatpush3.bf16.msra.mxu0 %v10788_v10  ;;  %4988 = vmatprep.mubr.bf16.mxu0 %v4807_v16  ;;  %v10825_v10 = vld [vmem:[%s11029_s17 + $0xae8] sm:$0xff]  }
 0x2d9   :  { %10194 = vmatprep.subr.bf16.mxu1 %v11001_v32  ;;  %9689 = vmatprep.subr.bf16.mxu0 %v10789_v12  ;;  %v10826_v12 = vld [vmem:[%s11029_s17 + $0xb28] sm:$0xff]  }
 0x2da   :  { %10208 = vmatprep.mubr.msk.bf16.mxu1 %vm11002_vm1, %v11001_v32  ;;  %v10827_v16 = vld [vmem:[%s11029_s17 + $0xaa8] sm:$0xff]  }
 0x2db   :  { %10195 = vmatpush3.bf16.msra.mxu1 %v10790_v44 }
 0x2dc   :  { %9690 = vmatpush3.bf16.msra.mxu0 %v10791_v11  ;;  %10196 = vmatprep.subr.bf16.mxu1 %v11001_v32  ;;  %v10828_v11 = vld [vmem:[%s11029_s17 + $0xaf0] sm:$0xff]  }
 0x2dd   :  { %9691 = vmatprep.subr.bf16.mxu0 %v10792_v18 }
 0x2df   :  { %10197 = vmatpush3.bf16.msra.mxu1 %v10793_v19 }
 0x2e0   :  { %9692 = vmatpush3.bf16.msra.mxu0 %v10794_v60  ;;  %10198 = vmatprep.subr.bf16.mxu1 %v11001_v32  ;;  %v767_v60 = vcombine.high %v11948_v27, %v11948_v27 }
 0x2e1   :  { %9693 = vmatprep.subr.bf16.mxu0 %v10795_v22 }
 0x2e2   :  { %v12052_v27 = vrot.slane %v767_v60, %v11238_v37 }
 0x2e3   :  { %10199 = vmatpush3.bf16.msra.mxu1 %v10796_v23 }
 0x2e4   :  { %9694 = vmatpush3.bf16.msra.mxu0 %v10797_v24  ;;  %10200 = vmatprep.subr.bf16.mxu1 %v11001_v32  ;;  %v10829_v24 = vld [vmem:[%s11029_s17 + $0xb30] sm:$0xff]  }
 0x2e5   :  { %9695 = vmatprep.subr.bf16.mxu0 %v10798_v25 }
 0x2e7   :  { %10201 = vmatpush3.bf16.msra.mxu1 %v10799_v26 }
 0x2e8   :  { %9696 = vmatpush3.bf16.msra.mxu0 %v10800_v8  ;;  %10202 = vmatprep.subr.bf16.mxu1 %v11001_v32 }
 0x2e9   :  { %v3280_v33 = vpop.f32.mrb[32].mxu1  ;;  %9697 = vmatprep.subr.bf16.mxu0 %v10801_v30  ;;  %v10830_v30 = vld [vmem:[%s11029_s17 + $0xab0] sm:$0xff]  }
 0x2ea   :  { %v9486_v28 = vpop.f32.mrb[40].mxu0  ;;  %v10070_v35 = vpop.f32.mrb[33].mxu1 }
 0x2eb   :  { %v9487_v40 = vpop.f32.mrb[41].mxu0  ;;  %v3283_v43 = vpop.f32.mrb[34].mxu1  ;;  %10203 = vmatpush3.bf16.msra.mxu1 %v10802_v31  ;;  %v10833_v35 = vld [vmem:[%s11029_s17 + $0xab8] sm:$0xff]  }
 0x2ec   :  { %v9488_v48 = vadd.f32 %v9487_v40, %v9486_v28  ;;  %v9489_v15 = vpop.f32.mrb[42].mxu0  ;;  %v10071_v55 = vpop.f32.mrb[35].mxu1  ;;  %9698 = vmatpush3.bf16.msra.mxu0 %v10803_v47  ;;  %10204 = vmatprep.subr.bf16.mxu1 %v11001_v32  ;;  %v10831_v47 = vld [vmem:[%s11029_s17 + $0xaf8] sm:$0xff]   ;;  %v10834_v43 = vld [vmem:[%s11029_s17 + $0xb80] sm:$0xff]  }
 0x2ed   :  { %v9490_v50 = vpop.f32.mrb[43].mxu0  ;;  %9699 = vmatprep.subr.bf16.mxu0 %v10804_v34  ;;  %v10832_v34 = vld [vmem:[%s11029_s17 + $0xb38] sm:$0xff]   ;;  %v5058_v15 = vcombine.high %v5050_v39, %v5050_v39  ;;  %v10836_v55 = vld [vmem:[%s11029_s17 + $0xb40] sm:$0xff]  }
 0x2ee   :  { %v3281_v52 = vadd.f32 %v9488_v48, %v3280_v33  ;;  %v10835_v48 = vld [vmem:[%s11029_s17 + $0xbc0] sm:$0xff]  }
 0x2ef   :  { %10205 = vmatpush3.bf16.msra.mxu1 %v10805_v46  ;;  %v5293_v46 = vcombine.high %v12052_v27, %v12052_v27 }
 0x2f0   :  { %v5549_v20 = vsel %vm136_vm2, %v3281_v52, 0.0  ;;  %9700 = vmatpush3.bf16.msra.mxu0 %v10806_v49  ;;  %10206 = vmatprep.subr.bf16.mxu1 %v11001_v32  ;;  %v10837_v49 = vld [vmem:[%s11029_s17 + $0xb88] sm:$0xff]  }
 0x2f1   :  { %v12013_v56 = vadd.f32 %v5549_v20, %v11965_v14  ;;  %9701 = vmatprep.subr.bf16.mxu0 %v10807_v51  ;;  %v10820_v14 = vld [vmem:[%s11029_s17 + $0xb18] sm:$0xff]   ;;  %v5307_v50 = vrot.slane %v5293_v46, %v11238_v37  ;;  %v10838_v51 = vld [vmem:[%s11029_s17 + $0xbc8] sm:$0xff]   ;;  %v10842_v20 = vld [vmem:[%s11029_s17 + $0xb50] sm:$0xff]  }
 0x2f2   :  { %v10839_v52 = vld [vmem:[%s11029_s17 + $0xb48] sm:$0xff]  }
 0x2f3   :  { %10207 = vmatpush3.bf16.msra.mxu1 %v10808_v53  ;;  %v10841_v53 = vld [vmem:[%s11029_s17 + $0xbd0] sm:$0xff]  }
 0x2f4   :  { %9702 = vmatpush3.bf16.msra.mxu0 %v10809_v54  ;;  %10212 = vmatprep.subr.bf16.mxu1 %v11001_v32  ;;  %v10843_v54 = vld [vmem:[%s11029_s17 + $0xb98] sm:$0xff]  }
 0x2f5   :  { %9718 = vmatprep.subr.bf16.mxu0 %v10810_v29  ;;  %v10846_v29 = vld [vmem:[%s11029_s17 + $0xba0] sm:$0xff]  }
 0x2f6   :  { %10209 = vmatmul.mubr.bf16.vlgmr.msra.gmra.mrb[60].mxu1 %v4808_v59  ;;  %v10849_v59 = vld [vmem:[%s11029_s17 + $0xba8] sm:$0xff]  }
 0x2f7   :  { %4989 = vmatmul.mubr.bf16.vlgmr.msra.gmra.mrb[68].mxu0 %v4800_v36  ;;  %10213 = vmatpush3.bf16.msra.mxu1 %v10811_v58  ;;  %v10844_v36 = vld [vmem:[%s11029_s17 + $0xbd8] sm:$0xff]   ;;  %v10848_v58 = vld [vmem:[%s11029_s17 + $0xb60] sm:$0xff]  }
 0x2f8   :  { %9719 = vmatpush3.bf16.msra.mxu0 %v10812_v61  ;;  %5238 = vmatprep.mubr.bf16.mxu0 %v5057_v41  ;;  %v10850_v61 = vld [vmem:[%s11029_s17 + $0xbe8] sm:$0xff]  }
 0x2f9   :  { %10214 = vmatprep.subr.bf16.mxu1 %v11001_v32  ;;  %9720 = vmatprep.subr.bf16.mxu0 %v10813_v63  ;;  %v10851_v63 = vld [vmem:[%s11029_s17 + $0xb68] sm:$0xff]  }
 0x2fa   :  { %10228 = vmatprep.mubr.msk.bf16.mxu1 %vm11002_vm1, %v11001_v32 }
 0x2fb   :  { %10215 = vmatpush3.bf16.msra.mxu1 %v10814_v42  ;;  %v10852_v42 = vld [vmem:[%s11029_s17 + $0xbb0] sm:$0xff]  }
 0x2fc   :  { %9721 = vmatpush3.bf16.msra.mxu0 %v10815_v45  ;;  %10216 = vmatprep.subr.bf16.mxu1 %v11001_v32 }
 0x2fd   :  { %9722 = vmatprep.subr.bf16.mxu0 %v10816_v0 }
 0x2ff   :  { %10217 = vmatpush3.bf16.msra.mxu1 %v10817_v1 }
 0x300   :  { %9723 = vmatpush3.bf16.msra.mxu0 %v10818_v62  ;;  %10218 = vmatprep.subr.bf16.mxu1 %v11001_v32 }
 0x301   :  { %9724 = vmatprep.subr.bf16.mxu0 %v10819_v7  ;;  %v10853_v7 = vld [vmem:[%s11029_s17 + $0xbf0] sm:$0xff]  }
 0x303   :  { %10219 = vmatpush3.bf16.msra.mxu1 %v10820_v14 }
 0x304   :  { %9725 = vmatpush3.bf16.msra.mxu0 %v10821_v3  ;;  %10220 = vmatprep.subr.bf16.mxu1 %v11001_v32 }
 0x305   :  { %9726 = vmatprep.subr.bf16.mxu0 %v10822_v4 }
 0x307   :  { %10221 = vmatpush3.bf16.msra.mxu1 %v10823_v6  ;;  %v10854_v6 = vld [vmem:[%s11029_s17 + $0xb70] sm:$0xff]  }
 0x308   :  { %9727 = vmatpush3.bf16.msra.mxu0 %v10824_v9  ;;  %10222 = vmatprep.subr.bf16.mxu1 %v11001_v32 }
 0x309   :  { %v3530_v44 = vpop.f32.mrb[36].mxu1  ;;  %9728 = vmatprep.subr.bf16.mxu0 %v10825_v10  ;;  %v10855_v10 = vld [vmem:[%s11029_s17 + $0xbb8] sm:$0xff]  }
 0x30a   :  { %v9517_v18 = vpop.f32.mrb[44].mxu0  ;;  %v10090_v19 = vpop.f32.mrb[37].mxu1 }
 0x30b   :  { %v9518_v22 = vpop.f32.mrb[45].mxu0  ;;  %v3533_v23 = vpop.f32.mrb[38].mxu1  ;;  %10223 = vmatpush3.bf16.msra.mxu1 %v10826_v12 }
 0x30c   :  { %v9519_v25 = vadd.f32 %v9518_v22, %v9517_v18  ;;  %v9520_v26 = vpop.f32.mrb[46].mxu0  ;;  %v10091_v8 = vpop.f32.mrb[39].mxu1  ;;  %9729 = vmatpush3.bf16.msra.mxu0 %v10827_v16  ;;  %10224 = vmatprep.subr.bf16.mxu1 %v11001_v32  ;;  %v10856_v16 = vld [vmem:[%s11029_s17 + $0xbf8] sm:$0xff]   ;;  %v5300_v18 = vrot.slane %v12052_v27, %v11238_v37 }
 0x30d   :  { %v9521_v31 = vpop.f32.mrb[47].mxu0  ;;  %9730 = vmatprep.subr.bf16.mxu0 %v10828_v11  ;;  %v10857_v11 = vld [vmem:[%s11029_s17 + $0xb78] sm:$0xff]  }
 0x30e   :  { %v3531_v33 = vadd.f32 %v9519_v25, %v3530_v44  ;;  %v5308_v60 = vcombine.high %v5300_v18, %v5300_v18 }
 0x30f   :  { %10225 = vmatpush3.bf16.msra.mxu1 %v10829_v24 }
 0x310   :  { %v5551_v28 = vsel %vm136_vm2, %v3531_v33, 0.0  ;;  %9731 = vmatpush3.bf16.msra.mxu0 %v10830_v30  ;;  %10226 = vmatprep.subr.bf16.mxu1 %v11001_v32 }
 0x311   :  { %v12061_v40 = vadd.f32 %v5551_v28, %v12013_v56  ;;  %9732 = vmatprep.subr.bf16.mxu0 %v10831_v47  ;;  %v10845_v56 = vld [vmem:[%s11029_s17 + $0xb58] sm:$0xff]  }
 0x313   :  { %10227 = vmatpush3.bf16.msra.mxu1 %v10832_v34 }
 0x314   :  { %9733 = vmatpush3.bf16.msra.mxu0 %v10833_v35  ;;  %10232 = vmatprep.subr.bf16.mxu1 %v11001_v32 }
 0x315   :  { %9749 = vmatprep.subr.bf16.mxu0 %v10834_v43 }
 0x316   :  { %10229 = vmatmul.mubr.bf16.vlgmr.msra.gmra.mrb[64].mxu1 %v5058_v15 }
 0x317   :  { %5239 = vmatmul.mubr.bf16.vlgmr.msra.gmra.mrb[72].mxu0 %v5050_v39  ;;  %10233 = vmatpush3.bf16.msra.mxu1 %v10835_v48 }
 0x318   :  { %9750 = vmatpush3.bf16.msra.mxu0 %v10836_v55  ;;  %5488 = vmatprep.mubr.bf16.mxu0 %v5307_v50 }
 0x319   :  { %10234 = vmatprep.subr.bf16.mxu1 %v11001_v32  ;;  %9751 = vmatprep.subr.bf16.mxu0 %v10837_v49 }
 0x31a   :  { %10248 = vmatprep.mubr.msk.bf16.mxu1 %vm11002_vm1, %v11001_v32 }
 0x31b   :  { %10235 = vmatpush3.bf16.msra.mxu1 %v10838_v51 }
 0x31c   :  { %9752 = vmatpush3.bf16.msra.mxu0 %v10839_v52  ;;  %10236 = vmatprep.subr.bf16.mxu1 %v11001_v32 }
 0x31d   :  { %9753 = vmatprep.subr.bf16.mxu0 %v10840_v38 }
 0x31f   :  { %10237 = vmatpush3.bf16.msra.mxu1 %v10841_v53 }
 0x320   :  { %9754 = vmatpush3.bf16.msra.mxu0 %v10842_v20  ;;  %10238 = vmatprep.subr.bf16.mxu1 %v11001_v32 }
 0x321   :  { %9755 = vmatprep.subr.bf16.mxu0 %v10843_v54 }
 0x323   :  { %10239 = vmatpush3.bf16.msra.mxu1 %v10844_v36 }
 0x324   :  { %9756 = vmatpush3.bf16.msra.mxu0 %v10845_v56  ;;  %10240 = vmatprep.subr.bf16.mxu1 %v11001_v32 }
 0x325   :  { %9757 = vmatprep.subr.bf16.mxu0 %v10846_v29 }
 0x327   :  { %10241 = vmatpush3.bf16.msra.mxu1 %v10847_v57 }
 0x328   :  { %9758 = vmatpush3.bf16.msra.mxu0 %v10848_v58  ;;  %10242 = vmatprep.subr.bf16.mxu1 %v11001_v32 }
 0x329   :  { %v3780_v41 = vpop.f32.mrb[40].mxu1  ;;  %9759 = vmatprep.subr.bf16.mxu0 %v10849_v59 }
 0x32a   :  { %v9548_v45 = vpop.f32.mrb[48].mxu0  ;;  %v10110_v0 = vpop.f32.mrb[41].mxu1 }
 0x32b   :  { %v9549_v1 = vpop.f32.mrb[49].mxu0  ;;  %v3783_v62 = vpop.f32.mrb[42].mxu1  ;;  %10243 = vmatpush3.bf16.msra.mxu1 %v10850_v61 }
 0x32c   :  { %v9550_v14 = vadd.f32 %v9549_v1, %v9548_v45  ;;  %v9551_v3 = vpop.f32.mrb[50].mxu0  ;;  %v10111_v4 = vpop.f32.mrb[43].mxu1  ;;  %9760 = vmatpush3.bf16.msra.mxu0 %v10851_v63  ;;  %10244 = vmatprep.subr.bf16.mxu1 %v11001_v32 }
 0x32d   :  { %v9552_v9 = vpop.f32.mrb[51].mxu0  ;;  %9761 = vmatprep.subr.bf16.mxu0 %v10852_v42 }
 0x32e   :  { %v3781_v12 = vadd.f32 %v9550_v14, %v3780_v41 }
 0x32f   :  { %10245 = vmatpush3.bf16.msra.mxu1 %v10853_v7 }
 0x330   :  { %v5553_v44 = vsel %vm136_vm2, %v3781_v12, 0.0  ;;  %9762 = vmatpush3.bf16.msra.mxu0 %v10854_v6  ;;  %10246 = vmatprep.subr.bf16.mxu1 %v11001_v32 }
 0x331   :  { %v5554_v19 = vadd.f32 %v5553_v44, %v12061_v40  ;;  %9763 = vmatprep.subr.bf16.mxu0 %v10855_v10 }
 0x333   :  { %10247 = vmatpush3.bf16.msra.mxu1 %v10856_v16 }
 0x334   :  { %9764 = vmatpush3.bf16.msra.mxu0 %v10857_v11 }
 0x336   :  { %10249 = vmatmul.mubr.bf16.vlgmr.msra.gmra.mrb[68].mxu1 %v5308_v60 }
 0x337   :  { %5489 = vmatmul.mubr.bf16.vlgmr.msra.gmra.mrb[76].mxu0 %v5300_v18 }
 0x349   :  { %v4030_v22 = vpop.f32.mrb[44].mxu1 }
 0x34a   :  { %v9579_v23 = vpop.f32.mrb[52].mxu0  ;;  %v10130_v24 = vpop.f32.mrb[45].mxu1 }
 0x34b   :  { %v9580_v25 = vpop.f32.mrb[53].mxu0  ;;  %v4033_v26 = vpop.f32.mrb[46].mxu1  ;;  %v5669_v24 = vld [vmem:[%s11049_s3] sm:$0xf] }
 0x34c   :  { %v9581_v8 = vadd.f32 %v9580_v25, %v9579_v23  ;;  %v9582_v30 = vpop.f32.mrb[54].mxu0  ;;  %v10131_v31 = vpop.f32.mrb[47].mxu1  ;;  %5670 = vst [vmem:[#allocation3] sm:$0xf] %v5669_v24 }
 0x34d   :  { %v9583_v47 = vpop.f32.mrb[55].mxu0 }
 0x34e   :  { %v4031_v33 = vadd.f32 %v9581_v8, %v4030_v22 }
 0x350   :  { %v5555_v37 = vsel %vm136_vm2, %v4031_v33, 0.0 }
 0x351   :  { %v5556_v27 = vadd.f32 %v5555_v37, %v5554_v19 }
 0x369   :  { %v4280_v34 = vpop.f32.mrb[48].mxu1 }
 0x36a   :  { %v9610_v28 = vpop.f32.mrb[56].mxu0  ;;  %v10150_v35 = vpop.f32.mrb[49].mxu1 }
 0x36b   :  { %v9611_v39 = vpop.f32.mrb[57].mxu0  ;;  %v4283_v40 = vpop.f32.mrb[50].mxu1 }
 0x36c   :  { %v9612_v43 = vadd.f32 %v9611_v39, %v9610_v28  ;;  %v9613_v46 = vpop.f32.mrb[58].mxu0  ;;  %v10151_v48 = vpop.f32.mrb[51].mxu1 }
 0x36d   :  { %v9614_v15 = vpop.f32.mrb[59].mxu0 }
 0x36e   :  { %v4281_v55 = vadd.f32 %v9612_v43, %v4280_v34 }
 0x370   :  { %v5557_v49 = vsel %vm136_vm2, %v4281_v55, 0.0 }
 0x371   :  { %v5558_v50 = vadd.f32 %v5557_v49, %v5556_v27 }
 0x389   :  { %v4530_v51 = vpop.f32.mrb[52].mxu1 }
 0x38a   :  { %v9641_v52 = vpop.f32.mrb[60].mxu0  ;;  %v10170_v38 = vpop.f32.mrb[53].mxu1 }
 0x38b   :  { %v9642_v53 = vpop.f32.mrb[61].mxu0  ;;  %v4533_v20 = vpop.f32.mrb[54].mxu1 }
 0x38c   :  { %v9643_v54 = vadd.f32 %v9642_v53, %v9641_v52  ;;  %v9644_v36 = vpop.f32.mrb[62].mxu0  ;;  %v10171_v56 = vpop.f32.mrb[55].mxu1  ;;  %v5536_v52 = vld [vmem:[#allocation2] sm:$0x3] }
 0x38d   :  { %v9645_v29 = vpop.f32.mrb[63].mxu0 }
 0x38e   :  { %v4531_v57 = vadd.f32 %v9643_v54, %v4530_v51  ;;  %v9261_v54 = vld [vmem:[%s11034_s21] ss:$0 sm:$0xff] }
 0x390   :  { %v5559_v58 = vsel %vm136_vm2, %v4531_v57, 0.0 }
 0x391   :  { %v5560_v59 = vadd.f32 %v5559_v58, %v5558_v50 }
 0x3a9   :  { %v4780_v61 = vpop.f32.mrb[56].mxu1 }
 0x3aa   :  { %v9672_v63 = vpop.f32.mrb[64].mxu0  ;;  %v10190_v41 = vpop.f32.mrb[57].mxu1 }
 0x3ab   :  { %v9673_v42 = vpop.f32.mrb[65].mxu0  ;;  %v4783_v45 = vpop.f32.mrb[58].mxu1 }
 0x3ac   :  { %v9674_v0 = vadd.f32 %v9673_v42, %v9672_v63  ;;  %v9675_v1 = vpop.f32.mrb[66].mxu0  ;;  %v10191_v62 = vpop.f32.mrb[59].mxu1 }
 0x3ad   :  { %v9676_v7 = vpop.f32.mrb[67].mxu0 }
 0x3ae   :  { %v4781_v14 = vadd.f32 %v9674_v0, %v4780_v61 }
 0x3b0   :  { %v5561_v3 = vsel %vm136_vm2, %v4781_v14, 0.0 }
 0x3b1   :  { %v5562_v4 = vadd.f32 %v5561_v3, %v5560_v59 }
 0x3c9   :  { %v5030_v6 = vpop.f32.mrb[60].mxu1 }
 0x3ca   :  { %v9703_v9 = vpop.f32.mrb[68].mxu0  ;;  %v10210_v10 = vpop.f32.mrb[61].mxu1 }
 0x3cb   :  { %v9704_v12 = vpop.f32.mrb[69].mxu0  ;;  %v5033_v16 = vpop.f32.mrb[62].mxu1 }
 0x3cc   :  { %v9705_v44 = vadd.f32 %v9704_v12, %v9703_v9  ;;  %v9706_v11 = vpop.f32.mrb[70].mxu0  ;;  %v10211_v18 = vpop.f32.mrb[63].mxu1  ;;  %v9262_v12 = vld [vmem:[%s11039_s25] ss:$0 sm:$0xff] }
 0x3cd   :  { %v9707_v19 = vpop.f32.mrb[71].mxu0  ;;  %v9263_v11 = vld [vmem:[%s11044_s29] ss:$0 sm:$0xff] }
 0x3ce   :  { %v5031_v60 = vadd.f32 %v9705_v44, %v5030_v6 }
 0x3d0   :  { %v5563_v22 = vsel %vm136_vm2, %v5031_v60, 0.0 }
 0x3d1   :  { %v5564_v23 = vadd.f32 %v5563_v22, %v5562_v4 }
 0x3e9   :  { %v5280_v25 = vpop.f32.mrb[64].mxu1 }
 0x3ea   :  { %v9734_v26 = vpop.f32.mrb[72].mxu0  ;;  %v10230_v8 = vpop.f32.mrb[65].mxu1 }
 0x3eb   :  { %v9735_v30 = vpop.f32.mrb[73].mxu0  ;;  %v5283_v31 = vpop.f32.mrb[66].mxu1 }
 0x3ec   :  { %v9736_v47 = vadd.f32 %v9735_v30, %v9734_v26  ;;  %v9737_v33 = vpop.f32.mrb[74].mxu0  ;;  %v10231_v37 = vpop.f32.mrb[67].mxu1 }
 0x3ed   :  { %v9738_v27 = vpop.f32.mrb[75].mxu0 }
 0x3ee   :  { %v5281_v34 = vadd.f32 %v9736_v47, %v5280_v25 }
 0x3f0   :  { %v5565_v28 = vsel %vm136_vm2, %v5281_v34, 0.0 }
 0x3f1   :  { %v5566_v35 = vadd.f32 %v5565_v28, %v5564_v23 }
 0x409   :  { %v5530_v39 = vpop.f32.mrb[68].mxu1 }
 0x40a   :  { %v9765_v40 = vpop.f32.mrb[76].mxu0  ;;  %v10250_v43 = vpop.f32.mrb[69].mxu1 }
 0x40b   :  { %v9766_v46 = vpop.f32.mrb[77].mxu0  ;;  %v5533_v48 = vpop.f32.mrb[70].mxu1 }
 0x40c   :  { %v9767_v15 = vadd.f32 %v9766_v46, %v9765_v40  ;;  %v9768_v55 = vpop.f32.mrb[78].mxu0  ;;  %v10251_v49 = vpop.f32.mrb[71].mxu1 }
 0x40d   :  { %v9769_v50 = vpop.f32.mrb[79].mxu0 }
 0x40e   :  { %v5531_v51 = vadd.f32 %v9767_v15, %v5530_v39 }
 0x410   :  { %v5567_v38 = vsel %vm136_vm2, %v5531_v51, 0.0 }
 0x411   :  { %v5568_v53 = vadd.f32 %v5567_v38, %v5566_v35 }
 0x413   :  { %v5569_v20 = vadd.f32 %v5568_v53, %v5536_v52 }
 0x415   :  { %5570 = vst.msk [vmem:[#allocation2] sm:$0x3] %vm136_vm2, %v5569_v20 }
 0x41c   :  { %v5574_v36 = vld [vmem:[#allocation2] sm:$0x3] }
 0x41d   :  { %v5582_v56 = vadd.f32 %v9261_v54, %v5574_v36 }
 0x41f   :  { %v5583_v29 = vsel %vm136_vm2, %v5582_v56, 0.0 }
 0x420   :  { %v5584_v57 = vrot.slane %v5583_v29, 4 }
 0x422   :  { %v5585_v58 = vadd.f32 %v5584_v57, %v5583_v29 }
 0x424   :  { %v5586_v59 = vrot.slane %v5585_v58, 2 }
 0x426   :  { %v5587_v61 = vadd.f32 %v5586_v59, %v5585_v58 }
 0x428   :  { %v5588_v63 = vrot.slane %v5587_v61, 1 }
 0x42a   :  { %v5589_v41 = vadd.f32 %v5588_v63, %v5587_v61 }
 0x42c   :  { %v5591_v42 = vmul.f32 0.5, %v5589_v41 }
 0x42e   :  { %v5592_v45 = vsub.f32 %v5582_v56, %v5591_v42 }
 0x430   :  { %v5593_v0 = vmul.f32 %v5592_v45, %v5592_v45  ;;  %v5609_v16 = vmul.f32 %v9262_v12, %v5592_v45 }
 0x432   :  { %v5594_v1 = vsel %vm136_vm2, %v5593_v0, 0.0 }
 0x433   :  { %v5595_v62 = vrot.slane %v5594_v1, 4 }
 0x435   :  { %v5596_v7 = vadd.f32 %v5595_v62, %v5594_v1 }
 0x437   :  { %v5597_v14 = vrot.slane %v5596_v7, 2 }
 0x439   :  { %v5598_v3 = vadd.f32 %v5597_v14, %v5596_v7 }
 0x43b   :  { %v5599_v4 = vrot.slane %v5598_v3, 1 }
 0x43d   :  { %v5600_v6 = vadd.f32 %v5599_v4, %v5598_v3 }
 0x43f   :  { %v5601_v9 = vmul.f32 0.5, %v5600_v6 }
 0x441   :  { %v5610_v10 = vadd.f32 1e-05, %v5601_v9 }
 0x443   :  { %10858 = vrsqrt.f32 %v5610_v10 }
 0x44d   :  { %v10859_v44 = vpop.eup %10858 }
 0x44e   :  { %v5612_v18 = vmul.f32 %v10859_v44, %v5609_v16 }
 0x450   :  { %v5620_v19 = vadd.f32 %v9263_v11, %v5612_v18 }
 0x452   :  { %5621 = vst.msk [vmem:[#allocation5] sm:$0x3] %vm136_vm2, %v5620_v19 }
 0x453   :  { %5695 = vsyncadd [#allocation4], 64 }
 0x454   :  { %10926 = dma.done.wait [#allocation4], 64 }
 0x455   :  { %10927 = vsyncadd [#allocation4], 4294967232  ;;  %10252 = vmatprep.subr.bf16.mxu1 %v11001_v32  ;;  %10254 = vmatprep.mubr.msk.bf16.mxu1 %vm11002_vm1, %v11001_v32  ;;  %v5806_v60 = vld [vmem:[%s11054_s8 + $0x8] sm:$0xff]  ;;  %v5808_v22 = vld [vmem:[%s11054_s8 + $0x10] sm:$0xff]  ;;  %vm5713_vm3 = vcmask 1043456   ;;  %v12131_v33 = vpack.c.bf16 %v5620_v19, %v5620_v19  ;;  %vm5709_vm4 = vcmask 64512  }
 0x456   :  { %v5810_v23 = vld [vmem:[%s11054_s8 + $0x18] sm:$0xff]  ;;  %5807 = vst [vmem:[#allocation3 + $0x20] sm:$0xff] %v5806_v60  ;;  %5809 = vst [vmem:[#allocation3 + $0x40] sm:$0xff] %v5808_v22  ;;  %v5812_v24 = vld [vmem:[%s11054_s8 + $0x20] sm:$0xff] }
 0x457   :  { %5811 = vst [vmem:[#allocation3 + $0x60] sm:$0xff] %v5810_v23  ;;  %v5814_v25 = vld [vmem:[%s11054_s8 + $0x28] sm:$0xff]  ;;  %v5816_v26 = vld [vmem:[%s11054_s8 + $0x30] sm:$0xff]  ;;  %5813 = vst [vmem:[#allocation3 + $0x80] sm:$0xff] %v5812_v24 }
 0x458   :  { %5815 = vst [vmem:[#allocation3 + $0xa0] sm:$0xff] %v5814_v25  ;;  %5817 = vst [vmem:[#allocation3 + $0xc0] sm:$0xff] %v5816_v26  ;;  %v5818_v8 = vld [vmem:[%s11054_s8 + $0x38] sm:$0xff]  ;;  %v5701_v30 = vld [vmem:[#allocation3] sm:$0xf] }
 0x459   :  { %v5804_v31 = vld [vmem:[%s11054_s8] sm:$0xff]  ;;  %5819 = vst [vmem:[#allocation3 + $0xe0] sm:$0xff] %v5818_v8  ;;  %v5715_v47 = vsel %vm5713_vm3, %v5701_v30, 0 }
 0x45a   :  { %5805 = vst [vmem:[#allocation3] sm:$0xff] %v5804_v31  ;;  %10253 = vmatpush3.bf16.msra.mxu1 %v5715_v47  ;;  %v9264_v37 = vld [vmem:[%s11084_s12] ss:$0 sm:$0xff] }
 0x45d   :  { %10255 = vmatmul.mubr.msk.bf16.vlgmr.msra.gmra.mrb[72].mxu1 %vm5709_vm4, %v12131_v33 }
 0x530   :  { %v5751_v27 = vpop.f32.mrb[72].mxu1 }
 0x531   :  { %v5752_v34 = vadd.f32 %v9264_v37, %v5751_v27  ;;  %v10256_v28 = vpop.f32.mrb[73].mxu1 }
 0x532   :  { %v5754_v35 = vpop.f32.mrb[74].mxu1 }
 0x533   :  { %v5757_v39 = vmax.f32 %v5752_v34, 0.0  ;;  %v10257_v40 = vpop.f32.mrb[75].mxu1 }
 0x534   :  { %5827 = vsyncadd [#allocation4], 1024 }
 0x535   :  { %10928 = dma.done.wait [#allocation4], 1024 }
 0x536   :  { %10929 = vsyncadd [#allocation4], 4294966272  ;;  %10258 = vmatprep.subr.bf16.mxu1 %v11001_v32  ;;  %10274 = vmatprep.mubr.msk.bf16.mxu1 %vm11002_vm1, %v11001_v32  ;;  %v5833_v43 = vld [vmem:[#allocation3] sm:$0xff]  ;;  %v5939_v49 = vld [vmem:[%s11059_s14 + $0x10] sm:$0xff]  ;;  %v5832_v57 = vpack.c.bf16 %v5757_v39, %v5757_v39 }
 0x537   :  { %v5935_v46 = vld [vmem:[%s11059_s14] sm:$0xff]  ;;  %10259 = vmatpush3.bf16.msra.mxu1 %v5833_v43  ;;  %v5937_v15 = vld [vmem:[%s11059_s14 + $0x8] sm:$0xff]  ;;  %v5941_v51 = vld [vmem:[%s11059_s14 + $0x18] sm:$0xff] }
 0x538   :  { %v5834_v48 = vld [vmem:[#allocation3 + $0x20] sm:$0xff]  ;;  %5936 = vst [vmem:[#allocation3] sm:$0xff] %v5935_v46  ;;  %10260 = vmatprep.subr.bf16.mxu1 %v11001_v32  ;;  %v5947_v36 = vld [vmem:[%s11059_s14 + $0x30] sm:$0xff]  ;;  %v5949_v29 = vld [vmem:[%s11059_s14 + $0x38] sm:$0xff] }
 0x539   :  { %v5835_v55 = vld [vmem:[#allocation3 + $0x40] sm:$0xff]  ;;  %5938 = vst [vmem:[#allocation3 + $0x20] sm:$0xff] %v5937_v15  ;;  %v9266_v58 = vld [vmem:[%s11089_s20] ss:$0 sm:$0xff] }
 0x53a   :  { %5940 = vst [vmem:[#allocation3 + $0x40] sm:$0xff] %v5939_v49  ;;  %v5836_v50 = vld [vmem:[#allocation3 + $0x60] sm:$0xff] }
 0x53b   :  { %v5837_v52 = vld [vmem:[#allocation3 + $0x80] sm:$0xff]  ;;  %5942 = vst [vmem:[#allocation3 + $0x60] sm:$0xff] %v5941_v51  ;;  %10261 = vmatpush3.bf16.msra.mxu1 %v5834_v48 }
 0x53c   :  { %v5943_v38 = vld [vmem:[%s11059_s14 + $0x20] sm:$0xff]  ;;  %v5945_v20 = vld [vmem:[%s11059_s14 + $0x28] sm:$0xff]  ;;  %10262 = vmatprep.subr.bf16.mxu1 %v11001_v32 }
 0x53d   :  { %v5838_v53 = vld [vmem:[#allocation3 + $0xa0] sm:$0xff]  ;;  %5944 = vst [vmem:[#allocation3 + $0x80] sm:$0xff] %v5943_v38 }
 0x53e   :  { %5946 = vst [vmem:[#allocation3 + $0xa0] sm:$0xff] %v5945_v20  ;;  %v5839_v54 = vld [vmem:[#allocation3 + $0xc0] sm:$0xff] }
 0x53f   :  { %5948 = vst [vmem:[#allocation3 + $0xc0] sm:$0xff] %v5947_v36  ;;  %v5840_v56 = vld [vmem:[#allocation3 + $0xe0] sm:$0xff]  ;;  %10263 = vmatpush3.bf16.msra.mxu1 %v5835_v55 }
 0x540   :  { %5950 = vst [vmem:[#allocation3 + $0xe0] sm:$0xff] %v5949_v29  ;;  %10264 = vmatprep.subr.bf16.mxu1 %v11001_v32 }
 0x543   :  { %10265 = vmatpush3.bf16.msra.mxu1 %v5836_v50 }
 0x544   :  { %10266 = vmatprep.subr.bf16.mxu1 %v11001_v32 }
 0x547   :  { %10267 = vmatpush3.bf16.msra.mxu1 %v5837_v52 }
 0x548   :  { %10268 = vmatprep.subr.bf16.mxu1 %v11001_v32 }
 0x54b   :  { %10269 = vmatpush3.bf16.msra.mxu1 %v5838_v53 }
 0x54c   :  { %10270 = vmatprep.subr.bf16.mxu1 %v11001_v32 }
 0x54f   :  { %10271 = vmatpush3.bf16.msra.mxu1 %v5839_v54 }
 0x550   :  { %10272 = vmatprep.subr.bf16.mxu1 %v11001_v32 }
 0x553   :  { %10273 = vmatpush3.bf16.msra.mxu1 %v5840_v56 }
 0x556   :  { %10275 = vmatmul.mubr.bf16.vlgmr.msra.gmra.mrb[76].mxu1 %v5832_v57 }
 0x629   :  { %v5882_v59 = vpop.f32.mrb[76].mxu1 }
 0x62a   :  { %v5883_v61 = vadd.f32 %v9266_v58, %v5882_v59  ;;  %v10276_v63 = vpop.f32.mrb[77].mxu1 }
 0x62b   :  { %v5885_v41 = vpop.f32.mrb[78].mxu1 }
 0x62c   :  { %v5888_v42 = vmax.f32 %v5883_v61, 0.0  ;;  %v10277_v45 = vpop.f32.mrb[79].mxu1 }
 0x62d   :  { %5958 = vsyncadd [#allocation4], 1024 }
 0x62e   :  { %10930 = dma.done.wait [#allocation4], 1024 }
 0x62f   :  { %10931 = vsyncadd [#allocation4], 4294966272  ;;  %10278 = vmatprep.subr.bf16.mxu0 %v11001_v32  ;;  %10294 = vmatprep.mubr.msk.bf16.mxu0 %vm11002_vm1, %v11001_v32  ;;  %v5962_v0 = vld [vmem:[#allocation3] sm:$0xff]  ;;  %v6068_v3 = vld [vmem:[%s11064_s19 + $0x10] sm:$0xff]  ;;  %v5961_v60 = vpack.c.bf16 %v5888_v42, %v5888_v42 }
 0x630   :  { %v6064_v1 = vld [vmem:[%s11064_s19] sm:$0xff]  ;;  %10279 = vmatpush3.bf16.msra.mxu0 %v5962_v0  ;;  %v6066_v7 = vld [vmem:[%s11064_s19 + $0x8] sm:$0xff]  ;;  %v6070_v6 = vld [vmem:[%s11064_s19 + $0x18] sm:$0xff] }
 0x631   :  { %v5963_v62 = vld [vmem:[#allocation3 + $0x20] sm:$0xff]  ;;  %6065 = vst [vmem:[#allocation3] sm:$0xff] %v6064_v1  ;;  %10280 = vmatprep.subr.bf16.mxu0 %v11001_v32  ;;  %v6076_v11 = vld [vmem:[%s11064_s19 + $0x30] sm:$0xff]  ;;  %v6078_v19 = vld [vmem:[%s11064_s19 + $0x38] sm:$0xff] }
 0x632   :  { %v5964_v14 = vld [vmem:[#allocation3 + $0x40] sm:$0xff]  ;;  %6067 = vst [vmem:[#allocation3 + $0x20] sm:$0xff] %v6066_v7  ;;  %v9267_v22 = vld [vmem:[%s11094_s27] ss:$0 sm:$0xff] }
 0x633   :  { %6069 = vst [vmem:[#allocation3 + $0x40] sm:$0xff] %v6068_v3  ;;  %v5965_v4 = vld [vmem:[#allocation3 + $0x60] sm:$0xff] }
 0x634   :  { %v5966_v9 = vld [vmem:[#allocation3 + $0x80] sm:$0xff]  ;;  %6071 = vst [vmem:[#allocation3 + $0x60] sm:$0xff] %v6070_v6  ;;  %10281 = vmatpush3.bf16.msra.mxu0 %v5963_v62 }
 0x635   :  { %v6072_v10 = vld [vmem:[%s11064_s19 + $0x20] sm:$0xff]  ;;  %v6074_v16 = vld [vmem:[%s11064_s19 + $0x28] sm:$0xff]  ;;  %10282 = vmatprep.subr.bf16.mxu0 %v11001_v32 }
 0x636   :  { %v5967_v12 = vld [vmem:[#allocation3 + $0xa0] sm:$0xff]  ;;  %6073 = vst [vmem:[#allocation3 + $0x80] sm:$0xff] %v6072_v10 }
 0x637   :  { %6075 = vst [vmem:[#allocation3 + $0xa0] sm:$0xff] %v6074_v16  ;;  %v5968_v44 = vld [vmem:[#allocation3 + $0xc0] sm:$0xff] }
 0x638   :  { %6077 = vst [vmem:[#allocation3 + $0xc0] sm:$0xff] %v6076_v11  ;;  %v5969_v18 = vld [vmem:[#allocation3 + $0xe0] sm:$0xff]  ;;  %10283 = vmatpush3.bf16.msra.mxu0 %v5964_v14 }
 0x639   :  { %6079 = vst [vmem:[#allocation3 + $0xe0] sm:$0xff] %v6078_v19  ;;  %10284 = vmatprep.subr.bf16.mxu0 %v11001_v32 }
 0x63c   :  { %10285 = vmatpush3.bf16.msra.mxu0 %v5965_v4 }
 0x63d   :  { %10286 = vmatprep.subr.bf16.mxu0 %v11001_v32 }
 0x640   :  { %10287 = vmatpush3.bf16.msra.mxu0 %v5966_v9 }
 0x641   :  { %10288 = vmatprep.subr.bf16.mxu0 %v11001_v32 }
 0x644   :  { %10289 = vmatpush3.bf16.msra.mxu0 %v5967_v12 }
 0x645   :  { %10290 = vmatprep.subr.bf16.mxu0 %v11001_v32 }
 0x648   :  { %10291 = vmatpush3.bf16.msra.mxu0 %v5968_v44 }
 0x649   :  { %10292 = vmatprep.subr.bf16.mxu0 %v11001_v32 }
 0x64c   :  { %10293 = vmatpush3.bf16.msra.mxu0 %v5969_v18 }
 0x64f   :  { %10295 = vmatmul.mubr.bf16.vlgmr.msra.gmra.mrb[80].mxu0 %v5961_v60 }
 0x722   :  { %v6011_v23 = vpop.f32.mrb[80].mxu0 }
 0x723   :  { %v12174_v24 = vadd.f32 %v9267_v22, %v6011_v23  ;;  %v10296_v25 = vpop.f32.mrb[81].mxu0 }
 0x724   :  { %v6014_v26 = vpop.f32.mrb[82].mxu0 }
 0x725   :  { %v6017_v8 = vmax.f32 %v12174_v24, 0.0  ;;  %v10297_v30 = vpop.f32.mrb[83].mxu0 }
 0x726   :  { %6087 = vsyncadd [#allocation4], 1024 }
 0x727   :  { %10932 = dma.done.wait [#allocation4], 1024 }
 0x728   :  { %10933 = vsyncadd [#allocation4], 4294966272  ;;  %s12634_s0 = sld [smem:[#allocation44_spill]]  ;;  %10298 = vmatprep.subr.bf16.mxu1 %v11001_v32  ;;  %10314 = vmatprep.mubr.msk.bf16.mxu1 %vm11002_vm1, %v11001_v32  ;;  %v6091_v51 = vld [vmem:[#allocation3] sm:$0xff]  ;;  %s12635_s5 = sld [smem:[#allocation47_spill]]  ;;  %v6090_v6 = vpack.c.bf16 %v6017_v8, %v6017_v8 }
 0x729   :  { %10299 = vmatpush3.bf16.msra.mxu1 %v6091_v51  ;;  %v6092_v53 = vld [vmem:[#allocation3 + $0x20] sm:$0xff] }
 0x72a   :  { %10300 = vmatprep.subr.bf16.mxu1 %v11001_v32  ;;  %v6093_v36 = vld [vmem:[#allocation3 + $0x40] sm:$0xff] }
 0x72b   :  { %v6094_v57 = vld [vmem:[#allocation3 + $0x60] sm:$0xff] }
 0x72c   :  { %v6095_v61 = vld [vmem:[#allocation3 + $0x80] sm:$0xff] }
 0x72d   :  { %10301 = vmatpush3.bf16.msra.mxu1 %v6092_v53  ;;  %v6096_v42 = vld [vmem:[#allocation3 + $0xa0] sm:$0xff] }
 0x72e   :  { %v6168_v31 = vld [vmem:[%s12634_s0 + $0x4] sm:$0xf]  ;;  %v6170_v47 = vld [vmem:[%s12634_s0 + $0xc] sm:$0xf]  ;;  %v6176_v37 = vld [vmem:[%s12634_s0 + $0x14] sm:$0xf]  ;;  %10302 = vmatprep.subr.bf16.mxu1 %v11001_v32 }
 0x72f   :  { %6169 = vst [vmem:[#allocation3 + $0x8] sm:$0xf] %v6168_v31  ;;  %6171 = vst [vmem:[#allocation3 + $0xc] sm:$0xf] %v6170_v47  ;;  %v6178_v27 = vld [vmem:[%s12634_s0 + $0x1c] sm:$0xf] }
 0x730   :  { %6177 = vst [vmem:[#allocation3 + $0x28] sm:$0xf] %v6176_v37  ;;  %v6184_v34 = vld [vmem:[%s12634_s0 + $0x24] sm:$0xf]  ;;  %v6186_v28 = vld [vmem:[%s12634_s0 + $0x2c] sm:$0xf] }
 0x731   :  { %6179 = vst [vmem:[#allocation3 + $0x2c] sm:$0xf] %v6178_v27  ;;  %6185 = vst [vmem:[#allocation3 + $0x48] sm:$0xf] %v6184_v34  ;;  %v6192_v35 = vld [vmem:[%s12634_s0 + $0x34] sm:$0xf]  ;;  %10303 = vmatpush3.bf16.msra.mxu1 %v6093_v36 }
 0x732   :  { %6187 = vst [vmem:[#allocation3 + $0x4c] sm:$0xf] %v6186_v28  ;;  %v6194_v39 = vld [vmem:[%s12634_s0 + $0x3c] sm:$0xf]  ;;  %v6200_v40 = vld [vmem:[%s12634_s0 + $0x44] sm:$0xf]  ;;  %10304 = vmatprep.subr.bf16.mxu1 %v11001_v32 }
 0x733   :  { %6193 = vst [vmem:[#allocation3 + $0x68] sm:$0xf] %v6192_v35  ;;  %6195 = vst [vmem:[#allocation3 + $0x6c] sm:$0xf] %v6194_v39  ;;  %v6202_v43 = vld [vmem:[%s12634_s0 + $0x4c] sm:$0xf] }
 0x734   :  { %6201 = vst [vmem:[#allocation3 + $0x88] sm:$0xf] %v6200_v40  ;;  %v6208_v46 = vld [vmem:[%s12634_s0 + $0x54] sm:$0xf]  ;;  %v6210_v48 = vld [vmem:[%s12634_s0 + $0x5c] sm:$0xf] }
 0x735   :  { %6203 = vst [vmem:[#allocation3 + $0x8c] sm:$0xf] %v6202_v43  ;;  %6209 = vst [vmem:[#allocation3 + $0xa8] sm:$0xf] %v6208_v46  ;;  %v6216_v15 = vld [vmem:[%s12634_s0 + $0x64] sm:$0xf]  ;;  %10305 = vmatpush3.bf16.msra.mxu1 %v6094_v57 }
 0x736   :  { %6211 = vst [vmem:[#allocation3 + $0xac] sm:$0xf] %v6210_v48  ;;  %v6218_v55 = vld [vmem:[%s12634_s0 + $0x6c] sm:$0xf]  ;;  %v6224_v49 = vld [vmem:[%s12634_s0 + $0x74] sm:$0xf]  ;;  %10306 = vmatprep.subr.bf16.mxu1 %v11001_v32 }
 0x737   :  { %6217 = vst [vmem:[#allocation3 + $0xc8] sm:$0xf] %v6216_v15  ;;  %6219 = vst [vmem:[#allocation3 + $0xcc] sm:$0xf] %v6218_v55  ;;  %v6226_v50 = vld [vmem:[%s12634_s0 + $0x7c] sm:$0xf] }
 0x738   :  { %6225 = vst [vmem:[#allocation3 + $0xe8] sm:$0xf] %v6224_v49  ;;  %v6164_v52 = vld [vmem:[%s12634_s0] sm:$0xf]  ;;  %6227 = vst [vmem:[#allocation3 + $0xec] sm:$0xf] %v6226_v50 }
 0x739   :  { %6165 = vst [vmem:[#allocation3] sm:$0xf] %v6164_v52  ;;  %v6166_v38 = vld [vmem:[%s12634_s0 + $0x8] sm:$0xf]  ;;  %v6172_v20 = vld [vmem:[%s12634_s0 + $0x10] sm:$0xf]  ;;  %10307 = vmatpush3.bf16.msra.mxu1 %v6095_v61 }
 0x73a   :  { %6167 = vst [vmem:[#allocation3 + $0x4] sm:$0xf] %v6166_v38  ;;  %6173 = vst [vmem:[#allocation3 + $0x20] sm:$0xf] %v6172_v20  ;;  %v6174_v54 = vld [vmem:[%s12634_s0 + $0x18] sm:$0xf]  ;;  %10308 = vmatprep.subr.bf16.mxu1 %v11001_v32 }
 0x73b   :  { %v6180_v56 = vld [vmem:[%s12634_s0 + $0x20] sm:$0xf]  ;;  %6175 = vst [vmem:[#allocation3 + $0x24] sm:$0xf] %v6174_v54  ;;  %v6182_v29 = vld [vmem:[%s12634_s0 + $0x28] sm:$0xf] }
 0x73c   :  { %6181 = vst [vmem:[#allocation3 + $0x40] sm:$0xf] %v6180_v56  ;;  %v6188_v58 = vld [vmem:[%s12634_s0 + $0x30] sm:$0xf]  ;;  %6183 = vst [vmem:[#allocation3 + $0x44] sm:$0xf] %v6182_v29 }
 0x73d   :  { %6189 = vst [vmem:[#allocation3 + $0x60] sm:$0xf] %v6188_v58  ;;  %v6190_v59 = vld [vmem:[%s12634_s0 + $0x38] sm:$0xf]  ;;  %v6196_v63 = vld [vmem:[%s12634_s0 + $0x40] sm:$0xf]  ;;  %10309 = vmatpush3.bf16.msra.mxu1 %v6096_v42 }
 0x73e   :  { %6191 = vst [vmem:[#allocation3 + $0x64] sm:$0xf] %v6190_v59  ;;  %6197 = vst [vmem:[#allocation3 + $0x80] sm:$0xf] %v6196_v63  ;;  %v6198_v41 = vld [vmem:[%s12634_s0 + $0x48] sm:$0xf]  ;;  %10310 = vmatprep.subr.bf16.mxu1 %v11001_v32 }
 0x73f   :  { %v6204_v45 = vld [vmem:[%s12634_s0 + $0x50] sm:$0xf]  ;;  %6199 = vst [vmem:[#allocation3 + $0x84] sm:$0xf] %v6198_v41  ;;  %v6206_v0 = vld [vmem:[%s12634_s0 + $0x58] sm:$0xf] }
 0x740   :  { %6205 = vst [vmem:[#allocation3 + $0xa0] sm:$0xf] %v6204_v45  ;;  %v6097_v1 = vld [vmem:[#allocation3 + $0xc0] sm:$0xff]  ;;  %6207 = vst [vmem:[#allocation3 + $0xa4] sm:$0xf] %v6206_v0 }
 0x741   :  { %v6212_v62 = vld [vmem:[%s12634_s0 + $0x60] sm:$0xf]  ;;  %v6214_v7 = vld [vmem:[%s12634_s0 + $0x68] sm:$0xf]  ;;  %v6220_v3 = vld [vmem:[%s12634_s0 + $0x70] sm:$0xf]  ;;  %10311 = vmatpush3.bf16.msra.mxu1 %v6097_v1 }
 0x742   :  { %6213 = vst [vmem:[#allocation3 + $0xc0] sm:$0xf] %v6212_v62  ;;  %v6098_v14 = vld [vmem:[#allocation3 + $0xe0] sm:$0xff]  ;;  %6215 = vst [vmem:[#allocation3 + $0xc4] sm:$0xf] %v6214_v7  ;;  %10312 = vmatprep.subr.bf16.mxu1 %v11001_v32 }
 0x743   :  { %6221 = vst [vmem:[#allocation3 + $0xe0] sm:$0xf] %v6220_v3  ;;  %v6222_v4 = vld [vmem:[%s12634_s0 + $0x78] sm:$0xf]  ;;  %v9268_v9 = vld [vmem:[%s12635_s5] ss:$0 sm:$0xff] }
 0x744   :  { %6223 = vst [vmem:[#allocation3 + $0xe4] sm:$0xf] %v6222_v4 }
 0x745   :  { %10313 = vmatpush3.bf16.msra.mxu1 %v6098_v14 }
 0x748   :  { %10315 = vmatmul.mubr.bf16.vlgmr.msra.gmra.mrb[80].mxu1 %v6090_v6 }
 0x81b   :  { %v6140_v10 = vpop.f32.mrb[80].mxu1 }
 0x81c   :  { %v12223_v12 = vadd.f32 %v9268_v9, %v6140_v10  ;;  %v10316_v16 = vpop.f32.mrb[81].mxu1 }
 0x81d   :  { %v6143_v44 = vpop.f32.mrb[82].mxu1 }
 0x81e   :  { %v6146_v11 = vmax.f32 %v12223_v12, 0.0  ;;  %v10317_v18 = vpop.f32.mrb[83].mxu1 }
 0x81f   :  { %6322 = vsyncadd [#allocation4], 2048 }
 0x820   :  { %10934 = dma.done.wait [#allocation4], 2048 }
 0x821   :  { %10935 = vsyncadd [#allocation4], 4294965248  ;;  %s12636_s9 = sld [smem:[#allocation45_spill]]  ;;  %6387 = vmatprep.mubr.bf16.mxu0 %v10999_v2  ;;  %s12637_s13 = sld [smem:[#allocation48_spill]] }
 0x827   :  { %v6423_v19 = vld [vmem:[%s12636_s9 + $0x8] sm:$0xf]  ;;  %v6425_v60 = vld [vmem:[%s12636_s9 + $0x18] sm:$0xf]  ;;  %v6427_v22 = vld [vmem:[%s12636_s9 + $0xc] sm:$0xf] }
 0x828   :  { %6424 = vst [vmem:[#allocation3 + $0x10] sm:$0xf] %v6423_v19  ;;  %6426 = vst [vmem:[#allocation3 + $0x14] sm:$0xf] %v6425_v60  ;;  %v6429_v23 = vld [vmem:[%s12636_s9 + $0x1c] sm:$0xf] }
 0x829   :  { %6428 = vst [vmem:[#allocation3 + $0x18] sm:$0xf] %v6427_v22  ;;  %v6439_v24 = vld [vmem:[%s12636_s9 + $0x28] sm:$0xf]  ;;  %v6441_v25 = vld [vmem:[%s12636_s9 + $0x38] sm:$0xf] }
 0x82a   :  { %6430 = vst [vmem:[#allocation3 + $0x1c] sm:$0xf] %v6429_v23  ;;  %6440 = vst [vmem:[#allocation3 + $0x30] sm:$0xf] %v6439_v24  ;;  %v6443_v26 = vld [vmem:[%s12636_s9 + $0x2c] sm:$0xf] }
 0x82b   :  { %6442 = vst [vmem:[#allocation3 + $0x34] sm:$0xf] %v6441_v25  ;;  %v6445_v8 = vld [vmem:[%s12636_s9 + $0x3c] sm:$0xf]  ;;  %v6455_v30 = vld [vmem:[%s12636_s9 + $0x48] sm:$0xf] }
 0x82c   :  { %6444 = vst [vmem:[#allocation3 + $0x38] sm:$0xf] %v6443_v26  ;;  %6446 = vst [vmem:[#allocation3 + $0x3c] sm:$0xf] %v6445_v8  ;;  %v6457_v31 = vld [vmem:[%s12636_s9 + $0x58] sm:$0xf] }
 0x82d   :  { %6456 = vst [vmem:[#allocation3 + $0x50] sm:$0xf] %v6455_v30  ;;  %v6459_v47 = vld [vmem:[%s12636_s9 + $0x4c] sm:$0xf]  ;;  %v6461_v37 = vld [vmem:[%s12636_s9 + $0x5c] sm:$0xf] }
 0x82e   :  { %6458 = vst [vmem:[#allocation3 + $0x54] sm:$0xf] %v6457_v31  ;;  %6460 = vst [vmem:[#allocation3 + $0x58] sm:$0xf] %v6459_v47  ;;  %v6471_v27 = vld [vmem:[%s12636_s9 + $0x68] sm:$0xf] }
 0x82f   :  { %6462 = vst [vmem:[#allocation3 + $0x5c] sm:$0xf] %v6461_v37  ;;  %v6473_v34 = vld [vmem:[%s12636_s9 + $0x78] sm:$0xf]  ;;  %v6475_v28 = vld [vmem:[%s12636_s9 + $0x6c] sm:$0xf] }
 0x830   :  { %6472 = vst [vmem:[#allocation3 + $0x70] sm:$0xf] %v6471_v27  ;;  %6474 = vst [vmem:[#allocation3 + $0x74] sm:$0xf] %v6473_v34  ;;  %v6477_v35 = vld [vmem:[%s12636_s9 + $0x7c] sm:$0xf] }
 0x831   :  { %6476 = vst [vmem:[#allocation3 + $0x78] sm:$0xf] %v6475_v28  ;;  %v6487_v39 = vld [vmem:[%s12636_s9 + $0x88] sm:$0xf]  ;;  %v6489_v40 = vld [vmem:[%s12636_s9 + $0x98] sm:$0xf] }
 0x832   :  { %6478 = vst [vmem:[#allocation3 + $0x7c] sm:$0xf] %v6477_v35  ;;  %6488 = vst [vmem:[#allocation3 + $0x90] sm:$0xf] %v6487_v39  ;;  %v6491_v43 = vld [vmem:[%s12636_s9 + $0x8c] sm:$0xf] }
 0x833   :  { %6490 = vst [vmem:[#allocation3 + $0x94] sm:$0xf] %v6489_v40  ;;  %v6493_v46 = vld [vmem:[%s12636_s9 + $0x9c] sm:$0xf]  ;;  %v6503_v48 = vld [vmem:[%s12636_s9 + $0xa8] sm:$0xf] }
 0x834   :  { %6492 = vst [vmem:[#allocation3 + $0x98] sm:$0xf] %v6491_v43  ;;  %6494 = vst [vmem:[#allocation3 + $0x9c] sm:$0xf] %v6493_v46  ;;  %v6505_v15 = vld [vmem:[%s12636_s9 + $0xb8] sm:$0xf] }
 0x835   :  { %6504 = vst [vmem:[#allocation3 + $0xb0] sm:$0xf] %v6503_v48  ;;  %v6507_v55 = vld [vmem:[%s12636_s9 + $0xac] sm:$0xf]  ;;  %v6509_v49 = vld [vmem:[%s12636_s9 + $0xbc] sm:$0xf] }
 0x836   :  { %6506 = vst [vmem:[#allocation3 + $0xb4] sm:$0xf] %v6505_v15  ;;  %6508 = vst [vmem:[#allocation3 + $0xb8] sm:$0xf] %v6507_v55  ;;  %v6519_v50 = vld [vmem:[%s12636_s9 + $0xc8] sm:$0xf] }
 0x837   :  { %6510 = vst [vmem:[#allocation3 + $0xbc] sm:$0xf] %v6509_v49  ;;  %v6521_v51 = vld [vmem:[%s12636_s9 + $0xd8] sm:$0xf]  ;;  %v6523_v52 = vld [vmem:[%s12636_s9 + $0xcc] sm:$0xf] }
 0x838   :  { %6520 = vst [vmem:[#allocation3 + $0xd0] sm:$0xf] %v6519_v50  ;;  %6522 = vst [vmem:[#allocation3 + $0xd4] sm:$0xf] %v6521_v51  ;;  %v6525_v38 = vld [vmem:[%s12636_s9 + $0xdc] sm:$0xf] }
 0x839   :  { %6524 = vst [vmem:[#allocation3 + $0xd8] sm:$0xf] %v6523_v52  ;;  %v6535_v53 = vld [vmem:[%s12636_s9 + $0xe8] sm:$0xf]  ;;  %v6537_v20 = vld [vmem:[%s12636_s9 + $0xf8] sm:$0xf] }
 0x83a   :  { %6526 = vst [vmem:[#allocation3 + $0xdc] sm:$0xf] %v6525_v38  ;;  %6536 = vst [vmem:[#allocation3 + $0xf0] sm:$0xf] %v6535_v53  ;;  %v6539_v54 = vld [vmem:[%s12636_s9 + $0xec] sm:$0xf] }
 0x83b   :  { %6538 = vst [vmem:[#allocation3 + $0xf4] sm:$0xf] %v6537_v20  ;;  %v6541_v36 = vld [vmem:[%s12636_s9 + $0xfc] sm:$0xf]  ;;  %v6543_v56 = vld [vmem:[%s12636_s9 + $0x100] sm:$0xf] }
 0x83c   :  { %6540 = vst [vmem:[#allocation3 + $0xf8] sm:$0xf] %v6539_v54  ;;  %6542 = vst [vmem:[#allocation3 + $0xfc] sm:$0xf] %v6541_v36  ;;  %v6545_v29 = vld [vmem:[%s12636_s9 + $0x110] sm:$0xf] }
 0x83d   :  { %6544 = vst [vmem:[#allocation3 + $0x100] sm:$0xf] %v6543_v56  ;;  %v6547_v57 = vld [vmem:[%s12636_s9 + $0x104] sm:$0xf]  ;;  %v6549_v58 = vld [vmem:[%s12636_s9 + $0x114] sm:$0xf] }
 0x83e   :  { %6546 = vst [vmem:[#allocation3 + $0x104] sm:$0xf] %v6545_v29  ;;  %6548 = vst [vmem:[#allocation3 + $0x108] sm:$0xf] %v6547_v57  ;;  %v6551_v59 = vld [vmem:[%s12636_s9 + $0x108] sm:$0xf] }
 0x83f   :  { %6550 = vst [vmem:[#allocation3 + $0x10c] sm:$0xf] %v6549_v58  ;;  %v6553_v61 = vld [vmem:[%s12636_s9 + $0x118] sm:$0xf]  ;;  %v6555_v63 = vld [vmem:[%s12636_s9 + $0x10c] sm:$0xf] }
 0x840   :  { %6552 = vst [vmem:[#allocation3 + $0x110] sm:$0xf] %v6551_v59  ;;  %6554 = vst [vmem:[#allocation3 + $0x114] sm:$0xf] %v6553_v61  ;;  %v6557_v41 = vld [vmem:[%s12636_s9 + $0x11c] sm:$0xf] }
 0x841   :  { %6556 = vst [vmem:[#allocation3 + $0x118] sm:$0xf] %v6555_v63  ;;  %v6559_v42 = vld [vmem:[%s12636_s9 + $0x120] sm:$0xf]  ;;  %v6561_v45 = vld [vmem:[%s12636_s9 + $0x130] sm:$0xf] }
 0x842   :  { %6558 = vst [vmem:[#allocation3 + $0x11c] sm:$0xf] %v6557_v41  ;;  %6560 = vst [vmem:[#allocation3 + $0x120] sm:$0xf] %v6559_v42  ;;  %v6563_v0 = vld [vmem:[%s12636_s9 + $0x124] sm:$0xf] }
 0x843   :  { %6562 = vst [vmem:[#allocation3 + $0x124] sm:$0xf] %v6561_v45  ;;  %v6565_v1 = vld [vmem:[%s12636_s9 + $0x134] sm:$0xf]  ;;  %v6567_v62 = vld [vmem:[%s12636_s9 + $0x128] sm:$0xf] }
 0x844   :  { %6564 = vst [vmem:[#allocation3 + $0x128] sm:$0xf] %v6563_v0  ;;  %6566 = vst [vmem:[#allocation3 + $0x12c] sm:$0xf] %v6565_v1  ;;  %v6569_v7 = vld [vmem:[%s12636_s9 + $0x138] sm:$0xf] }
 0x845   :  { %6568 = vst [vmem:[#allocation3 + $0x130] sm:$0xf] %v6567_v62  ;;  %v6571_v14 = vld [vmem:[%s12636_s9 + $0x12c] sm:$0xf]  ;;  %v6573_v3 = vld [vmem:[%s12636_s9 + $0x13c] sm:$0xf] }
 0x846   :  { %6570 = vst [vmem:[#allocation3 + $0x134] sm:$0xf] %v6569_v7  ;;  %6572 = vst [vmem:[#allocation3 + $0x138] sm:$0xf] %v6571_v14  ;;  %v6575_v4 = vld [vmem:[%s12636_s9 + $0x140] sm:$0xf] }
 0x847   :  { %6574 = vst [vmem:[#allocation3 + $0x13c] sm:$0xf] %v6573_v3  ;;  %v6577_v6 = vld [vmem:[%s12636_s9 + $0x150] sm:$0xf]  ;;  %v6579_v9 = vld [vmem:[%s12636_s9 + $0x144] sm:$0xf] }
 0x848   :  { %6576 = vst [vmem:[#allocation3 + $0x140] sm:$0xf] %v6575_v4  ;;  %6578 = vst [vmem:[#allocation3 + $0x144] sm:$0xf] %v6577_v6  ;;  %v6581_v10 = vld [vmem:[%s12636_s9 + $0x154] sm:$0xf] }
 0x849   :  { %6580 = vst [vmem:[#allocation3 + $0x148] sm:$0xf] %v6579_v9  ;;  %v6583_v16 = vld [vmem:[%s12636_s9 + $0x148] sm:$0xf]  ;;  %v6585_v44 = vld [vmem:[%s12636_s9 + $0x158] sm:$0xf] }
 0x84a   :  { %6582 = vst [vmem:[#allocation3 + $0x14c] sm:$0xf] %v6581_v10  ;;  %6584 = vst [vmem:[#allocation3 + $0x150] sm:$0xf] %v6583_v16  ;;  %v6587_v18 = vld [vmem:[%s12636_s9 + $0x14c] sm:$0xf] }
 0x84b   :  { %6586 = vst [vmem:[#allocation3 + $0x154] sm:$0xf] %v6585_v44  ;;  %v6589_v19 = vld [vmem:[%s12636_s9 + $0x15c] sm:$0xf]  ;;  %v6591_v60 = vld [vmem:[%s12636_s9 + $0x160] sm:$0xf] }
 0x84c   :  { %6588 = vst [vmem:[#allocation3 + $0x158] sm:$0xf] %v6587_v18  ;;  %6590 = vst [vmem:[#allocation3 + $0x15c] sm:$0xf] %v6589_v19  ;;  %v6593_v22 = vld [vmem:[%s12636_s9 + $0x170] sm:$0xf] }
 0x84d   :  { %6592 = vst [vmem:[#allocation3 + $0x160] sm:$0xf] %v6591_v60  ;;  %v6595_v23 = vld [vmem:[%s12636_s9 + $0x164] sm:$0xf]  ;;  %v6597_v24 = vld [vmem:[%s12636_s9 + $0x174] sm:$0xf] }
 0x84e   :  { %6594 = vst [vmem:[#allocation3 + $0x164] sm:$0xf] %v6593_v22  ;;  %6596 = vst [vmem:[#allocation3 + $0x168] sm:$0xf] %v6595_v23  ;;  %v6599_v25 = vld [vmem:[%s12636_s9 + $0x168] sm:$0xf] }
 0x84f   :  { %6598 = vst [vmem:[#allocation3 + $0x16c] sm:$0xf] %v6597_v24  ;;  %v6601_v26 = vld [vmem:[%s12636_s9 + $0x178] sm:$0xf]  ;;  %v6603_v8 = vld [vmem:[%s12636_s9 + $0x16c] sm:$0xf] }
 0x850   :  { %6600 = vst [vmem:[#allocation3 + $0x170] sm:$0xf] %v6599_v25  ;;  %6602 = vst [vmem:[#allocation3 + $0x174] sm:$0xf] %v6601_v26  ;;  %v6605_v30 = vld [vmem:[%s12636_s9 + $0x17c] sm:$0xf] }
 0x851   :  { %6604 = vst [vmem:[#allocation3 + $0x178] sm:$0xf] %v6603_v8  ;;  %v6607_v31 = vld [vmem:[%s12636_s9 + $0x180] sm:$0xf]  ;;  %v6609_v47 = vld [vmem:[%s12636_s9 + $0x190] sm:$0xf] }
 0x852   :  { %6606 = vst [vmem:[#allocation3 + $0x17c] sm:$0xf] %v6605_v30  ;;  %6608 = vst [vmem:[#allocation3 + $0x180] sm:$0xf] %v6607_v31  ;;  %v6611_v37 = vld [vmem:[%s12636_s9 + $0x184] sm:$0xf] }
 0x853   :  { %6610 = vst [vmem:[#allocation3 + $0x184] sm:$0xf] %v6609_v47  ;;  %v6613_v27 = vld [vmem:[%s12636_s9 + $0x194] sm:$0xf]  ;;  %v6615_v34 = vld [vmem:[%s12636_s9 + $0x188] sm:$0xf] }
 0x854   :  { %6612 = vst [vmem:[#allocation3 + $0x188] sm:$0xf] %v6611_v37  ;;  %6614 = vst [vmem:[#allocation3 + $0x18c] sm:$0xf] %v6613_v27  ;;  %v6617_v28 = vld [vmem:[%s12636_s9 + $0x198] sm:$0xf] }
 0x855   :  { %6616 = vst [vmem:[#allocation3 + $0x190] sm:$0xf] %v6615_v34  ;;  %v6619_v35 = vld [vmem:[%s12636_s9 + $0x18c] sm:$0xf]  ;;  %v6621_v39 = vld [vmem:[%s12636_s9 + $0x19c] sm:$0xf] }
 0x856   :  { %6618 = vst [vmem:[#allocation3 + $0x194] sm:$0xf] %v6617_v28  ;;  %6620 = vst [vmem:[#allocation3 + $0x198] sm:$0xf] %v6619_v35  ;;  %v6623_v40 = vld [vmem:[%s12636_s9 + $0x1a0] sm:$0xf] }
 0x857   :  { %6622 = vst [vmem:[#allocation3 + $0x19c] sm:$0xf] %v6621_v39  ;;  %v6625_v43 = vld [vmem:[%s12636_s9 + $0x1b0] sm:$0xf]  ;;  %v6627_v46 = vld [vmem:[%s12636_s9 + $0x1a4] sm:$0xf] }
 0x858   :  { %6624 = vst [vmem:[#allocation3 + $0x1a0] sm:$0xf] %v6623_v40  ;;  %6626 = vst [vmem:[#allocation3 + $0x1a4] sm:$0xf] %v6625_v43  ;;  %v6629_v48 = vld [vmem:[%s12636_s9 + $0x1b4] sm:$0xf] }
 0x859   :  { %6628 = vst [vmem:[#allocation3 + $0x1a8] sm:$0xf] %v6627_v46  ;;  %v6631_v15 = vld [vmem:[%s12636_s9 + $0x1a8] sm:$0xf]  ;;  %v6633_v55 = vld [vmem:[%s12636_s9 + $0x1b8] sm:$0xf] }
 0x85a   :  { %6630 = vst [vmem:[#allocation3 + $0x1ac] sm:$0xf] %v6629_v48  ;;  %6632 = vst [vmem:[#allocation3 + $0x1b0] sm:$0xf] %v6631_v15  ;;  %v6635_v49 = vld [vmem:[%s12636_s9 + $0x1ac] sm:$0xf] }
 0x85b   :  { %6634 = vst [vmem:[#allocation3 + $0x1b4] sm:$0xf] %v6633_v55  ;;  %v6637_v50 = vld [vmem:[%s12636_s9 + $0x1bc] sm:$0xf]  ;;  %v6639_v51 = vld [vmem:[%s12636_s9 + $0x1c0] sm:$0xf] }
 0x85c   :  { %6636 = vst [vmem:[#allocation3 + $0x1b8] sm:$0xf] %v6635_v49  ;;  %6638 = vst [vmem:[#allocation3 + $0x1bc] sm:$0xf] %v6637_v50  ;;  %v6641_v52 = vld [vmem:[%s12636_s9 + $0x1d0] sm:$0xf] }
 0x85d   :  { %6640 = vst [vmem:[#allocation3 + $0x1c0] sm:$0xf] %v6639_v51  ;;  %v6643_v38 = vld [vmem:[%s12636_s9 + $0x1c4] sm:$0xf]  ;;  %v6645_v53 = vld [vmem:[%s12636_s9 + $0x1d4] sm:$0xf] }
 0x85e   :  { %6642 = vst [vmem:[#allocation3 + $0x1c4] sm:$0xf] %v6641_v52  ;;  %6644 = vst [vmem:[#allocation3 + $0x1c8] sm:$0xf] %v6643_v38  ;;  %v6647_v20 = vld [vmem:[%s12636_s9 + $0x1c8] sm:$0xf] }
 0x85f   :  { %6646 = vst [vmem:[#allocation3 + $0x1cc] sm:$0xf] %v6645_v53  ;;  %v6649_v54 = vld [vmem:[%s12636_s9 + $0x1d8] sm:$0xf]  ;;  %v6651_v36 = vld [vmem:[%s12636_s9 + $0x1cc] sm:$0xf] }
 0x860   :  { %6648 = vst [vmem:[#allocation3 + $0x1d0] sm:$0xf] %v6647_v20  ;;  %6650 = vst [vmem:[#allocation3 + $0x1d4] sm:$0xf] %v6649_v54  ;;  %v6653_v56 = vld [vmem:[%s12636_s9 + $0x1dc] sm:$0xf] }
 0x861   :  { %6652 = vst [vmem:[#allocation3 + $0x1d8] sm:$0xf] %v6651_v36  ;;  %v6655_v29 = vld [vmem:[%s12636_s9 + $0x1e0] sm:$0xf]  ;;  %v6657_v57 = vld [vmem:[%s12636_s9 + $0x1f0] sm:$0xf] }
 0x862   :  { %6654 = vst [vmem:[#allocation3 + $0x1dc] sm:$0xf] %v6653_v56  ;;  %6656 = vst [vmem:[#allocation3 + $0x1e0] sm:$0xf] %v6655_v29  ;;  %v6659_v58 = vld [vmem:[%s12636_s9 + $0x1e4] sm:$0xf] }
 0x863   :  { %6658 = vst [vmem:[#allocation3 + $0x1e4] sm:$0xf] %v6657_v57  ;;  %v6661_v59 = vld [vmem:[%s12636_s9 + $0x1f4] sm:$0xf]  ;;  %v6663_v61 = vld [vmem:[%s12636_s9 + $0x1e8] sm:$0xf]  ;;  %v6326_v57 = vpack.c.bf16 %v6146_v11, %v6146_v11 }
 0x864   :  { %6660 = vst [vmem:[#allocation3 + $0x1e8] sm:$0xf] %v6659_v58  ;;  %6662 = vst [vmem:[#allocation3 + $0x1ec] sm:$0xf] %v6661_v59  ;;  %v6665_v63 = vld [vmem:[%s12636_s9 + $0x1f8] sm:$0xf] }
 0x865   :  { %6664 = vst [vmem:[#allocation3 + $0x1f0] sm:$0xf] %v6663_v61  ;;  %v6667_v41 = vld [vmem:[%s12636_s9 + $0x1ec] sm:$0xf]  ;;  %v6669_v42 = vld [vmem:[%s12636_s9 + $0x1fc] sm:$0xf] }
 0x866   :  { %6666 = vst [vmem:[#allocation3 + $0x1f4] sm:$0xf] %v6665_v63  ;;  %6668 = vst [vmem:[#allocation3 + $0x1f8] sm:$0xf] %v6667_v41  ;;  %v6328_v45 = vld [vmem:[#allocation3 + $0x8] sm:$0xff]  ;;  %v6327_v62 = vld [vmem:[#allocation3] sm:$0xff] }
 0x867   :  { %6670 = vst [vmem:[#allocation3 + $0x1fc] sm:$0xf] %v6669_v42  ;;  %v6419_v0 = vld [vmem:[%s12636_s9 + $0x4] sm:$0xf]  ;;  %v6421_v1 = vld [vmem:[%s12636_s9 + $0x14] sm:$0xf]  ;;  %6355 = vmatprep.subr.bf16.mxu0 %v6328_v45 }
 0x868   :  { %6420 = vst [vmem:[#allocation3 + $0x8] sm:$0xf] %v6419_v0  ;;  %6422 = vst [vmem:[#allocation3 + $0xc] sm:$0xf] %v6421_v1  ;;  %v6415_v7 = vld [vmem:[%s12636_s9] sm:$0xf]  ;;  %6356 = vmatpush1.bf16.msra.mxu0 %v6327_v62 }
 0x869   :  { %v6417_v14 = vld [vmem:[%s12636_s9 + $0x10] sm:$0xf]  ;;  %6416 = vst [vmem:[#allocation3] sm:$0xf] %v6415_v7  ;;  %v6435_v4 = vld [vmem:[%s12636_s9 + $0x24] sm:$0xf] }
 0x86a   :  { %6418 = vst [vmem:[#allocation3 + $0x4] sm:$0xf] %v6417_v14  ;;  %v6330_v3 = vld [vmem:[#allocation3 + $0x28] sm:$0xff]  ;;  %v6437_v6 = vld [vmem:[%s12636_s9 + $0x34] sm:$0xf]  ;;  %v6329_v9 = vld [vmem:[#allocation3 + $0x20] sm:$0xff] }
 0x86b   :  { %6357 = vmatprep.subr.bf16.mxu0 %v6330_v3  ;;  %6436 = vst [vmem:[#allocation3 + $0x28] sm:$0xf] %v6435_v4  ;;  %6438 = vst [vmem:[#allocation3 + $0x2c] sm:$0xf] %v6437_v6  ;;  %v6431_v10 = vld [vmem:[%s12636_s9 + $0x20] sm:$0xf] }
 0x86c   :  { %v6433_v16 = vld [vmem:[%s12636_s9 + $0x30] sm:$0xf]  ;;  %6432 = vst [vmem:[#allocation3 + $0x20] sm:$0xf] %v6431_v10  ;;  %v6451_v18 = vld [vmem:[%s12636_s9 + $0x44] sm:$0xf]  ;;  %6358 = vmatpush1.bf16.msra.mxu0 %v6329_v9 }
 0x86d   :  { %6434 = vst [vmem:[#allocation3 + $0x24] sm:$0xf] %v6433_v16  ;;  %v6332_v44 = vld [vmem:[#allocation3 + $0x48] sm:$0xff]  ;;  %v6453_v19 = vld [vmem:[%s12636_s9 + $0x54] sm:$0xf]  ;;  %v6331_v60 = vld [vmem:[#allocation3 + $0x40] sm:$0xff] }
 0x86e   :  { %6452 = vst [vmem:[#allocation3 + $0x48] sm:$0xf] %v6451_v18  ;;  %6454 = vst [vmem:[#allocation3 + $0x4c] sm:$0xf] %v6453_v19  ;;  %v6447_v22 = vld [vmem:[%s12636_s9 + $0x40] sm:$0xf]  ;;  %6359 = vmatprep.subr.bf16.mxu0 %v6332_v44 }
 0x86f   :  { %v6449_v23 = vld [vmem:[%s12636_s9 + $0x50] sm:$0xf]  ;;  %6448 = vst [vmem:[#allocation3 + $0x40] sm:$0xf] %v6447_v22  ;;  %v6467_v25 = vld [vmem:[%s12636_s9 + $0x64] sm:$0xf] }
 0x870   :  { %6450 = vst [vmem:[#allocation3 + $0x44] sm:$0xf] %v6449_v23  ;;  %v6334_v24 = vld [vmem:[#allocation3 + $0x68] sm:$0xff]  ;;  %v6469_v26 = vld [vmem:[%s12636_s9 + $0x74] sm:$0xf]  ;;  %v6333_v8 = vld [vmem:[#allocation3 + $0x60] sm:$0xff]  ;;  %6360 = vmatpush1.bf16.msra.mxu0 %v6331_v60 }
 0x871   :  { %6468 = vst [vmem:[#allocation3 + $0x68] sm:$0xf] %v6467_v25  ;;  %6470 = vst [vmem:[#allocation3 + $0x6c] sm:$0xf] %v6469_v26  ;;  %v6463_v30 = vld [vmem:[%s12636_s9 + $0x60] sm:$0xf]  ;;  %6361 = vmatprep.subr.bf16.mxu0 %v6334_v24 }
 0x872   :  { %v6465_v31 = vld [vmem:[%s12636_s9 + $0x70] sm:$0xf]  ;;  %6464 = vst [vmem:[#allocation3 + $0x60] sm:$0xf] %v6463_v30  ;;  %v6483_v37 = vld [vmem:[%s12636_s9 + $0x84] sm:$0xf] }
 0x873   :  { %6466 = vst [vmem:[#allocation3 + $0x64] sm:$0xf] %v6465_v31  ;;  %v6336_v47 = vld [vmem:[#allocation3 + $0x88] sm:$0xff]  ;;  %v6485_v27 = vld [vmem:[%s12636_s9 + $0x94] sm:$0xf]  ;;  %v6335_v34 = vld [vmem:[#allocation3 + $0x80] sm:$0xff] }
 0x874   :  { %6484 = vst [vmem:[#allocation3 + $0x88] sm:$0xf] %v6483_v37  ;;  %6486 = vst [vmem:[#allocation3 + $0x8c] sm:$0xf] %v6485_v27  ;;  %v6479_v28 = vld [vmem:[%s12636_s9 + $0x80] sm:$0xf]  ;;  %6362 = vmatpush1.bf16.msra.mxu0 %v6333_v8 }
 0x875   :  { %v6481_v35 = vld [vmem:[%s12636_s9 + $0x90] sm:$0xf]  ;;  %6480 = vst [vmem:[#allocation3 + $0x80] sm:$0xf] %v6479_v28  ;;  %v6499_v40 = vld [vmem:[%s12636_s9 + $0xa4] sm:$0xf]  ;;  %6363 = vmatprep.subr.bf16.mxu0 %v6336_v47 }
 0x876   :  { %6482 = vst [vmem:[#allocation3 + $0x84] sm:$0xf] %v6481_v35  ;;  %v6338_v39 = vld [vmem:[#allocation3 + $0xa8] sm:$0xff]  ;;  %v6501_v43 = vld [vmem:[%s12636_s9 + $0xb4] sm:$0xf]  ;;  %v6337_v46 = vld [vmem:[#allocation3 + $0xa0] sm:$0xff] }
 0x877   :  { %6500 = vst [vmem:[#allocation3 + $0xa8] sm:$0xf] %v6499_v40  ;;  %6502 = vst [vmem:[#allocation3 + $0xac] sm:$0xf] %v6501_v43  ;;  %v6495_v48 = vld [vmem:[%s12636_s9 + $0xa0] sm:$0xf] }
 0x878   :  { %v6497_v15 = vld [vmem:[%s12636_s9 + $0xb0] sm:$0xf]  ;;  %6496 = vst [vmem:[#allocation3 + $0xa0] sm:$0xf] %v6495_v48  ;;  %v6515_v49 = vld [vmem:[%s12636_s9 + $0xc4] sm:$0xf]  ;;  %6364 = vmatpush1.bf16.msra.mxu0 %v6335_v34 }
 0x879   :  { %6498 = vst [vmem:[#allocation3 + $0xa4] sm:$0xf] %v6497_v15  ;;  %v6340_v55 = vld [vmem:[#allocation3 + $0xc8] sm:$0xff]  ;;  %v6517_v50 = vld [vmem:[%s12636_s9 + $0xd4] sm:$0xf]  ;;  %v6339_v51 = vld [vmem:[#allocation3 + $0xc0] sm:$0xff]  ;;  %6365 = vmatprep.subr.bf16.mxu0 %v6338_v39 }
 0x87a   :  { %6516 = vst [vmem:[#allocation3 + $0xc8] sm:$0xf] %v6515_v49  ;;  %6518 = vst [vmem:[#allocation3 + $0xcc] sm:$0xf] %v6517_v50  ;;  %v6511_v52 = vld [vmem:[%s12636_s9 + $0xc0] sm:$0xf] }
 0x87b   :  { %v6513_v38 = vld [vmem:[%s12636_s9 + $0xd0] sm:$0xf]  ;;  %6512 = vst [vmem:[#allocation3 + $0xc0] sm:$0xf] %v6511_v52  ;;  %v6531_v20 = vld [vmem:[%s12636_s9 + $0xe4] sm:$0xf] }
 0x87c   :  { %6514 = vst [vmem:[#allocation3 + $0xc4] sm:$0xf] %v6513_v38  ;;  %v6342_v53 = vld [vmem:[#allocation3 + $0xe8] sm:$0xff]  ;;  %v6533_v54 = vld [vmem:[%s12636_s9 + $0xf4] sm:$0xf]  ;;  %v6341_v36 = vld [vmem:[#allocation3 + $0xe0] sm:$0xff]  ;;  %6366 = vmatpush1.bf16.msra.mxu0 %v6337_v46 }
 0x87d   :  { %6532 = vst [vmem:[#allocation3 + $0xe8] sm:$0xf] %v6531_v20  ;;  %6534 = vst [vmem:[#allocation3 + $0xec] sm:$0xf] %v6533_v54  ;;  %v6527_v56 = vld [vmem:[%s12636_s9 + $0xe0] sm:$0xf]  ;;  %6367 = vmatprep.subr.bf16.mxu0 %v6340_v55 }
 0x87e   :  { %v6529_v29 = vld [vmem:[%s12636_s9 + $0xf0] sm:$0xf]  ;;  %6528 = vst [vmem:[#allocation3 + $0xe0] sm:$0xf] %v6527_v56  ;;  %v6343_v58 = vld [vmem:[%s12637_s13] sm:$0x3] }
 0x87f   :  { %6530 = vst [vmem:[#allocation3 + $0xe4] sm:$0xf] %v6529_v29  ;;  %v6348_v59 = vrot.slane %v6343_v58, %v11328_v17  ;;  %v6352_v61 = vrot.slane %v6343_v58, %v11331_v21 }
 0x880   :  { %6368 = vmatpush1.bf16.msra.mxu0 %v6339_v51 }
 0x881   :  { %6369 = vmatprep.subr.bf16.mxu0 %v6342_v53 }
 0x884   :  { %6370 = vmatpush1.bf16.msra.mxu0 %v6341_v36 }
 0x887   :  { %6388 = vmatmul.mubr.bf16.vlgmr.msra.gmra.mrb[84].mxu0 %v6326_v57 }
 0x95a   :  { %v6389_v63 = vpop.f32.mrb[84].mxu0 }
 0x95b   :  { %v12361_v41 = vadd.f32 %v6389_v63, %v6348_v59  ;;  %v6391_v42 = vpop.f32.mrb[85].mxu0 }
 0x95c   :  { %v6392_v45 = vadd.f32 %v6391_v42, %v6352_v61  ;;  %v6393_v0 = vpop.f32.mrb[86].mxu0 }
 0x95d   :  { %v6396_v1 = vmax.f32 %v12361_v41, 0.0  ;;  %v6394_v62 = vpop.f32.mrb[87].mxu0 }
 0x95e   :  { %v6397_v7 = vmax.f32 %v6392_v45, 0.0 }
 0x95f   :  { %6957 = vsyncadd [#allocation4], 8192 }
 0x960   :  { %10936 = dma.done.wait [#allocation4], 8192 }
 0x961   :  { %10937 = vsyncadd [#allocation4], 4294959104  ;;  %s12638_s17 = sld [smem:[#allocation46_spill]]  ;;  %v6963_v12 = vpack.c.bf16 %v6397_v7, %v6397_v7  ;;  %v6965_v26 = vld [vmem:[#allocation3 + $0x8] sm:$0xff]  ;;  %v6967_v8 = vld [vmem:[#allocation3 + $0x18] sm:$0xff]  ;;  %s12639_s21 = sld [smem:[#allocation49_spill]] }
 0x962   :  { %7050 = vmatprep.subr.bf16.mxu1 %v6965_v26  ;;  %7091 = vmatprep.subr.bf16.mxu0 %v6967_v8  ;;  %v6964_v30 = vld [vmem:[#allocation3] sm:$0xff]  ;;  %v6966_v47 = vld [vmem:[#allocation3 + $0x10] sm:$0xff]  ;;  %v6969_v37 = vld [vmem:[#allocation3 + $0x28] sm:$0xff] }
 0x963   :  { %7082 = vmatprep.mubr.bf16.mxu1 %v6963_v12  ;;  %7123 = vmatprep.mubr.bf16.mxu0 %v6963_v12  ;;  %v6971_v27 = vld [vmem:[#allocation3 + $0x38] sm:$0xff]  ;;  %v6968_v34 = vld [vmem:[#allocation3 + $0x20] sm:$0xff]  ;;  %v6970_v35 = vld [vmem:[#allocation3 + $0x30] sm:$0xff] }
 0x964   :  { %7051 = vmatpush1.bf16.msra.mxu1 %v6964_v30  ;;  %7092 = vmatpush1.bf16.msra.mxu0 %v6966_v47  ;;  %v6973_v39 = vld [vmem:[#allocation3 + $0x48] sm:$0xff]  ;;  %v6975_v40 = vld [vmem:[#allocation3 + $0x58] sm:$0xff]  ;;  %v6972_v43 = vld [vmem:[#allocation3 + $0x40] sm:$0xff] }
 0x965   :  { %7052 = vmatprep.subr.bf16.mxu1 %v6969_v37  ;;  %7093 = vmatprep.subr.bf16.mxu0 %v6971_v27  ;;  %v6976_v48 = vld [vmem:[#allocation3 + $0x60] sm:$0xff]  ;;  %v6974_v55 = vld [vmem:[#allocation3 + $0x50] sm:$0xff]  ;;  %v6977_v49 = vld [vmem:[#allocation3 + $0x68] sm:$0xff] }
 0x966   :  { %v6979_v50 = vld [vmem:[#allocation3 + $0x78] sm:$0xff]  ;;  %v6980_v51 = vld [vmem:[#allocation3 + $0x80] sm:$0xff]  ;;  %v6978_v20 = vld [vmem:[#allocation3 + $0x70] sm:$0xff] }
 0x967   :  { %v7262_v11 = vld [vmem:[%s12638_s17 + $0x80] sm:$0xff]  ;;  %v7264_v14 = vld [vmem:[%s12638_s17 + $0x88] sm:$0xff]  ;;  %v7266_v3 = vld [vmem:[%s12638_s17 + $0x90] sm:$0xff] }
 0x968   :  { %7263 = vst [vmem:[#allocation3 + $0x200] sm:$0xff] %v7262_v11  ;;  %7265 = vst [vmem:[#allocation3 + $0x220] sm:$0xff] %v7264_v14  ;;  %v7268_v4 = vld [vmem:[%s12638_s17 + $0x98] sm:$0xff]  ;;  %v7270_v6 = vld [vmem:[%s12638_s17 + $0xa0] sm:$0xff]  ;;  %7053 = vmatpush1.bf16.msra.mxu1 %v6968_v34  ;;  %7094 = vmatpush1.bf16.msra.mxu0 %v6970_v35 }
 0x969   :  { %7267 = vst [vmem:[#allocation3 + $0x240] sm:$0xff] %v7266_v3  ;;  %v7272_v9 = vld [vmem:[%s12638_s17 + $0xa8] sm:$0xff]  ;;  %7269 = vst [vmem:[#allocation3 + $0x260] sm:$0xff] %v7268_v4  ;;  %v7274_v10 = vld [vmem:[%s12638_s17 + $0xb0] sm:$0xff]  ;;  %7054 = vmatprep.subr.bf16.mxu1 %v6973_v39  ;;  %7095 = vmatprep.subr.bf16.mxu0 %v6975_v40 }
 0x96a   :  { %7271 = vst [vmem:[#allocation3 + $0x280] sm:$0xff] %v7270_v6  ;;  %7273 = vst [vmem:[#allocation3 + $0x2a0] sm:$0xff] %v7272_v9  ;;  %v7276_v16 = vld [vmem:[%s12638_s17 + $0xb8] sm:$0xff]  ;;  %v7278_v44 = vld [vmem:[%s12638_s17 + $0xc0] sm:$0xff] }
 0x96b   :  { %7275 = vst [vmem:[#allocation3 + $0x2c0] sm:$0xff] %v7274_v10  ;;  %7277 = vst [vmem:[#allocation3 + $0x2e0] sm:$0xff] %v7276_v16  ;;  %v7280_v18 = vld [vmem:[%s12638_s17 + $0xc8] sm:$0xff]  ;;  %v7282_v19 = vld [vmem:[%s12638_s17 + $0xd0] sm:$0xff] }
 0x96c   :  { %7279 = vst [vmem:[#allocation3 + $0x300] sm:$0xff] %v7278_v44  ;;  %v7284_v60 = vld [vmem:[%s12638_s17 + $0xd8] sm:$0xff]  ;;  %7281 = vst [vmem:[#allocation3 + $0x320] sm:$0xff] %v7280_v18  ;;  %v7286_v22 = vld [vmem:[%s12638_s17 + $0xe0] sm:$0xff]  ;;  %7055 = vmatpush1.bf16.msra.mxu1 %v6972_v43  ;;  %7096 = vmatpush1.bf16.msra.mxu0 %v6974_v55 }
 0x96d   :  { %7283 = vst [vmem:[#allocation3 + $0x340] sm:$0xff] %v7282_v19  ;;  %7285 = vst [vmem:[#allocation3 + $0x360] sm:$0xff] %v7284_v60  ;;  %v7288_v23 = vld [vmem:[%s12638_s17 + $0xe8] sm:$0xff]  ;;  %v7290_v24 = vld [vmem:[%s12638_s17 + $0xf0] sm:$0xff]  ;;  %7056 = vmatprep.subr.bf16.mxu1 %v6977_v49  ;;  %7097 = vmatprep.subr.bf16.mxu0 %v6979_v50 }
 0x96e   :  { %7287 = vst [vmem:[#allocation3 + $0x380] sm:$0xff] %v7286_v22  ;;  %7289 = vst [vmem:[#allocation3 + $0x3a0] sm:$0xff] %v7288_v23  ;;  %v7292_v25 = vld [vmem:[%s12638_s17 + $0xf8] sm:$0xff]  ;;  %v7230_v31 = vld [vmem:[%s12638_s17] sm:$0xff] }
 0x96f   :  { %7291 = vst [vmem:[#allocation3 + $0x3c0] sm:$0xff] %v7290_v24  ;;  %7293 = vst [vmem:[#allocation3 + $0x3e0] sm:$0xff] %v7292_v25  ;;  %v7232_v28 = vld [vmem:[%s12638_s17 + $0x8] sm:$0xff]  ;;  %v7234_v46 = vld [vmem:[%s12638_s17 + $0x10] sm:$0xff] }
 0x970   :  { %7231 = vst [vmem:[#allocation3] sm:$0xff] %v7230_v31  ;;  %7233 = vst [vmem:[#allocation3 + $0x20] sm:$0xff] %v7232_v28  ;;  %v7236_v15 = vld [vmem:[%s12638_s17 + $0x18] sm:$0xff]  ;;  %v7238_v52 = vld [vmem:[%s12638_s17 + $0x20] sm:$0xff]  ;;  %7057 = vmatpush1.bf16.msra.mxu1 %v6976_v48  ;;  %7098 = vmatpush1.bf16.msra.mxu0 %v6978_v20 }
 0x971   :  { %7235 = vst [vmem:[#allocation3 + $0x40] sm:$0xff] %v7234_v46  ;;  %7237 = vst [vmem:[#allocation3 + $0x60] sm:$0xff] %v7236_v15  ;;  %v6984_v38 = vld [vmem:[#allocation3 + $0xa0] sm:$0xff]  ;;  %v7242_v36 = vld [vmem:[%s12638_s17 + $0x30] sm:$0xff] }
 0x972   :  { %7239 = vst [vmem:[#allocation3 + $0x80] sm:$0xff] %v7238_v52  ;;  %v7240_v53 = vld [vmem:[%s12638_s17 + $0x28] sm:$0xff]  ;;  %v6983_v29 = vld [vmem:[#allocation3 + $0x98] sm:$0xff]  ;;  %v6982_v63 = vld [vmem:[#allocation3 + $0x90] sm:$0xff] }
 0x973   :  { %7241 = vst [vmem:[#allocation3 + $0xa0] sm:$0xff] %v7240_v53  ;;  %v6988_v54 = vld [vmem:[#allocation3 + $0xc0] sm:$0xff]  ;;  %v6981_v56 = vld [vmem:[#allocation3 + $0x88] sm:$0xff]  ;;  %v7244_v58 = vld [vmem:[%s12638_s17 + $0x38] sm:$0xff]  ;;  %7099 = vmatprep.subr.bf16.mxu0 %v6983_v29  ;;  %v7044_v29 = vsub.s32 3, %v11223_v13 }
 0x974   :  { %7243 = vst [vmem:[#allocation3 + $0xc0] sm:$0xff] %v7242_v36  ;;  %v6992_v57 = vld [vmem:[#allocation3 + $0xe0] sm:$0xff]  ;;  %7058 = vmatprep.subr.bf16.mxu1 %v6981_v56  ;;  %v6985_v42 = vld [vmem:[#allocation3 + $0xa8] sm:$0xff]  ;;  %v6987_v45 = vld [vmem:[#allocation3 + $0xb8] sm:$0xff]  ;;  %7100 = vmatpush1.bf16.msra.mxu0 %v6982_v63  ;;  %v6962_v36 = vpack.c.bf16 %v6396_v1, %v6396_v1 }
 0x975   :  { %7245 = vst [vmem:[#allocation3 + $0xe0] sm:$0xff] %v7244_v58  ;;  %v6996_v59 = vld [vmem:[#allocation3 + $0x100] sm:$0xff]  ;;  %7059 = vmatpush1.bf16.msra.mxu1 %v6980_v51  ;;  %v7250_v12 = vld [vmem:[%s12638_s17 + $0x50] sm:$0xff]  ;;  %7101 = vmatprep.subr.bf16.mxu0 %v6987_v45  ;;  %v7252_v3 = vld [vmem:[%s12638_s17 + $0x58] sm:$0xff] }
 0x976   :  { %v7246_v61 = vld [vmem:[%s12638_s17 + $0x40] sm:$0xff]  ;;  %v7248_v62 = vld [vmem:[%s12638_s17 + $0x48] sm:$0xff]  ;;  %7060 = vmatprep.subr.bf16.mxu1 %v6985_v42  ;;  %v6986_v11 = vld [vmem:[#allocation3 + $0xb0] sm:$0xff] }
 0x977   :  { %7247 = vst [vmem:[#allocation3 + $0x100] sm:$0xff] %v7246_v61  ;;  %v7000_v0 = vld [vmem:[#allocation3 + $0x120] sm:$0xff]  ;;  %v6989_v4 = vld [vmem:[#allocation3 + $0xc8] sm:$0xff]  ;;  %v6991_v6 = vld [vmem:[#allocation3 + $0xd8] sm:$0xff] }
 0x978   :  { %7249 = vst [vmem:[#allocation3 + $0x120] sm:$0xff] %v7248_v62  ;;  %v7004_v7 = vld [vmem:[#allocation3 + $0x140] sm:$0xff]  ;;  %7102 = vmatpush1.bf16.msra.mxu0 %v6986_v11  ;;  %v6990_v16 = vld [vmem:[#allocation3 + $0xd0] sm:$0xff]  ;;  %v6993_v44 = vld [vmem:[#allocation3 + $0xe8] sm:$0xff] }
 0x979   :  { %7251 = vst [vmem:[#allocation3 + $0x140] sm:$0xff] %v7250_v12  ;;  %v7008_v14 = vld [vmem:[#allocation3 + $0x160] sm:$0xff]  ;;  %7061 = vmatpush1.bf16.msra.mxu1 %v6984_v38  ;;  %7103 = vmatprep.subr.bf16.mxu0 %v6991_v6  ;;  %v6995_v60 = vld [vmem:[#allocation3 + $0xf8] sm:$0xff]  ;;  %v7258_v23 = vld [vmem:[%s12638_s17 + $0x70] sm:$0xff] }
 0x97a   :  { %7253 = vst [vmem:[#allocation3 + $0x160] sm:$0xff] %v7252_v3  ;;  %v7012_v9 = vld [vmem:[#allocation3 + $0x180] sm:$0xff]  ;;  %7062 = vmatprep.subr.bf16.mxu1 %v6989_v4  ;;  %v7260_v25 = vld [vmem:[%s12638_s17 + $0x78] sm:$0xff]  ;;  %v6997_v8 = vld [vmem:[#allocation3 + $0x108] sm:$0xff] }
 0x97b   :  { %v7254_v10 = vld [vmem:[%s12638_s17 + $0x60] sm:$0xff]  ;;  %v7256_v19 = vld [vmem:[%s12638_s17 + $0x68] sm:$0xff]  ;;  %v6994_v26 = vld [vmem:[#allocation3 + $0xf0] sm:$0xff] }
 0x97c   :  { %7255 = vst [vmem:[#allocation3 + $0x180] sm:$0xff] %v7254_v10  ;;  %v7016_v18 = vld [vmem:[#allocation3 + $0x1a0] sm:$0xff]  ;;  %7104 = vmatpush1.bf16.msra.mxu0 %v6990_v16  ;;  %v6999_v30 = vld [vmem:[#allocation3 + $0x118] sm:$0xff]  ;;  %v6998_v31 = vld [vmem:[#allocation3 + $0x110] sm:$0xff] }
 0x97d   :  { %7257 = vst [vmem:[#allocation3 + $0x1a0] sm:$0xff] %v7256_v19  ;;  %v7020_v22 = vld [vmem:[#allocation3 + $0x1c0] sm:$0xff]  ;;  %7063 = vmatpush1.bf16.msra.mxu1 %v6988_v54  ;;  %7105 = vmatprep.subr.bf16.mxu0 %v6995_v60  ;;  %v7001_v47 = vld [vmem:[#allocation3 + $0x128] sm:$0xff]  ;;  %v7003_v37 = vld [vmem:[#allocation3 + $0x138] sm:$0xff] }
 0x97e   :  { %7259 = vst [vmem:[#allocation3 + $0x1c0] sm:$0xff] %v7258_v23  ;;  %v12395_v24 = vld [vmem:[#allocation3 + $0x1e0] sm:$0xff]  ;;  %7064 = vmatprep.subr.bf16.mxu1 %v6993_v44  ;;  %v7002_v27 = vld [vmem:[#allocation3 + $0x130] sm:$0xff]  ;;  %v7005_v34 = vld [vmem:[#allocation3 + $0x148] sm:$0xff] }
 0x97f   :  { %7261 = vst [vmem:[#allocation3 + $0x1e0] sm:$0xff] %v7260_v25  ;;  %v7007_v28 = vld [vmem:[#allocation3 + $0x158] sm:$0xff]  ;;  %v7006_v35 = vld [vmem:[#allocation3 + $0x150] sm:$0xff]  ;;  %v7009_v39 = vld [vmem:[#allocation3 + $0x168] sm:$0xff] }
 0x980   :  { %7106 = vmatpush1.bf16.msra.mxu0 %v6994_v26  ;;  %v7011_v40 = vld [vmem:[#allocation3 + $0x178] sm:$0xff]  ;;  %v7010_v43 = vld [vmem:[#allocation3 + $0x170] sm:$0xff]  ;;  %v7013_v46 = vld [vmem:[#allocation3 + $0x188] sm:$0xff] }
 0x981   :  { %7065 = vmatpush1.bf16.msra.mxu1 %v6992_v57  ;;  %7107 = vmatprep.subr.bf16.mxu0 %v6999_v30  ;;  %v7015_v48 = vld [vmem:[#allocation3 + $0x198] sm:$0xff]  ;;  %v7014_v15 = vld [vmem:[#allocation3 + $0x190] sm:$0xff]  ;;  %v7017_v55 = vld [vmem:[#allocation3 + $0x1a8] sm:$0xff] }
 0x982   :  { %7066 = vmatprep.subr.bf16.mxu1 %v6997_v8  ;;  %v7019_v49 = vld [vmem:[#allocation3 + $0x1b8] sm:$0xff]  ;;  %v7018_v50 = vld [vmem:[#allocation3 + $0x1b0] sm:$0xff]  ;;  %v7021_v51 = vld [vmem:[#allocation3 + $0x1c8] sm:$0xff] }
 0x983   :  { %v7023_v52 = vld [vmem:[#allocation3 + $0x1d8] sm:$0xff]  ;;  %v7022_v38 = vld [vmem:[#allocation3 + $0x1d0] sm:$0xff]  ;;  %v7025_v53 = vld [vmem:[#allocation3 + $0x1e8] sm:$0xff] }
 0x984   :  { %7108 = vmatpush1.bf16.msra.mxu0 %v6998_v31  ;;  %v7027_v20 = vld [vmem:[#allocation3 + $0x1f8] sm:$0xff]  ;;  %v7026_v54 = vld [vmem:[#allocation3 + $0x1f0] sm:$0xff] }
 0x985   :  { %7067 = vmatpush1.bf16.msra.mxu1 %v6996_v59  ;;  %7109 = vmatprep.subr.bf16.mxu0 %v7003_v37  ;;  %v7028_v56 = vld [vmem:[%s12639_s21] sm:$0xf] }
 0x986   :  { %7068 = vmatprep.subr.bf16.mxu1 %v7001_v47  ;;  %v7033_v57 = vrot.slane %v7028_v56, %v11328_v17  ;;  %v7041_v58 = vrot.slane %v7028_v56, %v593_v5  ;;  %v7037_v59 = vrot.slane %v7028_v56, %v11331_v21  ;;  %v7045_v61 = vrot.slane %v7028_v56, %v7044_v29 }
 0x988   :  { %7110 = vmatpush1.bf16.msra.mxu0 %v7002_v27 }
 0x989   :  { %7069 = vmatpush1.bf16.msra.mxu1 %v7000_v0  ;;  %7111 = vmatprep.subr.bf16.mxu0 %v7007_v28 }
 0x98a   :  { %7070 = vmatprep.subr.bf16.mxu1 %v7005_v34 }
 0x98c   :  { %7112 = vmatpush1.bf16.msra.mxu0 %v7006_v35 }
 0x98d   :  { %7071 = vmatpush1.bf16.msra.mxu1 %v7004_v7  ;;  %7113 = vmatprep.subr.bf16.mxu0 %v7011_v40 }
 0x98e   :  { %7072 = vmatprep.subr.bf16.mxu1 %v7009_v39 }
 0x990   :  { %7114 = vmatpush1.bf16.msra.mxu0 %v7010_v43 }
 0x991   :  { %7073 = vmatpush1.bf16.msra.mxu1 %v7008_v14  ;;  %7115 = vmatprep.subr.bf16.mxu0 %v7015_v48 }
 0x992   :  { %7074 = vmatprep.subr.bf16.mxu1 %v7013_v46 }
 0x994   :  { %7116 = vmatpush1.bf16.msra.mxu0 %v7014_v15 }
 0x995   :  { %7075 = vmatpush1.bf16.msra.mxu1 %v7012_v9  ;;  %7117 = vmatprep.subr.bf16.mxu0 %v7019_v49 }
 0x996   :  { %7076 = vmatprep.subr.bf16.mxu1 %v7017_v55 }
 0x998   :  { %7118 = vmatpush1.bf16.msra.mxu0 %v7018_v50 }
 0x999   :  { %7077 = vmatpush1.bf16.msra.mxu1 %v7016_v18  ;;  %7119 = vmatprep.subr.bf16.mxu0 %v7023_v52 }
 0x99a   :  { %7078 = vmatprep.subr.bf16.mxu1 %v7021_v51 }
 0x99c   :  { %7120 = vmatpush1.bf16.msra.mxu0 %v7022_v38 }
 0x99d   :  { %7079 = vmatpush1.bf16.msra.mxu1 %v7020_v22  ;;  %7121 = vmatprep.subr.bf16.mxu0 %v7027_v20 }
 0x99e   :  { %7080 = vmatprep.subr.bf16.mxu1 %v7025_v53 }
 0x9a0   :  { %7122 = vmatpush1.bf16.msra.mxu0 %v7026_v54 }
 0x9a1   :  { %7081 = vmatpush1.bf16.msra.mxu1 %v12395_v24 }
 0x9a3   :  { %7124 = vmatmul.mubr.bf16.vlgmr.msra.gmra.mrb[88].mxu0 %v6962_v36 }
 0x9a4   :  { %7083 = vmatmul.mubr.bf16.vlgmr.msra.gmra.mrb[84].mxu1 %v6962_v36 }
 0xa76   :  { %v7125_v41 = vpop.f32.mrb[88].mxu0 }
 0xa77   :  { %v7084_v63 = vpop.f32.mrb[84].mxu1  ;;  %v12410_v1 = vadd.f32 %v7125_v41, %v7041_v58  ;;  %v7127_v0 = vpop.f32.mrb[89].mxu0 }
 0xa78   :  { %v12408_v42 = vadd.f32 %v7084_v63, %v7033_v57  ;;  %v7086_v45 = vpop.f32.mrb[85].mxu1  ;;  %v7128_v7 = vadd.f32 %v7127_v0, %v7045_v61  ;;  %v7129_v11 = vpop.f32.mrb[90].mxu0 }
 0xa79   :  { %v7087_v62 = vadd.f32 %v7086_v45, %v7037_v59  ;;  %v7088_v12 = vpop.f32.mrb[86].mxu1  ;;  %v7134_v13 = vmax.f32 %v12410_v1, 0.0  ;;  %v7130_v3 = vpop.f32.mrb[91].mxu0 }
 0xa7a   :  { %v7132_v14 = vmax.f32 %v12408_v42, 0.0  ;;  %v7089_v5 = vpop.f32.mrb[87].mxu1  ;;  %v7135_v6 = vmax.f32 %v7128_v7, 0.0 }
 0xa7b   :  { %v7133_v4 = vmax.f32 %v7087_v62, 0.0 }
 0xa7c   :  { %7301 = vsyncadd [#allocation4], 4096 }
 0xa7d   :  { %10938 = dma.done.wait [#allocation4], 4096 }
 0xa7e   :  { %10939 = vsyncadd [#allocation4], 4294963200  ;;  %s12640_s25 = sld [smem:[#allocation51_spill]]  ;;  %v7307_v9 = vpack.c.bf16 %v7133_v4, %v7133_v4  ;;  %v7309_v10 = vpack.c.bf16 %v7135_v6, %v7135_v6  ;;  %v7318_v16 = vld [vmem:[#allocation3 + $0x100] sm:$0xff]  ;;  %s12641_s29 = sld [smem:[#allocation50_spill]]  ;;  %v7306_v54 = vpack.c.bf16 %v7132_v14, %v7132_v14  ;;  %v7308_v36 = vpack.c.bf16 %v7134_v13, %v7134_v13 }
 0xa7f   :  { %v7334_v44 = vld [vmem:[#allocation3 + $0x300] sm:$0xff]  ;;  %9809 = vmatprep.subr.bf16.mxu1 %v7318_v16 }
 0xa80   :  { %7381 = vmatprep.mubr.bf16.mxu1 %v7307_v9  ;;  %7421 = vmatprep.mubr.bf16.mxu0 %v7309_v10  ;;  %v7310_v18 = vld [vmem:[#allocation3] sm:$0xff] }
 0xa81   :  { %9831 = vmatprep.subr.bf16.mxu0 %v7334_v44  ;;  %v7326_v60 = vld [vmem:[#allocation3 + $0x200] sm:$0xff]  ;;  %9810 = vmatpush3.bf16.msra.mxu1 %v7310_v18 }
 0xa82   :  { %v7319_v22 = vld [vmem:[#allocation3 + $0x120] sm:$0xff]  ;;  %9832 = vmatpush3.bf16.msra.mxu0 %v7326_v60 }
 0xa83   :  { %v7335_v23 = vld [vmem:[#allocation3 + $0x320] sm:$0xff]  ;;  %9811 = vmatprep.subr.bf16.mxu1 %v7319_v22 }
 0xa84   :  { %v7477_v19 = vld [vmem:[%s12640_s25] sm:$0xf]  ;;  %9833 = vmatprep.subr.bf16.mxu0 %v7335_v23 }
 0xa85   :  { %7478 = vst [vmem:[#allocation3] sm:$0xf] %v7477_v19  ;;  %v7311_v24 = vld [vmem:[#allocation3 + $0x20] sm:$0xff]  ;;  %v9269_v57 = vld [vmem:[%s12641_s29] ss:$0 sm:$0xff] }
 0xa86   :  { %v7327_v25 = vld [vmem:[#allocation3 + $0x220] sm:$0xff]  ;;  %9812 = vmatpush3.bf16.msra.mxu1 %v7311_v24 }
 0xa87   :  { %v7320_v26 = vld [vmem:[#allocation3 + $0x140] sm:$0xff]  ;;  %9834 = vmatpush3.bf16.msra.mxu0 %v7327_v25 }
 0xa88   :  { %v7336_v8 = vld [vmem:[#allocation3 + $0x340] sm:$0xff]  ;;  %9813 = vmatprep.subr.bf16.mxu1 %v7320_v26 }
 0xa89   :  { %9835 = vmatprep.subr.bf16.mxu0 %v7336_v8  ;;  %v7312_v30 = vld [vmem:[#allocation3 + $0x40] sm:$0xff] }
 0xa8a   :  { %v7328_v31 = vld [vmem:[#allocation3 + $0x240] sm:$0xff]  ;;  %9814 = vmatpush3.bf16.msra.mxu1 %v7312_v30 }
 0xa8b   :  { %v7321_v47 = vld [vmem:[#allocation3 + $0x160] sm:$0xff]  ;;  %9836 = vmatpush3.bf16.msra.mxu0 %v7328_v31 }
 0xa8c   :  { %v7337_v37 = vld [vmem:[#allocation3 + $0x360] sm:$0xff]  ;;  %9815 = vmatprep.subr.bf16.mxu1 %v7321_v47 }
 0xa8d   :  { %9837 = vmatprep.subr.bf16.mxu0 %v7337_v37  ;;  %v7313_v27 = vld [vmem:[#allocation3 + $0x60] sm:$0xff] }
 0xa8e   :  { %v7329_v34 = vld [vmem:[#allocation3 + $0x260] sm:$0xff]  ;;  %9816 = vmatpush3.bf16.msra.mxu1 %v7313_v27 }
 0xa8f   :  { %v7322_v28 = vld [vmem:[#allocation3 + $0x180] sm:$0xff]  ;;  %9838 = vmatpush3.bf16.msra.mxu0 %v7329_v34 }
 0xa90   :  { %v7338_v35 = vld [vmem:[#allocation3 + $0x380] sm:$0xff]  ;;  %9817 = vmatprep.subr.bf16.mxu1 %v7322_v28 }
 0xa91   :  { %9839 = vmatprep.subr.bf16.mxu0 %v7338_v35  ;;  %v7314_v39 = vld [vmem:[#allocation3 + $0x80] sm:$0xff] }
 0xa92   :  { %v7330_v40 = vld [vmem:[#allocation3 + $0x280] sm:$0xff]  ;;  %9818 = vmatpush3.bf16.msra.mxu1 %v7314_v39 }
 0xa93   :  { %v7323_v43 = vld [vmem:[#allocation3 + $0x1a0] sm:$0xff]  ;;  %9840 = vmatpush3.bf16.msra.mxu0 %v7330_v40 }
 0xa94   :  { %v7339_v46 = vld [vmem:[#allocation3 + $0x3a0] sm:$0xff]  ;;  %9819 = vmatprep.subr.bf16.mxu1 %v7323_v43 }
 0xa95   :  { %9841 = vmatprep.subr.bf16.mxu0 %v7339_v46  ;;  %v7315_v48 = vld [vmem:[#allocation3 + $0xa0] sm:$0xff] }
 0xa96   :  { %v7331_v15 = vld [vmem:[#allocation3 + $0x2a0] sm:$0xff]  ;;  %9820 = vmatpush3.bf16.msra.mxu1 %v7315_v48 }
 0xa97   :  { %v7324_v55 = vld [vmem:[#allocation3 + $0x1c0] sm:$0xff]  ;;  %9842 = vmatpush3.bf16.msra.mxu0 %v7331_v15 }
 0xa98   :  { %v7340_v49 = vld [vmem:[#allocation3 + $0x3c0] sm:$0xff]  ;;  %9821 = vmatprep.subr.bf16.mxu1 %v7324_v55 }
 0xa99   :  { %9843 = vmatprep.subr.bf16.mxu0 %v7340_v49  ;;  %v7316_v50 = vld [vmem:[#allocation3 + $0xc0] sm:$0xff] }
 0xa9a   :  { %v7332_v51 = vld [vmem:[#allocation3 + $0x2c0] sm:$0xff]  ;;  %9822 = vmatpush3.bf16.msra.mxu1 %v7316_v50 }
 0xa9b   :  { %v7325_v52 = vld [vmem:[#allocation3 + $0x1e0] sm:$0xff]  ;;  %9844 = vmatpush3.bf16.msra.mxu0 %v7332_v51 }
 0xa9c   :  { %v7341_v38 = vld [vmem:[#allocation3 + $0x3e0] sm:$0xff]  ;;  %9823 = vmatprep.subr.bf16.mxu1 %v7325_v52 }
 0xa9d   :  { %9845 = vmatprep.subr.bf16.mxu0 %v7341_v38  ;;  %v7317_v53 = vld [vmem:[#allocation3 + $0xe0] sm:$0xff] }
 0xa9e   :  { %v7333_v20 = vld [vmem:[#allocation3 + $0x2e0] sm:$0xff]  ;;  %9824 = vmatpush3.bf16.msra.mxu1 %v7317_v53 }
 0xa9f   :  { %9846 = vmatpush3.bf16.msra.mxu0 %v7333_v20 }
 0xaa1   :  { %7382 = vmatmul.mubr.bf16.vlgmr.msra.gmra.mrb[88].mxu1 %v7306_v54 }
 0xaa2   :  { %7422 = vmatmul.mubr.bf16.vlgmr.msra.gmra.mrb[92].mxu0 %v7308_v36 }
 0xb74   :  { %v9825_v56 = vpop.f32.mrb[88].mxu1 }
 0xb75   :  { %v9847_v29 = vpop.f32.mrb[92].mxu0  ;;  %v9826_v58 = vpop.f32.mrb[89].mxu1 }
 0xb76   :  { %v9848_v59 = vpop.f32.mrb[93].mxu0  ;;  %v9827_v61 = vadd.f32 %v9826_v58, %v9825_v56  ;;  %v9828_v41 = vpop.f32.mrb[90].mxu1 }
 0xb77   :  { %v9849_v63 = vadd.f32 %v9848_v59, %v9847_v29  ;;  %v9850_v45 = vpop.f32.mrb[94].mxu0  ;;  %v9829_v42 = vpop.f32.mrb[91].mxu1 }
 0xb78   :  { %v9851_v0 = vpop.f32.mrb[95].mxu0  ;;  %v7384_v62 = vadd.f32 %v9827_v61, %v9269_v57 }
 0xb7a   :  { %v7424_v7 = vadd.f32 %v9849_v63, %v7384_v62 }
 0xb7c   :  { %7429 = vst [vmem:[#allocation9] sm:$0x3] %v7424_v7 }
 0xb7d   :  { %7503 = vsyncadd [#allocation4], 64 }
 0xb7e   :  { %10940 = dma.done.wait [#allocation4], 64 }
 0xb7f   :  { %10941 = vsyncadd [#allocation4], 4294967232  ;;  %s12642_s3 = sld [smem:[#allocation52_spill]]  ;;  %10318 = vmatprep.subr.bf16.mxu1 %v11001_v32  ;;  %10320 = vmatprep.mubr.msk.bf16.mxu1 %vm11002_vm1, %v11001_v32  ;;  %s12643_s8 = sld [smem:[#allocation59_spill]]  ;;  %v7506_v4 = vld [vmem:[#allocation3] sm:$0xf] }
 0xb80   :  { %v7515_v9 = vsel %vm5713_vm3, %v7506_v4, 0 }
 0xb81   :  { %10319 = vmatpush3.bf16.msra.mxu1 %v7515_v9 }
 0xb84   :  { %10321 = vmatmul.mubr.msk.bf16.vlgmr.msra.gmra.mrb[92].mxu1 %vm5709_vm4, %v12131_v33 }
 0xb85   :  { %v7606_v1 = vld [vmem:[%s12642_s3 + $0x8] sm:$0xff]  ;;  %v7608_v12 = vld [vmem:[%s12642_s3 + $0x10] sm:$0xff]  ;;  %v7610_v11 = vld [vmem:[%s12642_s3 + $0x18] sm:$0xff] }
 0xb86   :  { %7607 = vst [vmem:[#allocation3 + $0x20] sm:$0xff] %v7606_v1  ;;  %7609 = vst [vmem:[#allocation3 + $0x40] sm:$0xff] %v7608_v12  ;;  %v7612_v14 = vld [vmem:[%s12642_s3 + $0x20] sm:$0xff]  ;;  %v7614_v13 = vld [vmem:[%s12642_s3 + $0x28] sm:$0xff] }
 0xb87   :  { %7611 = vst [vmem:[#allocation3 + $0x60] sm:$0xff] %v7610_v11  ;;  %v7616_v5 = vld [vmem:[%s12642_s3 + $0x30] sm:$0xff]  ;;  %7613 = vst [vmem:[#allocation3 + $0x80] sm:$0xff] %v7612_v14  ;;  %v7618_v3 = vld [vmem:[%s12642_s3 + $0x38] sm:$0xff] }
 0xb88   :  { %7615 = vst [vmem:[#allocation3 + $0xa0] sm:$0xff] %v7614_v13  ;;  %7617 = vst [vmem:[#allocation3 + $0xc0] sm:$0xff] %v7616_v5  ;;  %v7604_v6 = vld [vmem:[%s12642_s3] sm:$0xff] }
 0xb89   :  { %7619 = vst [vmem:[#allocation3 + $0xe0] sm:$0xff] %v7618_v3  ;;  %7605 = vst [vmem:[#allocation3] sm:$0xff] %v7604_v6  ;;  %v9270_v10 = vld [vmem:[%s12643_s8] ss:$0 sm:$0xff] }
 0xc57   :  { %v7551_v16 = vpop.f32.mrb[92].mxu1 }
 0xc58   :  { %v7552_v44 = vadd.f32 %v9270_v10, %v7551_v16  ;;  %v10322_v18 = vpop.f32.mrb[93].mxu1 }
 0xc59   :  { %v7554_v19 = vpop.f32.mrb[94].mxu1 }
 0xc5a   :  { %v7557_v60 = vmax.f32 %v7552_v44, 0.0  ;;  %v10323_v22 = vpop.f32.mrb[95].mxu1 }
 0xc5b   :  { %7627 = vsyncadd [#allocation4], 1024 }
 0xc5c   :  { %10942 = dma.done.wait [#allocation4], 1024 }
 0xc5d   :  { %10943 = vsyncadd [#allocation4], 4294966272  ;;  %s12644_s14 = sld [smem:[#allocation53_spill]]  ;;  %10324 = vmatprep.subr.bf16.mxu0 %v11001_v32  ;;  %10340 = vmatprep.mubr.msk.bf16.mxu0 %vm11002_vm1, %v11001_v32  ;;  %v7631_v33 = vld [vmem:[#allocation3] sm:$0xff]  ;;  %s12645_s19 = sld [smem:[#allocation60_spill]]  ;;  %v7630_v43 = vpack.c.bf16 %v7557_v60, %v7557_v60 }
 0xc5e   :  { %v7632_v24 = vld [vmem:[#allocation3 + $0x20] sm:$0xff]  ;;  %10325 = vmatpush3.bf16.msra.mxu0 %v7631_v33 }
 0xc5f   :  { %v7633_v26 = vld [vmem:[#allocation3 + $0x40] sm:$0xff]  ;;  %10326 = vmatprep.subr.bf16.mxu0 %v11001_v32 }
 0xc60   :  { %v7634_v30 = vld [vmem:[#allocation3 + $0x60] sm:$0xff] }
 0xc61   :  { %v7635_v47 = vld [vmem:[#allocation3 + $0x80] sm:$0xff] }
 0xc62   :  { %v7636_v27 = vld [vmem:[#allocation3 + $0xa0] sm:$0xff]  ;;  %10327 = vmatpush3.bf16.msra.mxu0 %v7632_v24 }
 0xc63   :  { %v7733_v23 = vld [vmem:[%s12644_s14] sm:$0xff]  ;;  %v7735_v25 = vld [vmem:[%s12644_s14 + $0x8] sm:$0xff]  ;;  %v7737_v8 = vld [vmem:[%s12644_s14 + $0x10] sm:$0xff]  ;;  %10328 = vmatprep.subr.bf16.mxu0 %v11001_v32 }
 0xc64   :  { %7734 = vst [vmem:[#allocation3] sm:$0xff] %v7733_v23  ;;  %7736 = vst [vmem:[#allocation3 + $0x20] sm:$0xff] %v7735_v25  ;;  %v7739_v31 = vld [vmem:[%s12644_s14 + $0x18] sm:$0xff]  ;;  %v7741_v37 = vld [vmem:[%s12644_s14 + $0x20] sm:$0xff] }
 0xc65   :  { %7738 = vst [vmem:[#allocation3 + $0x40] sm:$0xff] %v7737_v8  ;;  %7740 = vst [vmem:[#allocation3 + $0x60] sm:$0xff] %v7739_v31  ;;  %v7743_v34 = vld [vmem:[%s12644_s14 + $0x28] sm:$0xff]  ;;  %v7745_v35 = vld [vmem:[%s12644_s14 + $0x30] sm:$0xff] }
 0xc66   :  { %7742 = vst [vmem:[#allocation3 + $0x80] sm:$0xff] %v7741_v37  ;;  %7744 = vst [vmem:[#allocation3 + $0xa0] sm:$0xff] %v7743_v34  ;;  %v7637_v28 = vld [vmem:[#allocation3 + $0xc0] sm:$0xff]  ;;  %v7747_v40 = vld [vmem:[%s12644_s14 + $0x38] sm:$0xff]  ;;  %10329 = vmatpush3.bf16.msra.mxu0 %v7633_v26 }
 0xc67   :  { %7746 = vst [vmem:[#allocation3 + $0xc0] sm:$0xff] %v7745_v35  ;;  %v7638_v39 = vld [vmem:[#allocation3 + $0xe0] sm:$0xff]  ;;  %10330 = vmatprep.subr.bf16.mxu0 %v11001_v32  ;;  %v9272_v46 = vld [vmem:[%s12645_s19] ss:$0 sm:$0xff] }
 0xc68   :  { %7748 = vst [vmem:[#allocation3 + $0xe0] sm:$0xff] %v7747_v40 }
 0xc6a   :  { %10331 = vmatpush3.bf16.msra.mxu0 %v7634_v30 }
 0xc6b   :  { %10332 = vmatprep.subr.bf16.mxu0 %v11001_v32 }
 0xc6e   :  { %10333 = vmatpush3.bf16.msra.mxu0 %v7635_v47 }
 0xc6f   :  { %10334 = vmatprep.subr.bf16.mxu0 %v11001_v32 }
 0xc72   :  { %10335 = vmatpush3.bf16.msra.mxu0 %v7636_v27 }
 0xc73   :  { %10336 = vmatprep.subr.bf16.mxu0 %v11001_v32 }
 0xc76   :  { %10337 = vmatpush3.bf16.msra.mxu0 %v7637_v28 }
 0xc77   :  { %10338 = vmatprep.subr.bf16.mxu0 %v11001_v32 }
 0xc7a   :  { %10339 = vmatpush3.bf16.msra.mxu0 %v7638_v39 }
 0xc7d   :  { %10341 = vmatmul.mubr.bf16.vlgmr.msra.gmra.mrb[96].mxu0 %v7630_v43 }
 0xd50   :  { %v7680_v48 = vpop.f32.mrb[96].mxu0 }
 0xd51   :  { %v7681_v15 = vadd.f32 %v9272_v46, %v7680_v48  ;;  %v10342_v55 = vpop.f32.mrb[97].mxu0 }
 0xd52   :  { %v7683_v49 = vpop.f32.mrb[98].mxu0 }
 0xd53   :  { %v7686_v50 = vmax.f32 %v7681_v15, 0.0  ;;  %v10343_v51 = vpop.f32.mrb[99].mxu0 }
 0xd54   :  { %7756 = vsyncadd [#allocation4], 1024 }
 0xd55   :  { %10944 = dma.done.wait [#allocation4], 1024 }
 0xd56   :  { %10945 = vsyncadd [#allocation4], 4294966272  ;;  %s12646_s12 = sld [smem:[#allocation54_spill]]  ;;  %10344 = vmatprep.subr.bf16.mxu1 %v11001_v32  ;;  %10360 = vmatprep.mubr.msk.bf16.mxu1 %vm11002_vm1, %v11001_v32  ;;  %v7760_v52 = vld [vmem:[#allocation3] sm:$0xff]  ;;  %s12647_s20 = sld [smem:[#allocation61_spill]]  ;;  %v7759_v0 = vpack.c.bf16 %v7686_v50, %v7686_v50 }
 0xd57   :  { %v7761_v53 = vld [vmem:[#allocation3 + $0x20] sm:$0xff]  ;;  %10345 = vmatpush3.bf16.msra.mxu1 %v7760_v52 }
 0xd58   :  { %v7762_v54 = vld [vmem:[#allocation3 + $0x40] sm:$0xff]  ;;  %10346 = vmatprep.subr.bf16.mxu1 %v11001_v32 }
 0xd59   :  { %v7763_v56 = vld [vmem:[#allocation3 + $0x60] sm:$0xff] }
 0xd5a   :  { %v7764_v57 = vld [vmem:[#allocation3 + $0x80] sm:$0xff] }
 0xd5b   :  { %v7765_v59 = vld [vmem:[#allocation3 + $0xa0] sm:$0xff]  ;;  %10347 = vmatpush3.bf16.msra.mxu1 %v7761_v53 }
 0xd5c   :  { %v7862_v38 = vld [vmem:[%s12646_s12] sm:$0xff]  ;;  %v7864_v20 = vld [vmem:[%s12646_s12 + $0x8] sm:$0xff]  ;;  %v7866_v36 = vld [vmem:[%s12646_s12 + $0x10] sm:$0xff]  ;;  %10348 = vmatprep.subr.bf16.mxu1 %v11001_v32 }
 0xd5d   :  { %7863 = vst [vmem:[#allocation3] sm:$0xff] %v7862_v38  ;;  %7865 = vst [vmem:[#allocation3 + $0x20] sm:$0xff] %v7864_v20  ;;  %v7868_v29 = vld [vmem:[%s12646_s12 + $0x18] sm:$0xff]  ;;  %v7870_v58 = vld [vmem:[%s12646_s12 + $0x20] sm:$0xff] }
 0xd5e   :  { %7867 = vst [vmem:[#allocation3 + $0x40] sm:$0xff] %v7866_v36  ;;  %7869 = vst [vmem:[#allocation3 + $0x60] sm:$0xff] %v7868_v29  ;;  %v7872_v61 = vld [vmem:[%s12646_s12 + $0x28] sm:$0xff]  ;;  %v7874_v41 = vld [vmem:[%s12646_s12 + $0x30] sm:$0xff] }
 0xd5f   :  { %7871 = vst [vmem:[#allocation3 + $0x80] sm:$0xff] %v7870_v58  ;;  %7873 = vst [vmem:[#allocation3 + $0xa0] sm:$0xff] %v7872_v61  ;;  %v7766_v63 = vld [vmem:[#allocation3 + $0xc0] sm:$0xff]  ;;  %v7876_v42 = vld [vmem:[%s12646_s12 + $0x38] sm:$0xff]  ;;  %10349 = vmatpush3.bf16.msra.mxu1 %v7762_v54 }
 0xd60   :  { %7875 = vst [vmem:[#allocation3 + $0xc0] sm:$0xff] %v7874_v41  ;;  %v7767_v45 = vld [vmem:[#allocation3 + $0xe0] sm:$0xff]  ;;  %10350 = vmatprep.subr.bf16.mxu1 %v11001_v32  ;;  %v9273_v62 = vld [vmem:[%s12647_s20] ss:$0 sm:$0xff] }
 0xd61   :  { %7877 = vst [vmem:[#allocation3 + $0xe0] sm:$0xff] %v7876_v42 }
 0xd63   :  { %10351 = vmatpush3.bf16.msra.mxu1 %v7763_v56 }
 0xd64   :  { %10352 = vmatprep.subr.bf16.mxu1 %v11001_v32 }
 0xd67   :  { %10353 = vmatpush3.bf16.msra.mxu1 %v7764_v57 }
 0xd68   :  { %10354 = vmatprep.subr.bf16.mxu1 %v11001_v32 }
 0xd6b   :  { %10355 = vmatpush3.bf16.msra.mxu1 %v7765_v59 }
 0xd6c   :  { %10356 = vmatprep.subr.bf16.mxu1 %v11001_v32 }
 0xd6f   :  { %10357 = vmatpush3.bf16.msra.mxu1 %v7766_v63 }
 0xd70   :  { %10358 = vmatprep.subr.bf16.mxu1 %v11001_v32 }
 0xd73   :  { %10359 = vmatpush3.bf16.msra.mxu1 %v7767_v45 }
 0xd76   :  { %10361 = vmatmul.mubr.bf16.vlgmr.msra.gmra.mrb[96].mxu1 %v7759_v0 }
 0xe49   :  { %v7809_v7 = vpop.f32.mrb[96].mxu1 }
 0xe4a   :  { %v12475_v1 = vadd.f32 %v9273_v62, %v7809_v7  ;;  %v10362_v12 = vpop.f32.mrb[97].mxu1 }
 0xe4b   :  { %v7812_v11 = vpop.f32.mrb[98].mxu1 }
 0xe4c   :  { %v7815_v14 = vmax.f32 %v12475_v1, 0.0  ;;  %v10363_v13 = vpop.f32.mrb[99].mxu1 }
 0xe4d   :  { %7885 = vsyncadd [#allocation4], 1024 }
 0xe4e   :  { %10946 = dma.done.wait [#allocation4], 1024 }
 0xe4f   :  { %10947 = vsyncadd [#allocation4], 4294966272  ;;  %s12648_s27 = sld [smem:[#allocation55_spill]]  ;;  %10364 = vmatprep.subr.bf16.mxu0 %v11001_v32  ;;  %10380 = vmatprep.mubr.msk.bf16.mxu0 %vm11002_vm1, %v11001_v32  ;;  %v7889_v26 = vld [vmem:[#allocation3] sm:$0xff]  ;;  %s12649_s22 = sld [smem:[#allocation62_spill]]  ;;  %v7888_v54 = vpack.c.bf16 %v7815_v14, %v7815_v14 }
 0xe50   :  { %10365 = vmatpush3.bf16.msra.mxu0 %v7889_v26  ;;  %v7890_v31 = vld [vmem:[#allocation3 + $0x20] sm:$0xff] }
 0xe51   :  { %10366 = vmatprep.subr.bf16.mxu0 %v11001_v32  ;;  %v7891_v27 = vld [vmem:[#allocation3 + $0x40] sm:$0xff] }
 0xe52   :  { %v7892_v35 = vld [vmem:[#allocation3 + $0x60] sm:$0xff] }
 0xe53   :  { %v7893_v43 = vld [vmem:[#allocation3 + $0x80] sm:$0xff] }
 0xe54   :  { %10367 = vmatpush3.bf16.msra.mxu0 %v7890_v31  ;;  %v7894_v15 = vld [vmem:[#allocation3 + $0xa0] sm:$0xff] }
 0xe55   :  { %v7966_v5 = vld [vmem:[%s12648_s27 + $0x4] sm:$0xf]  ;;  %v7968_v3 = vld [vmem:[%s12648_s27 + $0xc] sm:$0xf]  ;;  %v7974_v4 = vld [vmem:[%s12648_s27 + $0x14] sm:$0xf]  ;;  %10368 = vmatprep.subr.bf16.mxu0 %v11001_v32 }
 0xe56   :  { %7967 = vst [vmem:[#allocation3 + $0x8] sm:$0xf] %v7966_v5  ;;  %7969 = vst [vmem:[#allocation3 + $0xc] sm:$0xf] %v7968_v3  ;;  %v7976_v6 = vld [vmem:[%s12648_s27 + $0x1c] sm:$0xf] }
 0xe57   :  { %7975 = vst [vmem:[#allocation3 + $0x28] sm:$0xf] %v7974_v4  ;;  %v7982_v9 = vld [vmem:[%s12648_s27 + $0x24] sm:$0xf]  ;;  %v7984_v10 = vld [vmem:[%s12648_s27 + $0x2c] sm:$0xf] }
 0xe58   :  { %7977 = vst [vmem:[#allocation3 + $0x2c] sm:$0xf] %v7976_v6  ;;  %7983 = vst [vmem:[#allocation3 + $0x48] sm:$0xf] %v7982_v9  ;;  %v7990_v16 = vld [vmem:[%s12648_s27 + $0x34] sm:$0xf]  ;;  %10369 = vmatpush3.bf16.msra.mxu0 %v7891_v27 }
 0xe59   :  { %7985 = vst [vmem:[#allocation3 + $0x4c] sm:$0xf] %v7984_v10  ;;  %v7992_v44 = vld [vmem:[%s12648_s27 + $0x3c] sm:$0xf]  ;;  %v7998_v18 = vld [vmem:[%s12648_s27 + $0x44] sm:$0xf]  ;;  %10370 = vmatprep.subr.bf16.mxu0 %v11001_v32 }
 0xe5a   :  { %7991 = vst [vmem:[#allocation3 + $0x68] sm:$0xf] %v7990_v16  ;;  %7993 = vst [vmem:[#allocation3 + $0x6c] sm:$0xf] %v7992_v44  ;;  %v8000_v19 = vld [vmem:[%s12648_s27 + $0x4c] sm:$0xf] }
 0xe5b   :  { %7999 = vst [vmem:[#allocation3 + $0x88] sm:$0xf] %v7998_v18  ;;  %v8006_v60 = vld [vmem:[%s12648_s27 + $0x54] sm:$0xf]  ;;  %v8008_v22 = vld [vmem:[%s12648_s27 + $0x5c] sm:$0xf] }
 0xe5c   :  { %8001 = vst [vmem:[#allocation3 + $0x8c] sm:$0xf] %v8000_v19  ;;  %8007 = vst [vmem:[#allocation3 + $0xa8] sm:$0xf] %v8006_v60  ;;  %v8014_v33 = vld [vmem:[%s12648_s27 + $0x64] sm:$0xf]  ;;  %10371 = vmatpush3.bf16.msra.mxu0 %v7892_v35 }
 0xe5d   :  { %8009 = vst [vmem:[#allocation3 + $0xac] sm:$0xf] %v8008_v22  ;;  %v8016_v23 = vld [vmem:[%s12648_s27 + $0x6c] sm:$0xf]  ;;  %v8022_v24 = vld [vmem:[%s12648_s27 + $0x74] sm:$0xf]  ;;  %10372 = vmatprep.subr.bf16.mxu0 %v11001_v32 }
 0xe5e   :  { %8015 = vst [vmem:[#allocation3 + $0xc8] sm:$0xf] %v8014_v33  ;;  %8017 = vst [vmem:[#allocation3 + $0xcc] sm:$0xf] %v8016_v23  ;;  %v8024_v25 = vld [vmem:[%s12648_s27 + $0x7c] sm:$0xf] }
 0xe5f   :  { %8023 = vst [vmem:[#allocation3 + $0xe8] sm:$0xf] %v8022_v24  ;;  %v7962_v8 = vld [vmem:[%s12648_s27] sm:$0xf]  ;;  %8025 = vst [vmem:[#allocation3 + $0xec] sm:$0xf] %v8024_v25 }
 0xe60   :  { %7963 = vst [vmem:[#allocation3] sm:$0xf] %v7962_v8  ;;  %v7964_v30 = vld [vmem:[%s12648_s27 + $0x8] sm:$0xf]  ;;  %v7970_v47 = vld [vmem:[%s12648_s27 + $0x10] sm:$0xf]  ;;  %10373 = vmatpush3.bf16.msra.mxu0 %v7893_v43 }
 0xe61   :  { %7965 = vst [vmem:[#allocation3 + $0x4] sm:$0xf] %v7964_v30  ;;  %7971 = vst [vmem:[#allocation3 + $0x20] sm:$0xf] %v7970_v47  ;;  %v7972_v37 = vld [vmem:[%s12648_s27 + $0x18] sm:$0xf]  ;;  %10374 = vmatprep.subr.bf16.mxu0 %v11001_v32 }
 0xe62   :  { %v7978_v34 = vld [vmem:[%s12648_s27 + $0x20] sm:$0xf]  ;;  %7973 = vst [vmem:[#allocation3 + $0x24] sm:$0xf] %v7972_v37  ;;  %v7980_v28 = vld [vmem:[%s12648_s27 + $0x28] sm:$0xf] }
 0xe63   :  { %7979 = vst [vmem:[#allocation3 + $0x40] sm:$0xf] %v7978_v34  ;;  %v7986_v39 = vld [vmem:[%s12648_s27 + $0x30] sm:$0xf]  ;;  %7981 = vst [vmem:[#allocation3 + $0x44] sm:$0xf] %v7980_v28 }
 0xe64   :  { %7987 = vst [vmem:[#allocation3 + $0x60] sm:$0xf] %v7986_v39  ;;  %v7988_v40 = vld [vmem:[%s12648_s27 + $0x38] sm:$0xf]  ;;  %v7994_v46 = vld [vmem:[%s12648_s27 + $0x40] sm:$0xf]  ;;  %10375 = vmatpush3.bf16.msra.mxu0 %v7894_v15 }
 0xe65   :  { %7989 = vst [vmem:[#allocation3 + $0x64] sm:$0xf] %v7988_v40  ;;  %7995 = vst [vmem:[#allocation3 + $0x80] sm:$0xf] %v7994_v46  ;;  %v7996_v48 = vld [vmem:[%s12648_s27 + $0x48] sm:$0xf]  ;;  %10376 = vmatprep.subr.bf16.mxu0 %v11001_v32 }
 0xe66   :  { %v8002_v55 = vld [vmem:[%s12648_s27 + $0x50] sm:$0xf]  ;;  %7997 = vst [vmem:[#allocation3 + $0x84] sm:$0xf] %v7996_v48  ;;  %v8004_v49 = vld [vmem:[%s12648_s27 + $0x58] sm:$0xf] }
 0xe67   :  { %8003 = vst [vmem:[#allocation3 + $0xa0] sm:$0xf] %v8002_v55  ;;  %v7895_v50 = vld [vmem:[#allocation3 + $0xc0] sm:$0xff]  ;;  %8005 = vst [vmem:[#allocation3 + $0xa4] sm:$0xf] %v8004_v49 }
 0xe68   :  { %v8010_v51 = vld [vmem:[%s12648_s27 + $0x60] sm:$0xf]  ;;  %v8012_v52 = vld [vmem:[%s12648_s27 + $0x68] sm:$0xf]  ;;  %v8018_v53 = vld [vmem:[%s12648_s27 + $0x70] sm:$0xf]  ;;  %10377 = vmatpush3.bf16.msra.mxu0 %v7895_v50 }
 0xe69   :  { %8011 = vst [vmem:[#allocation3 + $0xc0] sm:$0xf] %v8010_v51  ;;  %v7896_v38 = vld [vmem:[#allocation3 + $0xe0] sm:$0xff]  ;;  %8013 = vst [vmem:[#allocation3 + $0xc4] sm:$0xf] %v8012_v52  ;;  %10378 = vmatprep.subr.bf16.mxu0 %v11001_v32 }
 0xe6a   :  { %8019 = vst [vmem:[#allocation3 + $0xe0] sm:$0xf] %v8018_v53  ;;  %v8020_v20 = vld [vmem:[%s12648_s27 + $0x78] sm:$0xf]  ;;  %v9274_v36 = vld [vmem:[%s12649_s22] ss:$0 sm:$0xff] }
 0xe6b   :  { %8021 = vst [vmem:[#allocation3 + $0xe4] sm:$0xf] %v8020_v20 }
 0xe6c   :  { %10379 = vmatpush3.bf16.msra.mxu0 %v7896_v38 }
 0xe6f   :  { %10381 = vmatmul.mubr.bf16.vlgmr.msra.gmra.mrb[100].mxu0 %v7888_v54 }
 0xf42   :  { %v7938_v56 = vpop.f32.mrb[100].mxu0 }
 0xf43   :  { %v12524_v29 = vadd.f32 %v9274_v36, %v7938_v56  ;;  %v10382_v57 = vpop.f32.mrb[101].mxu0 }
 0xf44   :  { %v7941_v58 = vpop.f32.mrb[102].mxu0 }
 0xf45   :  { %v7944_v59 = vmax.f32 %v12524_v29, 0.0  ;;  %v10383_v61 = vpop.f32.mrb[103].mxu0 }
 0xf46   :  { %8120 = vsyncadd [#allocation4], 2048 }
 0xf47   :  { %10948 = dma.done.wait [#allocation4], 2048 }
 0xf48   :  { %10949 = vsyncadd [#allocation4], 4294965248  ;;  %s12650_s23 = sld [smem:[#allocation56_spill]]  ;;  %8184 = vmatprep.mubr.bf16.mxu1 %v10999_v2  ;;  %v8125_v12 = vld [vmem:[#allocation3 + $0x8] sm:$0xff]  ;;  %v8124_v2 = vld [vmem:[#allocation3] sm:$0xff]  ;;  %s12651_s26 = sld [smem:[#allocation63_spill]]  ;;  %v8123_v31 = vpack.c.bf16 %v7944_v59, %v7944_v59 }
 0xf49   :  { %8152 = vmatprep.subr.bf16.mxu1 %v8125_v12  ;;  %v8127_v14 = vld [vmem:[#allocation3 + $0x28] sm:$0xff]  ;;  %v8126_v13 = vld [vmem:[#allocation3 + $0x20] sm:$0xff] }
 0xf4a   :  { %8153 = vmatpush1.bf16.msra.mxu1 %v8124_v2  ;;  %v8128_v3 = vld [vmem:[#allocation3 + $0x40] sm:$0xff]  ;;  %v8129_v6 = vld [vmem:[#allocation3 + $0x48] sm:$0xff] }
 0xf4b   :  { %8154 = vmatprep.subr.bf16.mxu1 %v8127_v14  ;;  %v8130_v9 = vld [vmem:[#allocation3 + $0x60] sm:$0xff]  ;;  %v8131_v33 = vld [vmem:[#allocation3 + $0x68] sm:$0xff] }
 0xf4c   :  { %v8132_v16 = vld [vmem:[#allocation3 + $0x80] sm:$0xff]  ;;  %v8133_v25 = vld [vmem:[#allocation3 + $0x88] sm:$0xff] }
 0xf4d   :  { %v8134_v18 = vld [vmem:[#allocation3 + $0xa0] sm:$0xff]  ;;  %v8135_v26 = vld [vmem:[#allocation3 + $0xa8] sm:$0xff] }
 0xf4e   :  { %v8273_v63 = vld [vmem:[%s12650_s23 + $0x40] sm:$0xff]  ;;  %v8275_v41 = vld [vmem:[%s12650_s23 + $0x48] sm:$0xff]  ;;  %v8277_v45 = vld [vmem:[%s12650_s23 + $0x50] sm:$0xff]  ;;  %8155 = vmatpush1.bf16.msra.mxu1 %v8126_v13 }
 0xf4f   :  { %8274 = vst [vmem:[#allocation3 + $0x100] sm:$0xff] %v8273_v63  ;;  %8276 = vst [vmem:[#allocation3 + $0x120] sm:$0xff] %v8275_v41  ;;  %v8279_v42 = vld [vmem:[%s12650_s23 + $0x58] sm:$0xff]  ;;  %v8281_v0 = vld [vmem:[%s12650_s23 + $0x60] sm:$0xff]  ;;  %8156 = vmatprep.subr.bf16.mxu1 %v8129_v6 }
 0xf50   :  { %8278 = vst [vmem:[#allocation3 + $0x140] sm:$0xff] %v8277_v45  ;;  %v8283_v62 = vld [vmem:[%s12650_s23 + $0x68] sm:$0xff]  ;;  %8280 = vst [vmem:[#allocation3 + $0x160] sm:$0xff] %v8279_v42  ;;  %v8285_v7 = vld [vmem:[%s12650_s23 + $0x70] sm:$0xff] }
 0xf51   :  { %8282 = vst [vmem:[#allocation3 + $0x180] sm:$0xff] %v8281_v0  ;;  %8284 = vst [vmem:[#allocation3 + $0x1a0] sm:$0xff] %v8283_v62  ;;  %v8287_v1 = vld [vmem:[%s12650_s23 + $0x78] sm:$0xff]  ;;  %v8257_v11 = vld [vmem:[%s12650_s23] sm:$0xff] }
 0xf52   :  { %8286 = vst [vmem:[#allocation3 + $0x1c0] sm:$0xff] %v8285_v7  ;;  %8288 = vst [vmem:[#allocation3 + $0x1e0] sm:$0xff] %v8287_v1  ;;  %v8259_v5 = vld [vmem:[%s12650_s23 + $0x8] sm:$0xff]  ;;  %v8261_v4 = vld [vmem:[%s12650_s23 + $0x10] sm:$0xff]  ;;  %8157 = vmatpush1.bf16.msra.mxu1 %v8128_v3 }
 0xf53   :  { %8258 = vst [vmem:[#allocation3] sm:$0xff] %v8257_v11  ;;  %8260 = vst [vmem:[#allocation3 + $0x20] sm:$0xff] %v8259_v5  ;;  %v8263_v10 = vld [vmem:[%s12650_s23 + $0x18] sm:$0xff]  ;;  %v8265_v44 = vld [vmem:[%s12650_s23 + $0x20] sm:$0xff]  ;;  %8158 = vmatprep.subr.bf16.mxu1 %v8131_v33 }
 0xf54   :  { %8262 = vst [vmem:[#allocation3 + $0x40] sm:$0xff] %v8261_v4  ;;  %8264 = vst [vmem:[#allocation3 + $0x60] sm:$0xff] %v8263_v10  ;;  %v8267_v19 = vld [vmem:[%s12650_s23 + $0x28] sm:$0xff]  ;;  %v8269_v22 = vld [vmem:[%s12650_s23 + $0x30] sm:$0xff] }
 0xf55   :  { %8266 = vst [vmem:[#allocation3 + $0x80] sm:$0xff] %v8265_v44  ;;  %8268 = vst [vmem:[#allocation3 + $0xa0] sm:$0xff] %v8267_v19  ;;  %v8136_v60 = vld [vmem:[#allocation3 + $0xc0] sm:$0xff]  ;;  %v8271_v24 = vld [vmem:[%s12650_s23 + $0x38] sm:$0xff] }
 0xf56   :  { %8270 = vst [vmem:[#allocation3 + $0xc0] sm:$0xff] %v8269_v22  ;;  %v8138_v23 = vld [vmem:[#allocation3 + $0xe0] sm:$0xff]  ;;  %8159 = vmatpush1.bf16.msra.mxu1 %v8130_v9  ;;  %v8137_v8 = vld [vmem:[#allocation3 + $0xc8] sm:$0xff]  ;;  %v8140_v47 = vld [vmem:[%s12651_s26] sm:$0x3] }
 0xf57   :  { %8272 = vst [vmem:[#allocation3 + $0xe0] sm:$0xff] %v8271_v24  ;;  %8160 = vmatprep.subr.bf16.mxu1 %v8133_v25  ;;  %v8139_v30 = vld [vmem:[#allocation3 + $0xe8] sm:$0xff]  ;;  %v8145_v37 = vrot.slane %v8140_v47, %v11328_v17  ;;  %v8149_v27 = vrot.slane %v8140_v47, %v11331_v21 }
 0xf5a   :  { %8161 = vmatpush1.bf16.msra.mxu1 %v8132_v16 }
 0xf5b   :  { %8162 = vmatprep.subr.bf16.mxu1 %v8135_v26 }
 0xf5e   :  { %8163 = vmatpush1.bf16.msra.mxu1 %v8134_v18 }
 0xf5f   :  { %8164 = vmatprep.subr.bf16.mxu1 %v8137_v8 }
 0xf62   :  { %8165 = vmatpush1.bf16.msra.mxu1 %v8136_v60 }
 0xf63   :  { %8166 = vmatprep.subr.bf16.mxu1 %v8139_v30 }
 0xf66   :  { %8167 = vmatpush1.bf16.msra.mxu1 %v8138_v23 }
 0xf69   :  { %8185 = vmatmul.mubr.bf16.vlgmr.msra.gmra.mrb[100].mxu1 %v8123_v31 }
0x103c   :  { %v8186_v34 = vpop.f32.mrb[100].mxu1 }
0x103d   :  { %v8187_v28 = vadd.f32 %v8186_v34, %v8145_v37  ;;  %v8188_v35 = vpop.f32.mrb[101].mxu1 }
0x103e   :  { %v8189_v39 = vadd.f32 %v8188_v35, %v8149_v27  ;;  %v8190_v40 = vpop.f32.mrb[102].mxu1 }
0x103f   :  { %v8193_v43 = vmax.f32 %v8187_v28, 0.0  ;;  %v8191_v46 = vpop.f32.mrb[103].mxu1 }
0x1040   :  { %v8194_v48 = vmax.f32 %v8189_v39, 0.0 }
0x1041   :  { %8296 = vsyncadd [#allocation4], 2048 }
0x1042   :  { %10950 = dma.done.wait [#allocation4], 2048 }
0x1043   :  { %10951 = vsyncadd [#allocation4], 4294965248  ;;  %s12652_s28 = sld [smem:[#allocation57_spill]]  ;;  %v8301_v15 = vpack.c.bf16 %v8194_v48, %v8194_v48  ;;  %v8310_v17 = vld [vmem:[#allocation3 + $0x100] sm:$0xff]  ;;  %s12653_s1 = sld [smem:[#allocation64_spill]]  ;;  %v8300_v7 = vpack.c.bf16 %v8193_v43, %v8193_v43 }
0x1044   :  { %v8302_v55 = vld [vmem:[#allocation3] sm:$0xff]  ;;  %9882 = vmatprep.subr.bf16.mxu0 %v8310_v17 }
0x1045   :  { %8357 = vmatprep.mubr.bf16.mxu0 %v8301_v15  ;;  %v8311_v49 = vld [vmem:[#allocation3 + $0x120] sm:$0xff]  ;;  %9883 = vmatpush3.bf16.msra.mxu0 %v8302_v55 }
0x1046   :  { %v8303_v50 = vld [vmem:[#allocation3 + $0x20] sm:$0xff]  ;;  %9884 = vmatprep.subr.bf16.mxu0 %v8311_v49 }
0x1047   :  { %v8304_v52 = vld [vmem:[#allocation3 + $0x40] sm:$0xff] }
0x1048   :  { %v8305_v53 = vld [vmem:[#allocation3 + $0x60] sm:$0xff] }
0x1049   :  { %v8412_v21 = vld [vmem:[%s12652_s28] sm:$0xff]  ;;  %v8414_v51 = vld [vmem:[%s12652_s28 + $0x8] sm:$0xff]  ;;  %v8416_v38 = vld [vmem:[%s12652_s28 + $0x10] sm:$0xff]  ;;  %9885 = vmatpush3.bf16.msra.mxu0 %v8303_v50 }
0x104a   :  { %8413 = vst [vmem:[#allocation3] sm:$0xff] %v8412_v21  ;;  %8415 = vst [vmem:[#allocation3 + $0x20] sm:$0xff] %v8414_v51  ;;  %v8418_v20 = vld [vmem:[%s12652_s28 + $0x18] sm:$0xff]  ;;  %v8312_v54 = vld [vmem:[#allocation3 + $0x140] sm:$0xff] }
0x104b   :  { %8417 = vst [vmem:[#allocation3 + $0x40] sm:$0xff] %v8416_v38  ;;  %8419 = vst [vmem:[#allocation3 + $0x60] sm:$0xff] %v8418_v20  ;;  %v8306_v36 = vld [vmem:[#allocation3 + $0x80] sm:$0xff]  ;;  %v8424_v59 = vld [vmem:[%s12652_s28 + $0x30] sm:$0xff]  ;;  %9886 = vmatprep.subr.bf16.mxu0 %v8312_v54 }
0x104c   :  { %v8420_v56 = vld [vmem:[%s12652_s28 + $0x20] sm:$0xff]  ;;  %v8422_v57 = vld [vmem:[%s12652_s28 + $0x28] sm:$0xff]  ;;  %v8426_v63 = vld [vmem:[%s12652_s28 + $0x38] sm:$0xff] }
0x104d   :  { %8421 = vst [vmem:[#allocation3 + $0x80] sm:$0xff] %v8420_v56  ;;  %v8307_v29 = vld [vmem:[#allocation3 + $0xa0] sm:$0xff]  ;;  %9887 = vmatpush3.bf16.msra.mxu0 %v8304_v52  ;;  %v9275_v12 = vld [vmem:[%s12653_s1] ss:$0 sm:$0xff] }
0x104e   :  { %8423 = vst [vmem:[#allocation3 + $0xa0] sm:$0xff] %v8422_v57  ;;  %v8308_v58 = vld [vmem:[#allocation3 + $0xc0] sm:$0xff] }
0x104f   :  { %8425 = vst [vmem:[#allocation3 + $0xc0] sm:$0xff] %v8424_v59  ;;  %v8309_v61 = vld [vmem:[#allocation3 + $0xe0] sm:$0xff] }
0x1050   :  { %v8313_v41 = vld [vmem:[#allocation3 + $0x160] sm:$0xff]  ;;  %8427 = vst [vmem:[#allocation3 + $0xe0] sm:$0xff] %v8426_v63 }
0x1051   :  { %9888 = vmatprep.subr.bf16.mxu0 %v8313_v41  ;;  %v8314_v45 = vld [vmem:[#allocation3 + $0x180] sm:$0xff] }
0x1052   :  { %9889 = vmatpush3.bf16.msra.mxu0 %v8305_v53  ;;  %v8315_v42 = vld [vmem:[#allocation3 + $0x1a0] sm:$0xff] }
0x1053   :  { %9890 = vmatprep.subr.bf16.mxu0 %v8314_v45  ;;  %v8316_v0 = vld [vmem:[#allocation3 + $0x1c0] sm:$0xff] }
0x1054   :  { %v8317_v62 = vld [vmem:[#allocation3 + $0x1e0] sm:$0xff] }
0x1056   :  { %9891 = vmatpush3.bf16.msra.mxu0 %v8306_v36 }
0x1057   :  { %9892 = vmatprep.subr.bf16.mxu0 %v8315_v42 }
0x105a   :  { %9893 = vmatpush3.bf16.msra.mxu0 %v8307_v29 }
0x105b   :  { %9894 = vmatprep.subr.bf16.mxu0 %v8316_v0 }
0x105e   :  { %9895 = vmatpush3.bf16.msra.mxu0 %v8308_v58 }
0x105f   :  { %9896 = vmatprep.subr.bf16.mxu0 %v8317_v62 }
0x1062   :  { %9897 = vmatpush3.bf16.msra.mxu0 %v8309_v61 }
0x1065   :  { %8358 = vmatmul.mubr.bf16.vlgmr.msra.gmra.mrb[104].mxu0 %v8300_v7 }
0x1138   :  { %v9898_v1 = vpop.f32.mrb[104].mxu0 }
0x1139   :  { %v9899_v2 = vpop.f32.mrb[105].mxu0 }
0x113a   :  { %v9900_v11 = vadd.f32 %v9899_v2, %v9898_v1  ;;  %v9901_v14 = vpop.f32.mrb[106].mxu0 }
0x113b   :  { %v9902_v13 = vpop.f32.mrb[107].mxu0 }
0x113c   :  { %v8360_v5 = vadd.f32 %v9900_v11, %v9275_v12 }
0x113e   :  { %v8365_v3 = vmax.f32 %v8360_v5, 0.0 }
0x113f   :  { %8435 = vsyncadd [#allocation4], 1024 }
0x1140   :  { %10952 = dma.done.wait [#allocation4], 1024 }
0x1141   :  { %10953 = vsyncadd [#allocation4], 4294966272  ;;  %s12654_s2 = sld [smem:[#allocation58_spill]]  ;;  %10384 = vmatprep.subr.bf16.mxu1 %v11001_v32  ;;  %10400 = vmatprep.mubr.msk.bf16.mxu1 %vm11002_vm1, %v11001_v32  ;;  %v8439_v4 = vld [vmem:[#allocation3] sm:$0xff]  ;;  %s12655_s7 = sld [smem:[#allocation65_spill]]  ;;  %v8438_v30 = vpack.c.bf16 %v8365_v3, %v8365_v3 }
0x1142   :  { %v8440_v9 = vld [vmem:[#allocation3 + $0x20] sm:$0xff]  ;;  %10385 = vmatpush3.bf16.msra.mxu1 %v8439_v4 }
0x1143   :  { %v8441_v16 = vld [vmem:[#allocation3 + $0x40] sm:$0xff]  ;;  %10386 = vmatprep.subr.bf16.mxu1 %v11001_v32 }
0x1144   :  { %v8442_v18 = vld [vmem:[#allocation3 + $0x60] sm:$0xff] }
0x1145   :  { %v8443_v60 = vld [vmem:[#allocation3 + $0x80] sm:$0xff] }
0x1146   :  { %v8444_v33 = vld [vmem:[#allocation3 + $0xa0] sm:$0xff]  ;;  %10387 = vmatpush3.bf16.msra.mxu1 %v8440_v9 }
0x1147   :  { %v8541_v6 = vld [vmem:[%s12654_s2] sm:$0xff]  ;;  %v8543_v10 = vld [vmem:[%s12654_s2 + $0x8] sm:$0xff]  ;;  %v8545_v44 = vld [vmem:[%s12654_s2 + $0x10] sm:$0xff]  ;;  %10388 = vmatprep.subr.bf16.mxu1 %v11001_v32 }
0x1148   :  { %8542 = vst [vmem:[#allocation3] sm:$0xff] %v8541_v6  ;;  %8544 = vst [vmem:[#allocation3 + $0x20] sm:$0xff] %v8543_v10  ;;  %v8547_v19 = vld [vmem:[%s12654_s2 + $0x18] sm:$0xff]  ;;  %v8549_v22 = vld [vmem:[%s12654_s2 + $0x20] sm:$0xff] }
0x1149   :  { %8546 = vst [vmem:[#allocation3 + $0x40] sm:$0xff] %v8545_v44  ;;  %8548 = vst [vmem:[#allocation3 + $0x60] sm:$0xff] %v8547_v19  ;;  %v8551_v23 = vld [vmem:[%s12654_s2 + $0x28] sm:$0xff]  ;;  %v8553_v25 = vld [vmem:[%s12654_s2 + $0x30] sm:$0xff] }
0x114a   :  { %8550 = vst [vmem:[#allocation3 + $0x80] sm:$0xff] %v8549_v22  ;;  %8552 = vst [vmem:[#allocation3 + $0xa0] sm:$0xff] %v8551_v23  ;;  %v8445_v24 = vld [vmem:[#allocation3 + $0xc0] sm:$0xff]  ;;  %v8555_v8 = vld [vmem:[%s12654_s2 + $0x38] sm:$0xff]  ;;  %10389 = vmatpush3.bf16.msra.mxu1 %v8441_v16 }
0x114b   :  { %8554 = vst [vmem:[#allocation3 + $0xc0] sm:$0xff] %v8553_v25  ;;  %v8446_v26 = vld [vmem:[#allocation3 + $0xe0] sm:$0xff]  ;;  %10390 = vmatprep.subr.bf16.mxu1 %v11001_v32  ;;  %v9276_v31 = vld [vmem:[%s12655_s7] ss:$0 sm:$0xff] }
0x114c   :  { %8556 = vst [vmem:[#allocation3 + $0xe0] sm:$0xff] %v8555_v8 }
0x114e   :  { %10391 = vmatpush3.bf16.msra.mxu1 %v8442_v18 }
0x114f   :  { %10392 = vmatprep.subr.bf16.mxu1 %v11001_v32 }
0x1152   :  { %10393 = vmatpush3.bf16.msra.mxu1 %v8443_v60 }
0x1153   :  { %10394 = vmatprep.subr.bf16.mxu1 %v11001_v32 }
0x1156   :  { %10395 = vmatpush3.bf16.msra.mxu1 %v8444_v33 }
0x1157   :  { %10396 = vmatprep.subr.bf16.mxu1 %v11001_v32 }
0x115a   :  { %10397 = vmatpush3.bf16.msra.mxu1 %v8445_v24 }
0x115b   :  { %10398 = vmatprep.subr.bf16.mxu1 %v11001_v32 }
0x115e   :  { %10399 = vmatpush3.bf16.msra.mxu1 %v8446_v26 }
0x1161   :  { %10401 = vmatmul.mubr.bf16.vlgmr.msra.gmra.mrb[104].mxu1 %v8438_v30 }
0x1234   :  { %v8488_v47 = vpop.f32.mrb[104].mxu1 }
0x1235   :  { %v8489_v37 = vadd.f32 %v9276_v31, %v8488_v47  ;;  %v10402_v27 = vpop.f32.mrb[105].mxu1 }
0x1236   :  { %v8491_v34 = vpop.f32.mrb[106].mxu1 }
0x1237   :  { %v8494_v28 = vmax.f32 %v8489_v37, 0.0  ;;  %v10403_v35 = vpop.f32.mrb[107].mxu1 }
0x1238   :  { %8564 = vsyncadd [#allocation4], 1024 }
0x1239   :  { %10954 = dma.done.wait [#allocation4], 1024 }
0x123a   :  { %10955 = vsyncadd [#allocation4], 4294966272  ;;  %10404 = vmatprep.subr.bf16.mxu0 %v11001_v32  ;;  %10420 = vmatprep.mubr.msk.bf16.mxu0 %vm11002_vm1, %v11001_v32  ;;  %v8568_v39 = vld [vmem:[#allocation3] sm:$0xff]  ;;  %v8567_v21 = vpack.c.bf16 %v8494_v28, %v8494_v28  ;;  %s11003_s10 = smov [#allocation5]  }
0x123b   :  { %10405 = vmatpush3.bf16.msra.mxu0 %v8568_v39  ;;  %v8569_v40 = vld [vmem:[#allocation3 + $0x20] sm:$0xff]  ;;  %s8630_s11 = sshll.u32 %s11003_s10, 4  ;;  %s8631_s11 = int_to_ptr.vmem [resolvable:$true] %s8630_s11 }
0x123c   :  { %10406 = vmatprep.subr.bf16.mxu0 %v11001_v32  ;;  %v8570_v43 = vld [vmem:[#allocation3 + $0x40] sm:$0xff]  ;;  %s10860_s15 = scalar_lea.vmem %s8631_s11, 32  ;;  %p10865_p1 = scmp.lt.s32.totalorder %s8631_s11, %s8631_s11 }
0x123d   :  { %v8571_v46 = vld [vmem:[#allocation3 + $0x60] sm:$0xff]  ;;  %p10861_p0 = scmp.ne.s32.totalorder %s8631_s11, %s10860_s15  ;;  %p10866_p2 = scmp.lt.s32.totalorder %s10860_s15, %s10860_s15 }
0x123e   :  { %v8572_v48 = vld [vmem:[#allocation3 + $0x80] sm:$0xff] }
0x123f   :  { %10407 = vmatpush3.bf16.msra.mxu0 %v8569_v40  ;;  %v8573_v15 = vld [vmem:[#allocation3 + $0xa0] sm:$0xff]  ;;  %p10867_p3 = por %p10866_p2, %p10865_p1 }
0x1240   :  { %10408 = vmatprep.subr.bf16.mxu0 %v11001_v32  ;;  %v8574_v17 = vld [vmem:[#allocation3 + $0xc0] sm:$0xff] }
0x1241   :  { %v8575_v55 = vld [vmem:[#allocation3 + $0xe0] sm:$0xff]  ;;  %p10868_p4 = pnand %p10867_p3, %p10861_p0 }
0x1243   :  { %10409 = vmatpush3.bf16.msra.mxu0 %v8570_v43 }
0x1244   :  { %10410 = vmatprep.subr.bf16.mxu0 %v11001_v32 }
0x1247   :  { %10411 = vmatpush3.bf16.msra.mxu0 %v8571_v46 }
0x1248   :  { %10412 = vmatprep.subr.bf16.mxu0 %v11001_v32 }
0x124b   :  { %10413 = vmatpush3.bf16.msra.mxu0 %v8572_v48 }
0x124c   :  { %10414 = vmatprep.subr.bf16.mxu0 %v11001_v32 }
0x124f   :  { %10415 = vmatpush3.bf16.msra.mxu0 %v8573_v15 }
0x1250   :  { %10416 = vmatprep.subr.bf16.mxu0 %v11001_v32 }
0x1253   :  { %10417 = vmatpush3.bf16.msra.mxu0 %v8574_v17 }
0x1254   :  { %10418 = vmatprep.subr.bf16.mxu0 %v11001_v32 }
0x1257   :  { %10419 = vmatpush3.bf16.msra.mxu0 %v8575_v55 }
0x125a   :  { %10421 = vmatmul.mubr.bf16.vlgmr.msra.gmra.mrb[108].mxu0 %v8567_v21 }
0x125b   :  { %10871 = shalt.err (!%p10868_p4)
}
0x125c   :  { %s10872_s16 = scalar_lea.hbm %s11199_s4, 32 }
0x125d   :  { %p10873_p5 = scmp.ne.s32.totalorder %s11199_s4, %s10872_s16  ;;  %p10876_p6 = scmp.lt.u32.totalorder %s10872_s16, %s11199_s4 }
0x125f   :  { %p10878_p7 = pnand %p10876_p6, %p10873_p5 }
0x1261   :  { %10881 = shalt.err (!%p10878_p7)
}
0x1262   :  { %8633 = dma.vmem_to_hbm [thread:$0]  %s8631_s11, 32, %s11199_s4, [#allocation6]   ;;  %v9277_v32 = vld [vmem:[%s11194_s24] ss:$0 sm:$0xff] }
0x1263   :  { %s11004_s18 = smov [#allocation7]   ;;  %s11005_s5 = smov [#allocation9]  }
0x1264   :  { %s8640_s0 = sshll.u32 %s11004_s18, 4  ;;  %s8650_s9 = sshll.u32 %s11005_s5, 4  ;;  %s8641_s0 = int_to_ptr.vmem [resolvable:$true] %s8640_s0  ;;  %s8651_s9 = int_to_ptr.vmem [resolvable:$true] %s8650_s9 }
0x1265   :  { %s10882_s13 = scalar_lea.vmem %s8641_s0, 32  ;;  %p10887_p9 = scmp.lt.s32.totalorder %s8641_s0, %s8641_s0 }
0x1266   :  { %p10883_p8 = scmp.ne.s32.totalorder %s8641_s0, %s10882_s13  ;;  %p10888_p10 = scmp.lt.s32.totalorder %s10882_s13, %s10882_s13 }
0x1268   :  { %p10889_p11 = por %p10888_p10, %p10887_p9 }
0x126a   :  { %p10890_p12 = pnand %p10889_p11, %p10883_p8 }
0x132d   :  { %v8617_v49 = vpop.f32.mrb[108].mxu0 }
0x132e   :  { %v8618_v50 = vadd.f32 %v9277_v32, %v8617_v49  ;;  %v10422_v51 = vpop.f32.mrb[109].mxu0 }
0x132f   :  { %v8620_v52 = vpop.f32.mrb[110].mxu0 }
0x1330   :  { %8623 = vst [vmem:[#allocation7] sm:$0x3] %v8618_v50  ;;  %v10423_v38 = vpop.f32.mrb[111].mxu0 }
0x1331   :  { %10893 = shalt.err (!%p10890_p12)
}
0x1332   :  { %s10894_s24 = scalar_lea.hbm %s11204_s6, 32 }
0x1333   :  { %p10895_p13 = scmp.ne.s32.totalorder %s11204_s6, %s10894_s24  ;;  %p10898_p0 = scmp.lt.u32.totalorder %s10894_s24, %s11204_s6 }
0x1335   :  { %p10900_p1 = pnand %p10898_p0, %p10895_p13 }
0x1337   :  { %10903 = shalt.err (!%p10900_p1)
}
0x1338   :  { %8643 = dma.vmem_to_hbm [thread:$0]  %s8641_s0, 32, %s11204_s6, [#allocation8]  }
0x1339   :  { %s10904_s4 = scalar_lea.vmem %s8651_s9, 32  ;;  %p10909_p3 = scmp.lt.s32.totalorder %s8651_s9, %s8651_s9 }
0x133a   :  { %p10905_p2 = scmp.ne.s32.totalorder %s8651_s9, %s10904_s4  ;;  %p10910_p4 = scmp.lt.s32.totalorder %s10904_s4, %s10904_s4 }
0x133c   :  { %p10911_p5 = por %p10910_p4, %p10909_p3 }
0x133e   :  { %p10912_p6 = pnand %p10911_p5, %p10905_p2 }
0x1340   :  { %10915 = shalt.err (!%p10912_p6)
}
0x1341   :  { %s10916_s17 = scalar_lea.hbm %s11209_s30, 32 }
0x1342   :  { %p10917_p7 = scmp.ne.s32.totalorder %s11209_s30, %s10916_s17  ;;  %p10920_p8 = scmp.lt.u32.totalorder %s10916_s17, %s11209_s30 }
0x1344   :  { %p10922_p9 = pnand %p10920_p8, %p10917_p7 }
0x1346   :  { %10925 = shalt.err (!%p10922_p9)
}
0x1347   :  { %8653 = dma.vmem_to_hbm [thread:$0]  %s8651_s9, 32, %s11209_s30, [#allocation8]  }
0x1348   :  { %10956 = dma.done.wait [#allocation6], 32  }
0x1349   :  { %10957 = vsyncadd [#allocation6], 4294967264 }
0x134a   :  { %10958 = dma.done.wait [#allocation8], 64  }
0x134b   :  { %10959 = vsyncadd [#allocation8], 4294967232 }
0x134c   :  { %8663 = vsyncpa [#allocation6], 1 }
0x134d   :  { %8664 = vsyncpa [#allocation8], 1 }
0x134e   :  { %8665 = vsyncmov [#allocation4] }
0x1351   :  { %s8666_s6 = vpop.sfrf %8665 }
0x1352   :  { %p9278_p10 = scmp.ne.s32.totalorder %s8666_s6, 0 }
0x1354   :  { %8670 = shalt.err (%p9278_p10)  }

</bundles_post_ra>
